<compile_context>
chip_gen: v5e
topology: v5e:2x2
jax: 0.10.0
libtpu: 0.0.40
codegen_flags: <defaults>
</compile_context>

<pallas_src>
import functools

import numpy as np

import jax
import jax.numpy as jnp
from jax.experimental import pallas as pl
from jax.experimental.pallas import tpu as pltpu


# ----------------------------------------------------------------------------
# Fully fused forward kernel: conv1 -> conv2 -> fc1 -> fc2 -> log_softmax
# ----------------------------------------------------------------------------
def _splitnn_fused_kernel(
    x_ref,       # (N*C0, H*W)      input, rows = (sample, in-chan), cols = (h, w)
    s1_ref,      # (9, H*W, H*W)    conv1 tap-selector (0/1) matrices
    w1_ref,      # (9, N*O1, N*C0)  conv1 per-tap block-diagonal weights, rows (n, o)
    b1_ref,      # (N*O1, 1)        conv1 bias, rows (n, o)
    s2_ref,      # (9, H*W, Ho*Wo)  conv2 stride-2 tap-selector matrices
    w2_ref,      # (9, O2*N, N*O1)  conv2 per-tap block-diagonal weights, rows (o, n)
    b2_ref,      # (O2*N, 1)        conv2 bias, rows (o, n)
    fc1w_ref,    # (O2*Ho*Wo, F1)
    fc1b_ref,    # (1, F1)
    fc2w_ref,    # (F1, F2)
    fc2b_ref,    # (1, F2)
    out_ref,     # (N, F2)
    act2_ref,    # VMEM scratch (O2*N, Ho*Wo)
    *, n_batch, n_taps, o2,
):
    f32 = jnp.float32
    x = x_ref[...]                                                   # (N*C0, 256)

    # ---- conv1 (3x3, stride 1, pad 1) + ReLU: 9 gather + channel matmuls ----
    acc1 = None
    for t in range(n_taps):
        g = jnp.dot(x, s1_ref[t], preferred_element_type=f32)        # (N*C0, 256)
        c = jnp.dot(w1_ref[t], g, preferred_element_type=f32)        # (N*O1, 256)
        acc1 = c if acc1 is None else acc1 + c
    act1 = jnp.maximum(acc1 + b1_ref[...], 0.0)                      # rows (n, o1)

    # ---- conv2 (3x3, stride 2, pad 1) + ReLU ----
    acc2 = None
    for t in range(n_taps):
        g = jnp.dot(act1, s2_ref[t], preferred_element_type=f32)     # (N*O1, 64)
        c = jnp.dot(w2_ref[t], g, preferred_element_type=f32)        # (O2*N, 64)
        acc2 = c if acc2 is None else acc2 + c
    act2_ref[...] = jnp.maximum(acc2 + b2_ref[...], 0.0)             # rows (o2, n)

    # ---- fc1 + ReLU.  torch's `view(-1, 512)` flattens (c, h, w); instead of
    # an in-kernel reshape we accumulate one (N, F1) partial matmul per conv2
    # output channel against the matching Ho*Wo-row block of fc1_w. ----
    hw2 = act2_ref.shape[1]
    y1 = None
    for o in range(o2):
        a = act2_ref[pl.ds(o * n_batch, n_batch), :]                 # (N, Ho*Wo)
        w = fc1w_ref[pl.ds(o * hw2, hw2), :]                         # (Ho*Wo, F1)
        part = jnp.dot(a, w, preferred_element_type=f32)
        y1 = part if y1 is None else y1 + part
    y1 = jnp.maximum(y1 + fc1b_ref[...], 0.0)                        # (N, F1)

    # ---- fc2 + fused log_softmax(dim=1) epilogue ----
    y2 = jnp.dot(y1, fc2w_ref[...], preferred_element_type=f32) + fc2b_ref[...]
    m = jnp.max(y2, axis=1, keepdims=True)
    s = y2 - m
    lse = jnp.log(jnp.sum(jnp.exp(s), axis=1, keepdims=True))
    out_ref[...] = (s - lse).astype(out_ref.dtype)


# ----------------------------------------------------------------------------
# One-time (init) packing helpers — all layout plumbing lives here.
# ----------------------------------------------------------------------------
def _conv_tap_selectors(h_in, w_in, h_out, w_out, stride, padding, ksize=3):
    """sel[t, q, p] = 1 iff tap t of output position p reads input position q
    (taps landing in the zero padding select nothing -> column of zeros)."""
    sel = np.zeros((ksize * ksize, h_in * w_in, h_out * w_out), np.float32)
    for di in range(ksize):
        for dj in range(ksize):
            t = di * ksize + dj
            for ho in range(h_out):
                hi = ho * stride + di - padding
                if hi < 0 or hi >= h_in:
                    continue
                for wo in range(w_out):
                    wi = wo * stride + dj - padding
                    if 0 <= wi < w_in:
                        sel[t, hi * w_in + wi, ho * w_out + wo] = 1.0
    return sel


def _conv1_tap_weights(w, n_batch):
    """(9, N*O, N*C) block-diagonal: out rows (n, o), in cols (n, c)."""
    o_ch, c_ch = w.shape[0], w.shape[1]
    wt = np.asarray(w, np.float32).reshape(o_ch, c_ch, 9)
    out = np.zeros((9, n_batch * o_ch, n_batch * c_ch), np.float32)
    for t in range(9):
        for n in range(n_batch):
            out[t, n * o_ch:(n + 1) * o_ch, n * c_ch:(n + 1) * c_ch] = wt[:, :, t]
    return out


def _conv2_tap_weights(w, n_batch):
    """(9, O*N, N*C) block structure: out rows (o, n), in cols (n, c)."""
    o_ch, c_ch = w.shape[0], w.shape[1]
    wt = np.asarray(w, np.float32).reshape(o_ch, c_ch, 9)
    out = np.zeros((9, o_ch * n_batch, n_batch * c_ch), np.float32)
    for t in range(9):
        for n in range(n_batch):
            for o in range(o_ch):
                out[t, o * n_batch + n, n * c_ch:(n + 1) * c_ch] = wt[o, :, t]
    return out


# ----------------------------------------------------------------------------
# SplitNN: chain of partitioned segments, flattened at the conv->fc boundary
# (the original's `view(-1, 512)`), final view + log_softmax.
# ----------------------------------------------------------------------------
class SplitNN:
    """models[0]: Conv(4->8, k3, s1, p1)+ReLU;  models[1]: Conv(8->8, k3, s2, p1)+ReLU;
    models[2]: Linear(512->64)+ReLU (after view(-1,512));  models[3]: Linear(64->10);
    followed by F.log_softmax(dim=1)."""

    C0, O1, O2 = 4, 8, 8
    H = W = 16
    HO = WO = 8
    F1, F2 = 64, 10

    def __init__(self, params, batch_size):
        self.batch_size = int(batch_size)
        n = self.batch_size
        dev = lambda a: jnp.asarray(a, jnp.float32)
        self._packed = dict(
            s1=dev(_conv_tap_selectors(self.H, self.W, self.H, self.W, 1, 1)),
            w1=dev(_conv1_tap_weights(np.asarray(params["conv1_w"]), n)),
            b1=dev(np.tile(np.asarray(params["conv1_b"]), n).reshape(n * self.O1, 1)),
            s2=dev(_conv_tap_selectors(self.H, self.W, self.HO, self.WO, 2, 1)),
            w2=dev(_conv2_tap_weights(np.asarray(params["conv2_w"]), n)),
            b2=dev(np.repeat(np.asarray(params["conv2_b"]), n).reshape(self.O2 * n, 1)),
            fc1_w=dev(params["fc1_w"]),
            fc1_b=dev(np.asarray(params["fc1_b"]).reshape(1, self.F1)),
            fc2_w=dev(params["fc2_w"]),
            fc2_b=dev(np.asarray(params["fc2_b"]).reshape(1, self.F2)),
        )
        # TODO(synk): PySyft .move()/location transfers, sys.getsizeof-based
        # data_tramission bookkeeping, and backward()/optimizer/zero_grads/step
        # training plumbing are federated glue with no Pallas equivalent; we
        # also do not cache per-segment inputs/outputs (they would capture
        # tracers under jit).

    def forward(self, x):
        n = self.batch_size
        assert x.shape == (n, self.C0, self.H, self.W), x.shape
        p = self._packed
        # Free row-major reshape: rows = (sample, in-channel), cols = (h, w).
        x_rows = x.astype(jnp.float32).reshape(n * self.C0, self.H * self.W)

        kernel = functools.partial(
            _splitnn_fused_kernel, n_batch=n, n_taps=9, o2=self.O2)
        vmem = pl.BlockSpec(memory_space=pltpu.MemorySpace.VMEM)
        return pl.pallas_call(
            kernel,
            out_shape=jax.ShapeDtypeStruct((n, self.F2), jnp.float32),
            in_specs=[vmem] * 11,
            out_specs=vmem,
            scratch_shapes=[
                pltpu.VMEM((self.O2 * n, self.HO * self.WO), jnp.float32)],
        )(x_rows, p["s1"], p["w1"], p["b1"], p["s2"], p["w2"], p["b2"],
          p["fc1_w"], p["fc1_b"], p["fc2_w"], p["fc2_b"])


def init_params(key):
    ks = jax.random.split(key, 8)

    def unif(k, shape, fan_in):
        bound = 1.0 / (fan_in ** 0.5)
        return jax.random.uniform(k, shape, jnp.float32, -bound, bound)

    return {
        "conv1_w": unif(ks[0], (8, 4, 3, 3), 4 * 9),
        "conv1_b": unif(ks[1], (8,), 4 * 9),
        "conv2_w": unif(ks[2], (8, 8, 3, 3), 8 * 9),
        "conv2_b": unif(ks[3], (8,), 8 * 9),
        "fc1_w":   unif(ks[4], (512, 64), 512),
        "fc1_b":   unif(ks[5], (64,), 512),
        "fc2_w":   unif(ks[6], (64, 10), 64),
        "fc2_b":   unif(ks[7], (10,), 64),
    }


def reference_forward(params, x):
    """Pure-JAX (XLA) reference with the original torch semantics."""
    def conv_relu(h, w, b, stride, padding):
        out = jax.lax.conv_general_dilated(
            h, w, window_strides=(stride, stride),
            padding=[(padding, padding), (padding, padding)],
            dimension_numbers=("NCHW", "OIHW", "NCHW"))
        return jax.nn.relu(out + b[None, :, None, None])

    h = conv_relu(x, params["conv1_w"], params["conv1_b"], 1, 1)
    h = conv_relu(h, params["conv2_w"], params["conv2_b"], 2, 1)
    h = h.reshape(-1, 512)
    h = jax.nn.relu(h @ params["fc1_w"] + params["fc1_b"])
    h = h @ params["fc2_w"] + params["fc2_b"]
    return jax.nn.log_softmax(h, axis=1)


if __name__ == "__main__":
    key = jax.random.PRNGKey(0)
    pkey, xkey = jax.random.split(key)
    params = init_params(pkey)
    x = jax.random.normal(xkey, (2, 4, 16, 16), jnp.float32)  # NCHW

    model = SplitNN(params, batch_size=2)
    out = jax.jit(model.forward)(x)
    jax.block_until_ready(out)

    assert out.shape == (2, 10), out.shape
    # log_softmax rows must exp-sum to 1
    assert bool(jnp.allclose(jnp.sum(jnp.exp(out), axis=1), 1.0, atol=1e-4))
    # match the pure-JAX reference (tolerance covers MXU f32 matmul precision)
    ref = reference_forward(params, x)
    assert bool(jnp.allclose(out, ref, atol=2e-2, rtol=2e-2)), (
        float(jnp.max(jnp.abs(out - ref))))
    print("KERNEL_OK")
</pallas_src>

<mosaic_0001>
module attributes {stable_mosaic.version = 11 : i64} {
  func.func @_splitnn_fused_kernel(%arg0: memref<8x256xf32, #tpu.memory_space<vmem>>, %arg1: memref<9x256x256xf32, #tpu.memory_space<vmem>>, %arg2: memref<9x16x8xf32, #tpu.memory_space<vmem>>, %arg3: memref<16x1xf32, #tpu.memory_space<vmem>>, %arg4: memref<9x256x64xf32, #tpu.memory_space<vmem>>, %arg5: memref<9x16x16xf32, #tpu.memory_space<vmem>>, %arg6: memref<16x1xf32, #tpu.memory_space<vmem>>, %arg7: memref<512x64xf32, #tpu.memory_space<vmem>>, %arg8: memref<1x64xf32, #tpu.memory_space<vmem>>, %arg9: memref<64x10xf32, #tpu.memory_space<vmem>>, %arg10: memref<1x10xf32, #tpu.memory_space<vmem>>, %arg11: memref<2x10xf32, #tpu.memory_space<vmem>>, %arg12: memref<16x64xf32, #tpu.memory_space<vmem>>) attributes {dimension_semantics = [], scalar_prefetch = 0 : i64, scratch_operands = 1 : i64, tpu.core_type = #tpu.core_type<tc>} {
    %c0 = arith.constant 0 : index
    %c0_0 = arith.constant 0 : index
    %0 = vector.load %arg0[%c0, %c0_0] : memref<8x256xf32, #tpu.memory_space<vmem>>, vector<8x256xf32>
    %c0_1 = arith.constant 0 : index
    %c0_2 = arith.constant 0 : index
    %c0_3 = arith.constant 0 : index
    %1 = vector.load %arg1[%c0_1, %c0_2, %c0_3] : memref<9x256x256xf32, #tpu.memory_space<vmem>>, vector<1x256x256xf32>
    %2 = vector.shape_cast %1 : vector<1x256x256xf32> to vector<256x256xf32>
    %cst = arith.constant dense<0.000000e+00> : vector<8x256xf32>
    %3 = tpu.matmul %0, %2, %cst {dimension_numbers = #tpu.dot_dimension_numbers<[1], [0], [0], [1], [0, 0, 1, 1], [], []>} : vector<8x256xf32>, vector<256x256xf32>, vector<8x256xf32> -> vector<8x256xf32>
    %c0_4 = arith.constant 0 : index
    %c0_5 = arith.constant 0 : index
    %c0_6 = arith.constant 0 : index
    %4 = vector.load %arg2[%c0_4, %c0_5, %c0_6] : memref<9x16x8xf32, #tpu.memory_space<vmem>>, vector<1x16x8xf32>
    %5 = vector.shape_cast %4 : vector<1x16x8xf32> to vector<16x8xf32>
    %cst_7 = arith.constant dense<0.000000e+00> : vector<16x256xf32>
    %6 = tpu.matmul %5, %3, %cst_7 {dimension_numbers = #tpu.dot_dimension_numbers<[1], [0], [0], [1], [0, 0, 1, 1], [], []>} : vector<16x8xf32>, vector<8x256xf32>, vector<16x256xf32> -> vector<16x256xf32>
    %c1 = arith.constant 1 : index
    %c0_8 = arith.constant 0 : index
    %c0_9 = arith.constant 0 : index
    %7 = vector.load %arg1[%c1, %c0_8, %c0_9] : memref<9x256x256xf32, #tpu.memory_space<vmem>>, vector<1x256x256xf32>
    %8 = vector.shape_cast %7 : vector<1x256x256xf32> to vector<256x256xf32>
    %cst_10 = arith.constant dense<0.000000e+00> : vector<8x256xf32>
    %9 = tpu.matmul %0, %8, %cst_10 {dimension_numbers = #tpu.dot_dimension_numbers<[1], [0], [0], [1], [0, 0, 1, 1], [], []>} : vector<8x256xf32>, vector<256x256xf32>, vector<8x256xf32> -> vector<8x256xf32>
    %c1_11 = arith.constant 1 : index
    %c0_12 = arith.constant 0 : index
    %c0_13 = arith.constant 0 : index
    %10 = vector.load %arg2[%c1_11, %c0_12, %c0_13] : memref<9x16x8xf32, #tpu.memory_space<vmem>>, vector<1x16x8xf32>
    %11 = vector.shape_cast %10 : vector<1x16x8xf32> to vector<16x8xf32>
    %cst_14 = arith.constant dense<0.000000e+00> : vector<16x256xf32>
    %12 = tpu.matmul %11, %9, %cst_14 {dimension_numbers = #tpu.dot_dimension_numbers<[1], [0], [0], [1], [0, 0, 1, 1], [], []>} : vector<16x8xf32>, vector<8x256xf32>, vector<16x256xf32> -> vector<16x256xf32>
    %13 = arith.addf %6, %12 : vector<16x256xf32>
    %c2 = arith.constant 2 : index
    %c0_15 = arith.constant 0 : index
    %c0_16 = arith.constant 0 : index
    %14 = vector.load %arg1[%c2, %c0_15, %c0_16] : memref<9x256x256xf32, #tpu.memory_space<vmem>>, vector<1x256x256xf32>
    %15 = vector.shape_cast %14 : vector<1x256x256xf32> to vector<256x256xf32>
    %cst_17 = arith.constant dense<0.000000e+00> : vector<8x256xf32>
    %16 = tpu.matmul %0, %15, %cst_17 {dimension_numbers = #tpu.dot_dimension_numbers<[1], [0], [0], [1], [0, 0, 1, 1], [], []>} : vector<8x256xf32>, vector<256x256xf32>, vector<8x256xf32> -> vector<8x256xf32>
    %c2_18 = arith.constant 2 : index
    %c0_19 = arith.constant 0 : index
    %c0_20 = arith.constant 0 : index
    %17 = vector.load %arg2[%c2_18, %c0_19, %c0_20] : memref<9x16x8xf32, #tpu.memory_space<vmem>>, vector<1x16x8xf32>
    %18 = vector.shape_cast %17 : vector<1x16x8xf32> to vector<16x8xf32>
    %cst_21 = arith.constant dense<0.000000e+00> : vector<16x256xf32>
    %19 = tpu.matmul %18, %16, %cst_21 {dimension_numbers = #tpu.dot_dimension_numbers<[1], [0], [0], [1], [0, 0, 1, 1], [], []>} : vector<16x8xf32>, vector<8x256xf32>, vector<16x256xf32> -> vector<16x256xf32>
    %20 = arith.addf %13, %19 : vector<16x256xf32>
    %c3 = arith.constant 3 : index
    %c0_22 = arith.constant 0 : index
    %c0_23 = arith.constant 0 : index
    %21 = vector.load %arg1[%c3, %c0_22, %c0_23] : memref<9x256x256xf32, #tpu.memory_space<vmem>>, vector<1x256x256xf32>
    %22 = vector.shape_cast %21 : vector<1x256x256xf32> to vector<256x256xf32>
    %cst_24 = arith.constant dense<0.000000e+00> : vector<8x256xf32>
    %23 = tpu.matmul %0, %22, %cst_24 {dimension_numbers = #tpu.dot_dimension_numbers<[1], [0], [0], [1], [0, 0, 1, 1], [], []>} : vector<8x256xf32>, vector<256x256xf32>, vector<8x256xf32> -> vector<8x256xf32>
    %c3_25 = arith.constant 3 : index
    %c0_26 = arith.constant 0 : index
    %c0_27 = arith.constant 0 : index
    %24 = vector.load %arg2[%c3_25, %c0_26, %c0_27] : memref<9x16x8xf32, #tpu.memory_space<vmem>>, vector<1x16x8xf32>
    %25 = vector.shape_cast %24 : vector<1x16x8xf32> to vector<16x8xf32>
    %cst_28 = arith.constant dense<0.000000e+00> : vector<16x256xf32>
    %26 = tpu.matmul %25, %23, %cst_28 {dimension_numbers = #tpu.dot_dimension_numbers<[1], [0], [0], [1], [0, 0, 1, 1], [], []>} : vector<16x8xf32>, vector<8x256xf32>, vector<16x256xf32> -> vector<16x256xf32>
    %27 = arith.addf %20, %26 : vector<16x256xf32>
    %c4 = arith.constant 4 : index
    %c0_29 = arith.constant 0 : index
    %c0_30 = arith.constant 0 : index
    %28 = vector.load %arg1[%c4, %c0_29, %c0_30] : memref<9x256x256xf32, #tpu.memory_space<vmem>>, vector<1x256x256xf32>
    %29 = vector.shape_cast %28 : vector<1x256x256xf32> to vector<256x256xf32>
    %cst_31 = arith.constant dense<0.000000e+00> : vector<8x256xf32>
    %30 = tpu.matmul %0, %29, %cst_31 {dimension_numbers = #tpu.dot_dimension_numbers<[1], [0], [0], [1], [0, 0, 1, 1], [], []>} : vector<8x256xf32>, vector<256x256xf32>, vector<8x256xf32> -> vector<8x256xf32>
    %c4_32 = arith.constant 4 : index
    %c0_33 = arith.constant 0 : index
    %c0_34 = arith.constant 0 : index
    %31 = vector.load %arg2[%c4_32, %c0_33, %c0_34] : memref<9x16x8xf32, #tpu.memory_space<vmem>>, vector<1x16x8xf32>
    %32 = vector.shape_cast %31 : vector<1x16x8xf32> to vector<16x8xf32>
    %cst_35 = arith.constant dense<0.000000e+00> : vector<16x256xf32>
    %33 = tpu.matmul %32, %30, %cst_35 {dimension_numbers = #tpu.dot_dimension_numbers<[1], [0], [0], [1], [0, 0, 1, 1], [], []>} : vector<16x8xf32>, vector<8x256xf32>, vector<16x256xf32> -> vector<16x256xf32>
    %34 = arith.addf %27, %33 : vector<16x256xf32>
    %c5 = arith.constant 5 : index
    %c0_36 = arith.constant 0 : index
    %c0_37 = arith.constant 0 : index
    %35 = vector.load %arg1[%c5, %c0_36, %c0_37] : memref<9x256x256xf32, #tpu.memory_space<vmem>>, vector<1x256x256xf32>
    %36 = vector.shape_cast %35 : vector<1x256x256xf32> to vector<256x256xf32>
    %cst_38 = arith.constant dense<0.000000e+00> : vector<8x256xf32>
    %37 = tpu.matmul %0, %36, %cst_38 {dimension_numbers = #tpu.dot_dimension_numbers<[1], [0], [0], [1], [0, 0, 1, 1], [], []>} : vector<8x256xf32>, vector<256x256xf32>, vector<8x256xf32> -> vector<8x256xf32>
    %c5_39 = arith.constant 5 : index
    %c0_40 = arith.constant 0 : index
    %c0_41 = arith.constant 0 : index
    %38 = vector.load %arg2[%c5_39, %c0_40, %c0_41] : memref<9x16x8xf32, #tpu.memory_space<vmem>>, vector<1x16x8xf32>
    %39 = vector.shape_cast %38 : vector<1x16x8xf32> to vector<16x8xf32>
    %cst_42 = arith.constant dense<0.000000e+00> : vector<16x256xf32>
    %40 = tpu.matmul %39, %37, %cst_42 {dimension_numbers = #tpu.dot_dimension_numbers<[1], [0], [0], [1], [0, 0, 1, 1], [], []>} : vector<16x8xf32>, vector<8x256xf32>, vector<16x256xf32> -> vector<16x256xf32>
    %41 = arith.addf %34, %40 : vector<16x256xf32>
    %c6 = arith.constant 6 : index
    %c0_43 = arith.constant 0 : index
    %c0_44 = arith.constant 0 : index
    %42 = vector.load %arg1[%c6, %c0_43, %c0_44] : memref<9x256x256xf32, #tpu.memory_space<vmem>>, vector<1x256x256xf32>
    %43 = vector.shape_cast %42 : vector<1x256x256xf32> to vector<256x256xf32>
    %cst_45 = arith.constant dense<0.000000e+00> : vector<8x256xf32>
    %44 = tpu.matmul %0, %43, %cst_45 {dimension_numbers = #tpu.dot_dimension_numbers<[1], [0], [0], [1], [0, 0, 1, 1], [], []>} : vector<8x256xf32>, vector<256x256xf32>, vector<8x256xf32> -> vector<8x256xf32>
    %c6_46 = arith.constant 6 : index
    %c0_47 = arith.constant 0 : index
    %c0_48 = arith.constant 0 : index
    %45 = vector.load %arg2[%c6_46, %c0_47, %c0_48] : memref<9x16x8xf32, #tpu.memory_space<vmem>>, vector<1x16x8xf32>
    %46 = vector.shape_cast %45 : vector<1x16x8xf32> to vector<16x8xf32>
    %cst_49 = arith.constant dense<0.000000e+00> : vector<16x256xf32>
    %47 = tpu.matmul %46, %44, %cst_49 {dimension_numbers = #tpu.dot_dimension_numbers<[1], [0], [0], [1], [0, 0, 1, 1], [], []>} : vector<16x8xf32>, vector<8x256xf32>, vector<16x256xf32> -> vector<16x256xf32>
    %48 = arith.addf %41, %47 : vector<16x256xf32>
    %c7 = arith.constant 7 : index
    %c0_50 = arith.constant 0 : index
    %c0_51 = arith.constant 0 : index
    %49 = vector.load %arg1[%c7, %c0_50, %c0_51] : memref<9x256x256xf32, #tpu.memory_space<vmem>>, vector<1x256x256xf32>
    %50 = vector.shape_cast %49 : vector<1x256x256xf32> to vector<256x256xf32>
    %cst_52 = arith.constant dense<0.000000e+00> : vector<8x256xf32>
    %51 = tpu.matmul %0, %50, %cst_52 {dimension_numbers = #tpu.dot_dimension_numbers<[1], [0], [0], [1], [0, 0, 1, 1], [], []>} : vector<8x256xf32>, vector<256x256xf32>, vector<8x256xf32> -> vector<8x256xf32>
    %c7_53 = arith.constant 7 : index
    %c0_54 = arith.constant 0 : index
    %c0_55 = arith.constant 0 : index
    %52 = vector.load %arg2[%c7_53, %c0_54, %c0_55] : memref<9x16x8xf32, #tpu.memory_space<vmem>>, vector<1x16x8xf32>
    %53 = vector.shape_cast %52 : vector<1x16x8xf32> to vector<16x8xf32>
    %cst_56 = arith.constant dense<0.000000e+00> : vector<16x256xf32>
    %54 = tpu.matmul %53, %51, %cst_56 {dimension_numbers = #tpu.dot_dimension_numbers<[1], [0], [0], [1], [0, 0, 1, 1], [], []>} : vector<16x8xf32>, vector<8x256xf32>, vector<16x256xf32> -> vector<16x256xf32>
    %55 = arith.addf %48, %54 : vector<16x256xf32>
    %c8 = arith.constant 8 : index
    %c0_57 = arith.constant 0 : index
    %c0_58 = arith.constant 0 : index
    %56 = vector.load %arg1[%c8, %c0_57, %c0_58] : memref<9x256x256xf32, #tpu.memory_space<vmem>>, vector<1x256x256xf32>
    %57 = vector.shape_cast %56 : vector<1x256x256xf32> to vector<256x256xf32>
    %cst_59 = arith.constant dense<0.000000e+00> : vector<8x256xf32>
    %58 = tpu.matmul %0, %57, %cst_59 {dimension_numbers = #tpu.dot_dimension_numbers<[1], [0], [0], [1], [0, 0, 1, 1], [], []>} : vector<8x256xf32>, vector<256x256xf32>, vector<8x256xf32> -> vector<8x256xf32>
    %c8_60 = arith.constant 8 : index
    %c0_61 = arith.constant 0 : index
    %c0_62 = arith.constant 0 : index
    %59 = vector.load %arg2[%c8_60, %c0_61, %c0_62] : memref<9x16x8xf32, #tpu.memory_space<vmem>>, vector<1x16x8xf32>
    %60 = vector.shape_cast %59 : vector<1x16x8xf32> to vector<16x8xf32>
    %cst_63 = arith.constant dense<0.000000e+00> : vector<16x256xf32>
    %61 = tpu.matmul %60, %58, %cst_63 {dimension_numbers = #tpu.dot_dimension_numbers<[1], [0], [0], [1], [0, 0, 1, 1], [], []>} : vector<16x8xf32>, vector<8x256xf32>, vector<16x256xf32> -> vector<16x256xf32>
    %62 = arith.addf %55, %61 : vector<16x256xf32>
    %c0_64 = arith.constant 0 : index
    %c0_65 = arith.constant 0 : index
    %63 = vector.load %arg3[%c0_64, %c0_65] : memref<16x1xf32, #tpu.memory_space<vmem>>, vector<16x1xf32>
    %64 = vector.broadcast %63 : vector<16x1xf32> to vector<16x256xf32>
    %65 = arith.addf %62, %64 : vector<16x256xf32>
    %cst_66 = arith.constant 0.000000e+00 : f32
    %66 = vector.broadcast %cst_66 : f32 to vector<16x256xf32>
    %67 = arith.maximumf %65, %66 : vector<16x256xf32>
    %c0_67 = arith.constant 0 : index
    %c0_68 = arith.constant 0 : index
    %c0_69 = arith.constant 0 : index
    %68 = vector.load %arg4[%c0_67, %c0_68, %c0_69] : memref<9x256x64xf32, #tpu.memory_space<vmem>>, vector<1x256x64xf32>
    %69 = vector.shape_cast %68 : vector<1x256x64xf32> to vector<256x64xf32>
    %cst_70 = arith.constant dense<0.000000e+00> : vector<16x64xf32>
    %70 = tpu.matmul %67, %69, %cst_70 {dimension_numbers = #tpu.dot_dimension_numbers<[1], [0], [0], [1], [0, 0, 1, 1], [], []>} : vector<16x256xf32>, vector<256x64xf32>, vector<16x64xf32> -> vector<16x64xf32>
    %c0_71 = arith.constant 0 : index
    %c0_72 = arith.constant 0 : index
    %c0_73 = arith.constant 0 : index
    %71 = vector.load %arg5[%c0_71, %c0_72, %c0_73] : memref<9x16x16xf32, #tpu.memory_space<vmem>>, vector<1x16x16xf32>
    %72 = vector.shape_cast %71 : vector<1x16x16xf32> to vector<16x16xf32>
    %cst_74 = arith.constant dense<0.000000e+00> : vector<16x64xf32>
    %73 = tpu.matmul %72, %70, %cst_74 {dimension_numbers = #tpu.dot_dimension_numbers<[1], [0], [0], [1], [0, 0, 1, 1], [], []>} : vector<16x16xf32>, vector<16x64xf32>, vector<16x64xf32> -> vector<16x64xf32>
    %c1_75 = arith.constant 1 : index
    %c0_76 = arith.constant 0 : index
    %c0_77 = arith.constant 0 : index
    %74 = vector.load %arg4[%c1_75, %c0_76, %c0_77] : memref<9x256x64xf32, #tpu.memory_space<vmem>>, vector<1x256x64xf32>
    %75 = vector.shape_cast %74 : vector<1x256x64xf32> to vector<256x64xf32>
    %cst_78 = arith.constant dense<0.000000e+00> : vector<16x64xf32>
    %76 = tpu.matmul %67, %75, %cst_78 {dimension_numbers = #tpu.dot_dimension_numbers<[1], [0], [0], [1], [0, 0, 1, 1], [], []>} : vector<16x256xf32>, vector<256x64xf32>, vector<16x64xf32> -> vector<16x64xf32>
    %c1_79 = arith.constant 1 : index
    %c0_80 = arith.constant 0 : index
    %c0_81 = arith.constant 0 : index
    %77 = vector.load %arg5[%c1_79, %c0_80, %c0_81] : memref<9x16x16xf32, #tpu.memory_space<vmem>>, vector<1x16x16xf32>
    %78 = vector.shape_cast %77 : vector<1x16x16xf32> to vector<16x16xf32>
    %cst_82 = arith.constant dense<0.000000e+00> : vector<16x64xf32>
    %79 = tpu.matmul %78, %76, %cst_82 {dimension_numbers = #tpu.dot_dimension_numbers<[1], [0], [0], [1], [0, 0, 1, 1], [], []>} : vector<16x16xf32>, vector<16x64xf32>, vector<16x64xf32> -> vector<16x64xf32>
    %80 = arith.addf %73, %79 : vector<16x64xf32>
    %c2_83 = arith.constant 2 : index
    %c0_84 = arith.constant 0 : index
    %c0_85 = arith.constant 0 : index
    %81 = vector.load %arg4[%c2_83, %c0_84, %c0_85] : memref<9x256x64xf32, #tpu.memory_space<vmem>>, vector<1x256x64xf32>
    %82 = vector.shape_cast %81 : vector<1x256x64xf32> to vector<256x64xf32>
    %cst_86 = arith.constant dense<0.000000e+00> : vector<16x64xf32>
    %83 = tpu.matmul %67, %82, %cst_86 {dimension_numbers = #tpu.dot_dimension_numbers<[1], [0], [0], [1], [0, 0, 1, 1], [], []>} : vector<16x256xf32>, vector<256x64xf32>, vector<16x64xf32> -> vector<16x64xf32>
    %c2_87 = arith.constant 2 : index
    %c0_88 = arith.constant 0 : index
    %c0_89 = arith.constant 0 : index
    %84 = vector.load %arg5[%c2_87, %c0_88, %c0_89] : memref<9x16x16xf32, #tpu.memory_space<vmem>>, vector<1x16x16xf32>
    %85 = vector.shape_cast %84 : vector<1x16x16xf32> to vector<16x16xf32>
    %cst_90 = arith.constant dense<0.000000e+00> : vector<16x64xf32>
    %86 = tpu.matmul %85, %83, %cst_90 {dimension_numbers = #tpu.dot_dimension_numbers<[1], [0], [0], [1], [0, 0, 1, 1], [], []>} : vector<16x16xf32>, vector<16x64xf32>, vector<16x64xf32> -> vector<16x64xf32>
    %87 = arith.addf %80, %86 : vector<16x64xf32>
    %c3_91 = arith.constant 3 : index
    %c0_92 = arith.constant 0 : index
    %c0_93 = arith.constant 0 : index
    %88 = vector.load %arg4[%c3_91, %c0_92, %c0_93] : memref<9x256x64xf32, #tpu.memory_space<vmem>>, vector<1x256x64xf32>
    %89 = vector.shape_cast %88 : vector<1x256x64xf32> to vector<256x64xf32>
    %cst_94 = arith.constant dense<0.000000e+00> : vector<16x64xf32>
    %90 = tpu.matmul %67, %89, %cst_94 {dimension_numbers = #tpu.dot_dimension_numbers<[1], [0], [0], [1], [0, 0, 1, 1], [], []>} : vector<16x256xf32>, vector<256x64xf32>, vector<16x64xf32> -> vector<16x64xf32>
    %c3_95 = arith.constant 3 : index
    %c0_96 = arith.constant 0 : index
    %c0_97 = arith.constant 0 : index
    %91 = vector.load %arg5[%c3_95, %c0_96, %c0_97] : memref<9x16x16xf32, #tpu.memory_space<vmem>>, vector<1x16x16xf32>
    %92 = vector.shape_cast %91 : vector<1x16x16xf32> to vector<16x16xf32>
    %cst_98 = arith.constant dense<0.000000e+00> : vector<16x64xf32>
    %93 = tpu.matmul %92, %90, %cst_98 {dimension_numbers = #tpu.dot_dimension_numbers<[1], [0], [0], [1], [0, 0, 1, 1], [], []>} : vector<16x16xf32>, vector<16x64xf32>, vector<16x64xf32> -> vector<16x64xf32>
    %94 = arith.addf %87, %93 : vector<16x64xf32>
    %c4_99 = arith.constant 4 : index
    %c0_100 = arith.constant 0 : index
    %c0_101 = arith.constant 0 : index
    %95 = vector.load %arg4[%c4_99, %c0_100, %c0_101] : memref<9x256x64xf32, #tpu.memory_space<vmem>>, vector<1x256x64xf32>
    %96 = vector.shape_cast %95 : vector<1x256x64xf32> to vector<256x64xf32>
    %cst_102 = arith.constant dense<0.000000e+00> : vector<16x64xf32>
    %97 = tpu.matmul %67, %96, %cst_102 {dimension_numbers = #tpu.dot_dimension_numbers<[1], [0], [0], [1], [0, 0, 1, 1], [], []>} : vector<16x256xf32>, vector<256x64xf32>, vector<16x64xf32> -> vector<16x64xf32>
    %c4_103 = arith.constant 4 : index
    %c0_104 = arith.constant 0 : index
    %c0_105 = arith.constant 0 : index
    %98 = vector.load %arg5[%c4_103, %c0_104, %c0_105] : memref<9x16x16xf32, #tpu.memory_space<vmem>>, vector<1x16x16xf32>
    %99 = vector.shape_cast %98 : vector<1x16x16xf32> to vector<16x16xf32>
    %cst_106 = arith.constant dense<0.000000e+00> : vector<16x64xf32>
    %100 = tpu.matmul %99, %97, %cst_106 {dimension_numbers = #tpu.dot_dimension_numbers<[1], [0], [0], [1], [0, 0, 1, 1], [], []>} : vector<16x16xf32>, vector<16x64xf32>, vector<16x64xf32> -> vector<16x64xf32>
    %101 = arith.addf %94, %100 : vector<16x64xf32>
    %c5_107 = arith.constant 5 : index
    %c0_108 = arith.constant 0 : index
    %c0_109 = arith.constant 0 : index
    %102 = vector.load %arg4[%c5_107, %c0_108, %c0_109] : memref<9x256x64xf32, #tpu.memory_space<vmem>>, vector<1x256x64xf32>
    %103 = vector.shape_cast %102 : vector<1x256x64xf32> to vector<256x64xf32>
    %cst_110 = arith.constant dense<0.000000e+00> : vector<16x64xf32>
    %104 = tpu.matmul %67, %103, %cst_110 {dimension_numbers = #tpu.dot_dimension_numbers<[1], [0], [0], [1], [0, 0, 1, 1], [], []>} : vector<16x256xf32>, vector<256x64xf32>, vector<16x64xf32> -> vector<16x64xf32>
    %c5_111 = arith.constant 5 : index
    %c0_112 = arith.constant 0 : index
    %c0_113 = arith.constant 0 : index
    %105 = vector.load %arg5[%c5_111, %c0_112, %c0_113] : memref<9x16x16xf32, #tpu.memory_space<vmem>>, vector<1x16x16xf32>
    %106 = vector.shape_cast %105 : vector<1x16x16xf32> to vector<16x16xf32>
    %cst_114 = arith.constant dense<0.000000e+00> : vector<16x64xf32>
    %107 = tpu.matmul %106, %104, %cst_114 {dimension_numbers = #tpu.dot_dimension_numbers<[1], [0], [0], [1], [0, 0, 1, 1], [], []>} : vector<16x16xf32>, vector<16x64xf32>, vector<16x64xf32> -> vector<16x64xf32>
    %108 = arith.addf %101, %107 : vector<16x64xf32>
    %c6_115 = arith.constant 6 : index
    %c0_116 = arith.constant 0 : index
    %c0_117 = arith.constant 0 : index
    %109 = vector.load %arg4[%c6_115, %c0_116, %c0_117] : memref<9x256x64xf32, #tpu.memory_space<vmem>>, vector<1x256x64xf32>
    %110 = vector.shape_cast %109 : vector<1x256x64xf32> to vector<256x64xf32>
    %cst_118 = arith.constant dense<0.000000e+00> : vector<16x64xf32>
    %111 = tpu.matmul %67, %110, %cst_118 {dimension_numbers = #tpu.dot_dimension_numbers<[1], [0], [0], [1], [0, 0, 1, 1], [], []>} : vector<16x256xf32>, vector<256x64xf32>, vector<16x64xf32> -> vector<16x64xf32>
    %c6_119 = arith.constant 6 : index
    %c0_120 = arith.constant 0 : index
    %c0_121 = arith.constant 0 : index
    %112 = vector.load %arg5[%c6_119, %c0_120, %c0_121] : memref<9x16x16xf32, #tpu.memory_space<vmem>>, vector<1x16x16xf32>
    %113 = vector.shape_cast %112 : vector<1x16x16xf32> to vector<16x16xf32>
    %cst_122 = arith.constant dense<0.000000e+00> : vector<16x64xf32>
    %114 = tpu.matmul %113, %111, %cst_122 {dimension_numbers = #tpu.dot_dimension_numbers<[1], [0], [0], [1], [0, 0, 1, 1], [], []>} : vector<16x16xf32>, vector<16x64xf32>, vector<16x64xf32> -> vector<16x64xf32>
    %115 = arith.addf %108, %114 : vector<16x64xf32>
    %c7_123 = arith.constant 7 : index
    %c0_124 = arith.constant 0 : index
    %c0_125 = arith.constant 0 : index
    %116 = vector.load %arg4[%c7_123, %c0_124, %c0_125] : memref<9x256x64xf32, #tpu.memory_space<vmem>>, vector<1x256x64xf32>
    %117 = vector.shape_cast %116 : vector<1x256x64xf32> to vector<256x64xf32>
    %cst_126 = arith.constant dense<0.000000e+00> : vector<16x64xf32>
    %118 = tpu.matmul %67, %117, %cst_126 {dimension_numbers = #tpu.dot_dimension_numbers<[1], [0], [0], [1], [0, 0, 1, 1], [], []>} : vector<16x256xf32>, vector<256x64xf32>, vector<16x64xf32> -> vector<16x64xf32>
    %c7_127 = arith.constant 7 : index
    %c0_128 = arith.constant 0 : index
    %c0_129 = arith.constant 0 : index
    %119 = vector.load %arg5[%c7_127, %c0_128, %c0_129] : memref<9x16x16xf32, #tpu.memory_space<vmem>>, vector<1x16x16xf32>
    %120 = vector.shape_cast %119 : vector<1x16x16xf32> to vector<16x16xf32>
    %cst_130 = arith.constant dense<0.000000e+00> : vector<16x64xf32>
    %121 = tpu.matmul %120, %118, %cst_130 {dimension_numbers = #tpu.dot_dimension_numbers<[1], [0], [0], [1], [0, 0, 1, 1], [], []>} : vector<16x16xf32>, vector<16x64xf32>, vector<16x64xf32> -> vector<16x64xf32>
    %122 = arith.addf %115, %121 : vector<16x64xf32>
    %c8_131 = arith.constant 8 : index
    %c0_132 = arith.constant 0 : index
    %c0_133 = arith.constant 0 : index
    %123 = vector.load %arg4[%c8_131, %c0_132, %c0_133] : memref<9x256x64xf32, #tpu.memory_space<vmem>>, vector<1x256x64xf32>
    %124 = vector.shape_cast %123 : vector<1x256x64xf32> to vector<256x64xf32>
    %cst_134 = arith.constant dense<0.000000e+00> : vector<16x64xf32>
    %125 = tpu.matmul %67, %124, %cst_134 {dimension_numbers = #tpu.dot_dimension_numbers<[1], [0], [0], [1], [0, 0, 1, 1], [], []>} : vector<16x256xf32>, vector<256x64xf32>, vector<16x64xf32> -> vector<16x64xf32>
    %c8_135 = arith.constant 8 : index
    %c0_136 = arith.constant 0 : index
    %c0_137 = arith.constant 0 : index
    %126 = vector.load %arg5[%c8_135, %c0_136, %c0_137] : memref<9x16x16xf32, #tpu.memory_space<vmem>>, vector<1x16x16xf32>
    %127 = vector.shape_cast %126 : vector<1x16x16xf32> to vector<16x16xf32>
    %cst_138 = arith.constant dense<0.000000e+00> : vector<16x64xf32>
    %128 = tpu.matmul %127, %125, %cst_138 {dimension_numbers = #tpu.dot_dimension_numbers<[1], [0], [0], [1], [0, 0, 1, 1], [], []>} : vector<16x16xf32>, vector<16x64xf32>, vector<16x64xf32> -> vector<16x64xf32>
    %129 = arith.addf %122, %128 : vector<16x64xf32>
    %c0_139 = arith.constant 0 : index
    %c0_140 = arith.constant 0 : index
    %130 = vector.load %arg6[%c0_139, %c0_140] : memref<16x1xf32, #tpu.memory_space<vmem>>, vector<16x1xf32>
    %131 = vector.broadcast %130 : vector<16x1xf32> to vector<16x64xf32>
    %132 = arith.addf %129, %131 : vector<16x64xf32>
    %cst_141 = arith.constant 0.000000e+00 : f32
    %133 = vector.broadcast %cst_141 : f32 to vector<16x64xf32>
    %134 = arith.maximumf %132, %133 : vector<16x64xf32>
    %c0_142 = arith.constant 0 : index
    %c0_143 = arith.constant 0 : index
    %135 = vector.load %arg12[%c0_142, %c0_143] : memref<16x64xf32, #tpu.memory_space<vmem>>, vector<16x64xf32>
    tpu.vector_store %arg12[%c0_142, %c0_143], %134 {strides = array<i32>} : memref<16x64xf32, #tpu.memory_space<vmem>>, vector<16x64xf32>,
    %c0_144 = arith.constant 0 : index
    %c0_145 = arith.constant 0 : index
    %136 = vector.load %arg12[%c0_144, %c0_145] : memref<16x64xf32, #tpu.memory_space<vmem>>, vector<2x64xf32>
    %c0_146 = arith.constant 0 : index
    %c0_147 = arith.constant 0 : index
    %137 = vector.load %arg7[%c0_146, %c0_147] : memref<512x64xf32, #tpu.memory_space<vmem>>, vector<64x64xf32>
    %cst_148 = arith.constant dense<0.000000e+00> : vector<2x64xf32>
    %138 = tpu.matmul %136, %137, %cst_148 {dimension_numbers = #tpu.dot_dimension_numbers<[1], [0], [0], [1], [0, 0, 1, 1], [], []>} : vector<2x64xf32>, vector<64x64xf32>, vector<2x64xf32> -> vector<2x64xf32>
    %c2_149 = arith.constant 2 : index
    %c0_150 = arith.constant 0 : index
    %139 = vector.load %arg12[%c2_149, %c0_150] : memref<16x64xf32, #tpu.memory_space<vmem>>, vector<2x64xf32>
    %c64 = arith.constant 64 : index
    %c0_151 = arith.constant 0 : index
    %140 = vector.load %arg7[%c64, %c0_151] : memref<512x64xf32, #tpu.memory_space<vmem>>, vector<64x64xf32>
    %cst_152 = arith.constant dense<0.000000e+00> : vector<2x64xf32>
    %141 = tpu.matmul %139, %140, %cst_152 {dimension_numbers = #tpu.dot_dimension_numbers<[1], [0], [0], [1], [0, 0, 1, 1], [], []>} : vector<2x64xf32>, vector<64x64xf32>, vector<2x64xf32> -> vector<2x64xf32>
    %142 = arith.addf %138, %141 : vector<2x64xf32>
    %c4_153 = arith.constant 4 : index
    %c0_154 = arith.constant 0 : index
    %143 = vector.load %arg12[%c4_153, %c0_154] : memref<16x64xf32, #tpu.memory_space<vmem>>, vector<2x64xf32>
    %c128 = arith.constant 128 : index
    %c0_155 = arith.constant 0 : index
    %144 = vector.load %arg7[%c128, %c0_155] : memref<512x64xf32, #tpu.memory_space<vmem>>, vector<64x64xf32>
    %cst_156 = arith.constant dense<0.000000e+00> : vector<2x64xf32>
    %145 = tpu.matmul %143, %144, %cst_156 {dimension_numbers = #tpu.dot_dimension_numbers<[1], [0], [0], [1], [0, 0, 1, 1], [], []>} : vector<2x64xf32>, vector<64x64xf32>, vector<2x64xf32> -> vector<2x64xf32>
    %146 = arith.addf %142, %145 : vector<2x64xf32>
    %c6_157 = arith.constant 6 : index
    %c0_158 = arith.constant 0 : index
    %147 = vector.load %arg12[%c6_157, %c0_158] : memref<16x64xf32, #tpu.memory_space<vmem>>, vector<2x64xf32>
    %c192 = arith.constant 192 : index
    %c0_159 = arith.constant 0 : index
    %148 = vector.load %arg7[%c192, %c0_159] : memref<512x64xf32, #tpu.memory_space<vmem>>, vector<64x64xf32>
    %cst_160 = arith.constant dense<0.000000e+00> : vector<2x64xf32>
    %149 = tpu.matmul %147, %148, %cst_160 {dimension_numbers = #tpu.dot_dimension_numbers<[1], [0], [0], [1], [0, 0, 1, 1], [], []>} : vector<2x64xf32>, vector<64x64xf32>, vector<2x64xf32> -> vector<2x64xf32>
    %150 = arith.addf %146, %149 : vector<2x64xf32>
    %c8_161 = arith.constant 8 : index
    %c0_162 = arith.constant 0 : index
    %151 = vector.load %arg12[%c8_161, %c0_162] : memref<16x64xf32, #tpu.memory_space<vmem>>, vector<2x64xf32>
    %c256 = arith.constant 256 : index
    %c0_163 = arith.constant 0 : index
    %152 = vector.load %arg7[%c256, %c0_163] : memref<512x64xf32, #tpu.memory_space<vmem>>, vector<64x64xf32>
    %cst_164 = arith.constant dense<0.000000e+00> : vector<2x64xf32>
    %153 = tpu.matmul %151, %152, %cst_164 {dimension_numbers = #tpu.dot_dimension_numbers<[1], [0], [0], [1], [0, 0, 1, 1], [], []>} : vector<2x64xf32>, vector<64x64xf32>, vector<2x64xf32> -> vector<2x64xf32>
    %154 = arith.addf %150, %153 : vector<2x64xf32>
    %c10 = arith.constant 10 : index
    %c0_165 = arith.constant 0 : index
    %155 = vector.load %arg12[%c10, %c0_165] : memref<16x64xf32, #tpu.memory_space<vmem>>, vector<2x64xf32>
    %c320 = arith.constant 320 : index
    %c0_166 = arith.constant 0 : index
    %156 = vector.load %arg7[%c320, %c0_166] : memref<512x64xf32, #tpu.memory_space<vmem>>, vector<64x64xf32>
    %cst_167 = arith.constant dense<0.000000e+00> : vector<2x64xf32>
    %157 = tpu.matmul %155, %156, %cst_167 {dimension_numbers = #tpu.dot_dimension_numbers<[1], [0], [0], [1], [0, 0, 1, 1], [], []>} : vector<2x64xf32>, vector<64x64xf32>, vector<2x64xf32> -> vector<2x64xf32>
    %158 = arith.addf %154, %157 : vector<2x64xf32>
    %c12 = arith.constant 12 : index
    %c0_168 = arith.constant 0 : index
    %159 = vector.load %arg12[%c12, %c0_168] : memref<16x64xf32, #tpu.memory_space<vmem>>, vector<2x64xf32>
    %c384 = arith.constant 384 : index
    %c0_169 = arith.constant 0 : index
    %160 = vector.load %arg7[%c384, %c0_169] : memref<512x64xf32, #tpu.memory_space<vmem>>, vector<64x64xf32>
    %cst_170 = arith.constant dense<0.000000e+00> : vector<2x64xf32>
    %161 = tpu.matmul %159, %160, %cst_170 {dimension_numbers = #tpu.dot_dimension_numbers<[1], [0], [0], [1], [0, 0, 1, 1], [], []>} : vector<2x64xf32>, vector<64x64xf32>, vector<2x64xf32> -> vector<2x64xf32>
    %162 = arith.addf %158, %161 : vector<2x64xf32>
    %c14 = arith.constant 14 : index
    %c0_171 = arith.constant 0 : index
    %163 = vector.load %arg12[%c14, %c0_171] : memref<16x64xf32, #tpu.memory_space<vmem>>, vector<2x64xf32>
    %c448 = arith.constant 448 : index
    %c0_172 = arith.constant 0 : index
    %164 = vector.load %arg7[%c448, %c0_172] : memref<512x64xf32, #tpu.memory_space<vmem>>, vector<64x64xf32>
    %cst_173 = arith.constant dense<0.000000e+00> : vector<2x64xf32>
    %165 = tpu.matmul %163, %164, %cst_173 {dimension_numbers = #tpu.dot_dimension_numbers<[1], [0], [0], [1], [0, 0, 1, 1], [], []>} : vector<2x64xf32>, vector<64x64xf32>, vector<2x64xf32> -> vector<2x64xf32>
    %166 = arith.addf %162, %165 : vector<2x64xf32>
    %c0_174 = arith.constant 0 : index
    %c0_175 = arith.constant 0 : index
    %167 = vector.load %arg8[%c0_174, %c0_175] : memref<1x64xf32, #tpu.memory_space<vmem>>, vector<1x64xf32>
    %168 = vector.broadcast %167 : vector<1x64xf32> to vector<2x64xf32>
    %169 = arith.addf %166, %168 : vector<2x64xf32>
    %cst_176 = arith.constant 0.000000e+00 : f32
    %170 = vector.broadcast %cst_176 : f32 to vector<2x64xf32>
    %171 = arith.maximumf %169, %170 : vector<2x64xf32>
    %c0_177 = arith.constant 0 : index
    %c0_178 = arith.constant 0 : index
    %172 = vector.load %arg9[%c0_177, %c0_178] : memref<64x10xf32, #tpu.memory_space<vmem>>, vector<64x10xf32>
    %cst_179 = arith.constant dense<0.000000e+00> : vector<2x10xf32>
    %173 = tpu.matmul %171, %172, %cst_179 {dimension_numbers = #tpu.dot_dimension_numbers<[1], [0], [0], [1], [0, 0, 1, 1], [], []>} : vector<2x64xf32>, vector<64x10xf32>, vector<2x10xf32> -> vector<2x10xf32>
    %c0_180 = arith.constant 0 : index
    %c0_181 = arith.constant 0 : index
    %174 = vector.load %arg10[%c0_180, %c0_181] : memref<1x10xf32, #tpu.memory_space<vmem>>, vector<1x10xf32>
    %175 = vector.broadcast %174 : vector<1x10xf32> to vector<2x10xf32>
    %176 = arith.addf %173, %175 : vector<2x10xf32>
    %cst_182 = arith.constant dense<0xFF800000> : vector<2xf32>
    %177 = vector.multi_reduction <maximumf>, %176, %cst_182 [1] : vector<2x10xf32> to vector<2xf32>
    %178 = vector.shape_cast %177 : vector<2xf32> to vector<2x1xf32>
    %179 = vector.broadcast %178 : vector<2x1xf32> to vector<2x10xf32>
    %180 = arith.subf %176, %179 : vector<2x10xf32>
    %181 = math.exp %180 : vector<2x10xf32>
    %cst_183 = arith.constant dense<0.000000e+00> : vector<2xf32>
    %182 = vector.multi_reduction <add>, %181, %cst_183 [1] : vector<2x10xf32> to vector<2xf32>
    %183 = vector.shape_cast %182 : vector<2xf32> to vector<2x1xf32>
    %184 = math.log %183 : vector<2x1xf32>
    %185 = vector.broadcast %184 : vector<2x1xf32> to vector<2x10xf32>
    %186 = arith.subf %180, %185 : vector<2x10xf32>
    %c0_184 = arith.constant 0 : index
    %c0_185 = arith.constant 0 : index
    %187 = vector.load %arg11[%c0_184, %c0_185] : memref<2x10xf32, #tpu.memory_space<vmem>>, vector<2x10xf32>
    tpu.vector_store %arg11[%c0_184, %c0_185], %186 {strides = array<i32>} : memref<2x10xf32, #tpu.memory_space<vmem>>, vector<2x10xf32>,
    return
  }
}

</mosaic_0001>

<bundles_post_ra>
// kernel: forward.1
= control target key start
LH: loop header
LB: loop body
LE: loop exit
PB: predicated region body
PF: predicated region fallthrough
CT: control target
= control target key end

     0   :  { %16 = vsyncpa [#allocation4], 0  ;;  %s4245_s0 = inlined_call_operand.vmem [shape: f32[8,256], index: 0, kind: input, shape index: {}]   ;;  %s4246_s1 = inlined_call_operand.hbm [shape: f32[9,256,256], index: 1, kind: input, shape index: {}]   ;;  %s4247_s2 = inlined_call_operand.hbm [shape: f32[9,16,8], index: 2, kind: input, shape index: {}]   ;;  %s4248_s3 = inlined_call_operand.hbm [shape: f32[16,1], index: 3, kind: input, shape index: {}]   ;;  %s4249_s4 = inlined_call_operand.hbm [shape: f32[9,256,64], index: 4, kind: input, shape index: {}]   ;;  %s4250_s5 = inlined_call_operand.hbm [shape: f32[9,16,16], index: 5, kind: input, shape index: {}]   ;;  %s4251_s6 = inlined_call_operand.hbm [shape: f32[16,1], index: 6, kind: input, shape index: {}]   ;;  %s4252_s7 = inlined_call_operand.hbm [shape: f32[512,64], index: 7, kind: input, shape index: {}]   ;;  %s4253_s8 = inlined_call_operand.hbm [shape: f32[1,64], index: 8, kind: input, shape index: {}]   ;;  %s4254_s9 = inlined_call_operand.hbm [shape: f32[64,10], index: 9, kind: input, shape index: {}]   ;;  %s4255_s10 = inlined_call_operand.hbm [shape: f32[1,10], index: 10, kind: input, shape index: {}]   ;;  %s4256_s11 = inlined_call_operand.hbm [shape: f32[2,10], index: 11, kind: output, shape index: {}]  }
   0x1   :  { %17 = vsyncpa [#allocation7], 0 }
   0x2   :  { %18 = vsyncpa [#allocation10], 0 }
   0x3   :  { %19 = vsyncpa [#allocation13], 0 }
   0x4   :  { %20 = vsyncpa [#allocation16], 0 }
   0x5   :  { %21 = vsyncpa [#allocation19], 0  ;;  %s42_s19 = sshll.u32 %s4247_s2, 4  ;;  %s43_s19 = int_to_ptr.hbm [resolvable:$true] %s42_s19 }
   0x6   :  { %22 = vsyncpa [#allocation5], 0  ;;  %s3779_s20 = smov [#allocation6]   ;;  %s68_s24 = sshll.u32 %s4249_s4, 4  ;;  %s69_s24 = int_to_ptr.hbm [resolvable:$true] %s68_s24 }
   0x7   :  { %s44_s21 = sshll.u32 %s3779_s20, 4  ;;  %s3780_s25 = smov 128   ;;  %s45_s21 = int_to_ptr.vmem [resolvable:$true] %s44_s21 }
   0x8   :  { %s3781_s26 = smov 8   ;;  %s3782_s27 = smov [#allocation9]  }
   0x9   :  { %50 = dma.hbm_to_vmem [thread:$0]  %s43_s19, 2304, %s45_s21, [#allocation7], %s3780_s25, %s3780_s25, %s3781_s26  }
   0xa   :  { %s70_s28 = sshll.u32 %s3782_s27, 4  ;;  %s94_s30 = sshll.u32 %s4251_s6, 4  ;;  %s71_s28 = int_to_ptr.vmem [resolvable:$true] %s70_s28  ;;  %s95_s30 = int_to_ptr.hbm [resolvable:$true] %s94_s30 }
   0xb   :  { %76 = dma.hbm_to_vmem [thread:$0]  %s69_s24, 36864, %s71_s28, [#allocation10], %s3780_s25, %s3780_s25, %s3781_s26  }
   0xc   :  { %s121_s13 = sshll.u32 %s4253_s8, 4  ;;  %s3783_s14 = smov [#allocation12]   ;;  %s122_s13 = int_to_ptr.hbm [resolvable:$true] %s121_s13 }
   0xd   :  { %s96_s15 = sshll.u32 %s3783_s14, 4  ;;  %s3784_s16 = smov [#allocation15]   ;;  %s97_s15 = int_to_ptr.vmem [resolvable:$true] %s96_s15 }
   0xe   :  { %102 = dma.hbm_to_vmem [thread:$0]  %s95_s30, 256, %s97_s15, [#allocation13], %s3780_s25, %s3780_s25, %s3781_s26  }
   0xf   :  { %s123_s6 = sshll.u32 %s3784_s16, 4  ;;  %s29_s19 = sshll.u32 %s4246_s1, 4  ;;  %s124_s6 = int_to_ptr.vmem [resolvable:$true] %s123_s6  ;;  %s30_s19 = int_to_ptr.hbm [resolvable:$true] %s29_s19 }
  0x10   :  { %126 = dma.hbm_to_vmem [thread:$0]  %s122_s13, 16, %s124_s6, [#allocation16]  }
  0x11   :  { %s3785_s20 = smov [#allocation3]   ;;  %s55_s23 = sshll.u32 %s4248_s3, 4  ;;  %s56_s23 = int_to_ptr.hbm [resolvable:$true] %s55_s23 }
  0x12   :  { %s31_s21 = sshll.u32 %s3785_s20, 4  ;;  %s3786_s24 = smov 256   ;;  %s32_s21 = int_to_ptr.vmem [resolvable:$true] %s31_s21 }
  0x13   :  { %s3787_s27 = smov 16   ;;  %s3788_s28 = smov [#allocation8]  }
  0x14   :  { %37 = dma.hbm_to_vmem [thread:$0]  %s30_s19, 73728, %s32_s21, [#allocation4], %s3786_s24, %s3786_s24, %s3787_s27  }
  0x15   :  { %s57_s29 = sshll.u32 %s3788_s28, 4  ;;  %s81_s1 = sshll.u32 %s4250_s5, 4  ;;  %s58_s29 = int_to_ptr.vmem [resolvable:$true] %s57_s29  ;;  %s82_s1 = int_to_ptr.hbm [resolvable:$true] %s81_s1 }
  0x16   :  { %63 = dma.hbm_to_vmem [thread:$0]  %s56_s23, 256, %s58_s29, [#allocation7], %s3780_s25, %s3780_s25, %s3781_s26  }
  0x17   :  { %s107_s3 = sshll.u32 %s4252_s7, 4  ;;  %s3789_s13 = smov [#allocation11]   ;;  %s108_s3 = int_to_ptr.hbm [resolvable:$true] %s107_s3 }
  0x18   :  { %s83_s14 = sshll.u32 %s3789_s13, 4  ;;  %s3790_s15 = smov [#allocation14]   ;;  %s84_s14 = int_to_ptr.vmem [resolvable:$true] %s83_s14 }
  0x19   :  { %89 = dma.hbm_to_vmem [thread:$0]  %s82_s1, 2304, %s84_s14, [#allocation10], %s3780_s25, %s3780_s25, %s3781_s26  }
  0x1a   :  { %s109_s5 = sshll.u32 %s3790_s15, 4  ;;  %s131_s17 = sshll.u32 %s4254_s9, 4  ;;  %s110_s5 = int_to_ptr.vmem [resolvable:$true] %s109_s5  ;;  %s132_s17 = int_to_ptr.hbm [resolvable:$true] %s131_s17 }
  0x1b   :  { %115 = dma.hbm_to_vmem [thread:$0]  %s108_s3, 8192, %s110_s5, [#allocation13], %s3780_s25, %s3780_s25, %s3781_s26  }
  0x1c   :  { %s145_s19 = sshll.u32 %s4255_s10, 4  ;;  %s3791_s20 = smov [#allocation17]   ;;  %s146_s19 = int_to_ptr.hbm [resolvable:$true] %s145_s19 }
  0x1d   :  { %s133_s21 = sshll.u32 %s3791_s20, 4  ;;  %s3792_s8 = smov [#allocation18]   ;;  %s134_s21 = int_to_ptr.vmem [resolvable:$true] %s133_s21 }
  0x1e   :  { %139 = dma.hbm_to_vmem [thread:$0]  %s132_s17, 1024, %s134_s21, [#allocation16], %s3780_s25, %s3780_s25, %s3781_s26  }
  0x1f   :  { %s147_s9 = sshll.u32 %s3792_s8, 4  ;;  %s148_s9 = int_to_ptr.vmem [resolvable:$true] %s147_s9 }
  0x20   :  { %150 = dma.hbm_to_vmem [thread:$0]  %s146_s19, 16, %s148_s9, [#allocation19]  }
  0x21   :  { %3765 = dma.done.wait [#allocation4], 73728  }
  0x22   :  { %3766 = vsyncadd [#allocation4], 4294893568 }
  0x23   :  { %3767 = dma.done.wait [#allocation7], 2560  }
  0x24   :  { %3768 = vsyncadd [#allocation7], 4294964736 }
  0x25   :  { %3769 = dma.done.wait [#allocation10], 39168  }
  0x26   :  { %3770 = vsyncadd [#allocation10], 4294928128 }
  0x27   :  { %3771 = dma.done.wait [#allocation13], 8448  }
  0x28   :  { %3772 = vsyncadd [#allocation13], 4294958848 }
  0x29   :  { %3773 = dma.done.wait [#allocation16], 1040  }
  0x2a   :  { %3774 = vsyncadd [#allocation16], 4294966256 }
  0x2b   :  { %3775 = dma.done.wait [#allocation19], 16  }
  0x2c   :  { %3776 = vsyncadd [#allocation19], 4294967280  ;;  %v224_v0 = vld [vmem:[#allocation3 + $0xf8] sm:$0xff]  ;;  %v222_v2 = vld [vmem:[#allocation3 + $0xe8] sm:$0xff]  ;;  %vm487_vm0 = vcmask 64512   ;;  %vm2202_vm1 = vcmask 130048  }
  0x2d   :  { %v256_v1 = vld [vmem:[#allocation3 + $0x1f8] sm:$0xff]  ;;  %297 = vmatpush.msra.mxu2 %v224_v0  ;;  %v254_v3 = vld [vmem:[#allocation3 + $0x1e8] sm:$0xff]  ;;  %v223_v6 = vld [vmem:[#allocation3 + $0xf0] sm:$0xff]  ;;  %vm3068_vm2 = vcmask 523264   ;;  %vm3374_vm3 = vcmask 74752   ;;  %s3395_s13 = sshll.u32 %s4256_s11, 4  ;;  %s3396_s13 = int_to_ptr.hbm [resolvable:$true] %s3395_s13 }
  0x2e   :  { %317 = vmatpush.msra.mxu3 %v256_v1  ;;  %v220_v4 = vld [vmem:[#allocation3 + $0xd8] sm:$0xff]  ;;  %v255_v7 = vld [vmem:[#allocation3 + $0x1f0] sm:$0xff]  ;;  %v221_v8 = vld [vmem:[#allocation3 + $0xe0] sm:$0xff]  ;;  %257 = vmatpush.msra.mxu0 %v223_v6 }
  0x2f   :  { %v252_v5 = vld [vmem:[#allocation3 + $0x1d8] sm:$0xff]  ;;  %298 = vmatpush.msra.mxu2 %v222_v2  ;;  %v253_v9 = vld [vmem:[#allocation3 + $0x1e0] sm:$0xff]  ;;  %277 = vmatpush.msra.mxu1 %v255_v7  ;;  %v218_v10 = vld [vmem:[#allocation3 + $0xc8] sm:$0xff] }
  0x30   :  { %318 = vmatpush.msra.mxu3 %v254_v3  ;;  %v250_v11 = vld [vmem:[#allocation3 + $0x1c8] sm:$0xff]  ;;  %v219_v12 = vld [vmem:[#allocation3 + $0xd0] sm:$0xff]  ;;  %258 = vmatpush.msra.mxu0 %v221_v8  ;;  %v216_v14 = vld [vmem:[#allocation3 + $0xb8] sm:$0xff] }
  0x31   :  { %299 = vmatpush.msra.mxu2 %v220_v4  ;;  %v251_v13 = vld [vmem:[#allocation3 + $0x1d0] sm:$0xff]  ;;  %278 = vmatpush.msra.mxu1 %v253_v9  ;;  %v248_v15 = vld [vmem:[#allocation3 + $0x1b8] sm:$0xff]  ;;  %v217_v16 = vld [vmem:[#allocation3 + $0xc0] sm:$0xff] }
  0x32   :  { %319 = vmatpush.msra.mxu3 %v252_v5  ;;  %v249_v17 = vld [vmem:[#allocation3 + $0x1c0] sm:$0xff]  ;;  %259 = vmatpush.msra.mxu0 %v219_v12  ;;  %v214_v18 = vld [vmem:[#allocation3 + $0xa8] sm:$0xff]  ;;  %v215_v20 = vld [vmem:[#allocation3 + $0xb0] sm:$0xff] }
  0x33   :  { %300 = vmatpush.msra.mxu2 %v218_v10  ;;  %279 = vmatpush.msra.mxu1 %v251_v13  ;;  %v246_v19 = vld [vmem:[#allocation3 + $0x1a8] sm:$0xff]  ;;  %v247_v21 = vld [vmem:[#allocation3 + $0x1b0] sm:$0xff]  ;;  %v212_v22 = vld [vmem:[#allocation3 + $0x98] sm:$0xff] }
  0x34   :  { %320 = vmatpush.msra.mxu3 %v250_v11  ;;  %260 = vmatpush.msra.mxu0 %v217_v16  ;;  %v244_v23 = vld [vmem:[#allocation3 + $0x198] sm:$0xff]  ;;  %v213_v24 = vld [vmem:[#allocation3 + $0xa0] sm:$0xff]  ;;  %v210_v26 = vld [vmem:[#allocation3 + $0x88] sm:$0xff] }
  0x35   :  { %301 = vmatpush.msra.mxu2 %v216_v14  ;;  %280 = vmatpush.msra.mxu1 %v249_v17  ;;  %v245_v25 = vld [vmem:[#allocation3 + $0x1a0] sm:$0xff]  ;;  %v242_v27 = vld [vmem:[#allocation3 + $0x188] sm:$0xff]  ;;  %v211_v28 = vld [vmem:[#allocation3 + $0x90] sm:$0xff] }
  0x36   :  { %321 = vmatpush.msra.mxu3 %v248_v15  ;;  %261 = vmatpush.msra.mxu0 %v215_v20  ;;  %v243_v29 = vld [vmem:[#allocation3 + $0x190] sm:$0xff]  ;;  %v208_v30 = vld [vmem:[#allocation3 + $0x78] sm:$0xff]  ;;  %v209_v32 = vld [vmem:[#allocation3 + $0x80] sm:$0xff] }
  0x37   :  { %302 = vmatpush.msra.mxu2 %v214_v18  ;;  %281 = vmatpush.msra.mxu1 %v247_v21  ;;  %v240_v31 = vld [vmem:[#allocation3 + $0x178] sm:$0xff]  ;;  %v241_v33 = vld [vmem:[#allocation3 + $0x180] sm:$0xff]  ;;  %v206_v34 = vld [vmem:[#allocation3 + $0x68] sm:$0xff] }
  0x38   :  { %322 = vmatpush.msra.mxu3 %v246_v19  ;;  %262 = vmatpush.msra.mxu0 %v213_v24  ;;  %v238_v35 = vld [vmem:[#allocation3 + $0x168] sm:$0xff]  ;;  %v207_v36 = vld [vmem:[#allocation3 + $0x70] sm:$0xff]  ;;  %v204_v38 = vld [vmem:[#allocation3 + $0x58] sm:$0xff] }
  0x39   :  { %303 = vmatpush.msra.mxu2 %v212_v22  ;;  %282 = vmatpush.msra.mxu1 %v245_v25  ;;  %v239_v37 = vld [vmem:[#allocation3 + $0x170] sm:$0xff]  ;;  %v236_v39 = vld [vmem:[#allocation3 + $0x158] sm:$0xff]  ;;  %v205_v40 = vld [vmem:[#allocation3 + $0x60] sm:$0xff] }
  0x3a   :  { %323 = vmatpush.msra.mxu3 %v244_v23  ;;  %263 = vmatpush.msra.mxu0 %v211_v28  ;;  %v237_v41 = vld [vmem:[#allocation3 + $0x160] sm:$0xff]  ;;  %v202_v42 = vld [vmem:[#allocation3 + $0x48] sm:$0xff]  ;;  %v203_v44 = vld [vmem:[#allocation3 + $0x50] sm:$0xff] }
  0x3b   :  { %304 = vmatpush.msra.mxu2 %v210_v26  ;;  %283 = vmatpush.msra.mxu1 %v243_v29  ;;  %v234_v43 = vld [vmem:[#allocation3 + $0x148] sm:$0xff]  ;;  %v235_v45 = vld [vmem:[#allocation3 + $0x150] sm:$0xff]  ;;  %v200_v46 = vld [vmem:[#allocation3 + $0x38] sm:$0xff] }
  0x3c   :  { %324 = vmatpush.msra.mxu3 %v242_v27  ;;  %264 = vmatpush.msra.mxu0 %v209_v32  ;;  %v232_v47 = vld [vmem:[#allocation3 + $0x138] sm:$0xff]  ;;  %v201_v48 = vld [vmem:[#allocation3 + $0x40] sm:$0xff]  ;;  %v198_v50 = vld [vmem:[#allocation3 + $0x28] sm:$0xff] }
  0x3d   :  { %305 = vmatpush.msra.mxu2 %v208_v30  ;;  %284 = vmatpush.msra.mxu1 %v241_v33  ;;  %v233_v49 = vld [vmem:[#allocation3 + $0x140] sm:$0xff]  ;;  %v230_v51 = vld [vmem:[#allocation3 + $0x128] sm:$0xff]  ;;  %v199_v52 = vld [vmem:[#allocation3 + $0x30] sm:$0xff] }
  0x3e   :  { %325 = vmatpush.msra.mxu3 %v240_v31  ;;  %265 = vmatpush.msra.mxu0 %v207_v36  ;;  %v231_v53 = vld [vmem:[#allocation3 + $0x130] sm:$0xff]  ;;  %v196_v54 = vld [vmem:[#allocation3 + $0x18] sm:$0xff]  ;;  %v197_v56 = vld [vmem:[#allocation3 + $0x20] sm:$0xff] }
  0x3f   :  { %306 = vmatpush.msra.mxu2 %v206_v34  ;;  %285 = vmatpush.msra.mxu1 %v239_v37  ;;  %v228_v55 = vld [vmem:[#allocation3 + $0x118] sm:$0xff]  ;;  %v229_v57 = vld [vmem:[#allocation3 + $0x120] sm:$0xff]  ;;  %v194_v58 = vld [vmem:[#allocation3 + $0x8] sm:$0xff] }
  0x40   :  { %326 = vmatpush.msra.mxu3 %v238_v35  ;;  %266 = vmatpush.msra.mxu0 %v205_v40  ;;  %v226_v59 = vld [vmem:[#allocation3 + $0x108] sm:$0xff]  ;;  %v3909_v60 = vld [vmem:[%s4245_s0] sm:$0xff]  ;;  %v3914_v61 = vld [vmem:[%s4245_s0 + $0x8] sm:$0xff] }
  0x41   :  { %307 = vmatpush.msra.mxu2 %v204_v38  ;;  %286 = vmatpush.msra.mxu1 %v237_v41  ;;  %v371_v62 = vld [vmem:[#allocation3 + $0x2f8] sm:$0xff]  ;;  %v195_v0 = vld [vmem:[#allocation3 + $0x10] sm:$0xff]  ;;  %v369_v2 = vld [vmem:[#allocation3 + $0x2e8] sm:$0xff] }
  0x42   :  { %327 = vmatpush.msra.mxu3 %v236_v39  ;;  %267 = vmatpush.msra.mxu0 %v203_v44  ;;  %v403_v63 = vld [vmem:[#allocation3 + $0x3f8] sm:$0xff]  ;;  %v227_v1 = vld [vmem:[#allocation3 + $0x110] sm:$0xff]  ;;  %v401_v3 = vld [vmem:[#allocation3 + $0x3e8] sm:$0xff] }
  0x43   :  { %308 = vmatpush.msra.mxu2 %v202_v42  ;;  %287 = vmatpush.msra.mxu1 %v235_v45  ;;  %v193_v4 = vld [vmem:[#allocation3] sm:$0xff]  ;;  %v367_v6 = vld [vmem:[#allocation3 + $0x2d8] sm:$0xff]  ;;  %v370_v8 = vld [vmem:[#allocation3 + $0x2f0] sm:$0xff] }
  0x44   :  { %328 = vmatpush.msra.mxu3 %v234_v43  ;;  %268 = vmatpush.msra.mxu0 %v201_v48  ;;  %v225_v5 = vld [vmem:[#allocation3 + $0x100] sm:$0xff]  ;;  %v399_v7 = vld [vmem:[#allocation3 + $0x3d8] sm:$0xff]  ;;  %v402_v9 = vld [vmem:[#allocation3 + $0x3f0] sm:$0xff] }
  0x45   :  { %309 = vmatpush.msra.mxu2 %v200_v46  ;;  %288 = vmatpush.msra.mxu1 %v233_v49  ;;  %v365_v10 = vld [vmem:[#allocation3 + $0x2c8] sm:$0xff]  ;;  %v368_v12 = vld [vmem:[#allocation3 + $0x2e0] sm:$0xff]  ;;  %v363_v14 = vld [vmem:[#allocation3 + $0x2b8] sm:$0xff] }
  0x46   :  { %329 = vmatpush.msra.mxu3 %v232_v47  ;;  %269 = vmatpush.msra.mxu0 %v199_v52  ;;  %v397_v11 = vld [vmem:[#allocation3 + $0x3c8] sm:$0xff]  ;;  %v400_v13 = vld [vmem:[#allocation3 + $0x3e0] sm:$0xff]  ;;  %v395_v15 = vld [vmem:[#allocation3 + $0x3b8] sm:$0xff] }
  0x47   :  { %310 = vmatpush.msra.mxu2 %v198_v50  ;;  %289 = vmatpush.msra.mxu1 %v231_v53  ;;  %v366_v16 = vld [vmem:[#allocation3 + $0x2d0] sm:$0xff]  ;;  %v361_v18 = vld [vmem:[#allocation3 + $0x2a8] sm:$0xff]  ;;  %v364_v20 = vld [vmem:[#allocation3 + $0x2c0] sm:$0xff] }
  0x48   :  { %330 = vmatpush.msra.mxu3 %v230_v51  ;;  %270 = vmatpush.msra.mxu0 %v197_v56  ;;  %v398_v17 = vld [vmem:[#allocation3 + $0x3d0] sm:$0xff]  ;;  %v393_v19 = vld [vmem:[#allocation3 + $0x3a8] sm:$0xff]  ;;  %v396_v21 = vld [vmem:[#allocation3 + $0x3c0] sm:$0xff] }
  0x49   :  { %311 = vmatpush.msra.mxu2 %v196_v54  ;;  %290 = vmatpush.msra.mxu1 %v229_v57  ;;  %v359_v22 = vld [vmem:[#allocation3 + $0x298] sm:$0xff]  ;;  %v362_v24 = vld [vmem:[#allocation3 + $0x2b0] sm:$0xff]  ;;  %v357_v26 = vld [vmem:[#allocation3 + $0x288] sm:$0xff] }
  0x4a   :  { %331 = vmatpush.msra.mxu3 %v228_v55  ;;  %271 = vmatpush.msra.mxu0 %v195_v0  ;;  %v391_v23 = vld [vmem:[#allocation3 + $0x398] sm:$0xff]  ;;  %v394_v25 = vld [vmem:[#allocation3 + $0x3b0] sm:$0xff]  ;;  %v389_v27 = vld [vmem:[#allocation3 + $0x388] sm:$0xff] }
  0x4b   :  { %312 = vmatpush.msra.mxu2 %v194_v58  ;;  %291 = vmatpush.msra.mxu1 %v227_v1  ;;  %v360_v28 = vld [vmem:[#allocation3 + $0x2a0] sm:$0xff]  ;;  %v355_v30 = vld [vmem:[#allocation3 + $0x278] sm:$0xff]  ;;  %v358_v32 = vld [vmem:[#allocation3 + $0x290] sm:$0xff] }
  0x4c   :  { %332 = vmatpush.msra.mxu3 %v226_v59  ;;  %313 = vmatmul.f32.vlgmr.msra.gmra.mxu2 %v3909_v60  ;;  %v392_v29 = vld [vmem:[#allocation3 + $0x3a0] sm:$0xff]  ;;  %v387_v31 = vld [vmem:[#allocation3 + $0x378] sm:$0xff]  ;;  %v390_v33 = vld [vmem:[#allocation3 + $0x390] sm:$0xff] }
  0x4d   :  { %333 = vmatmul.f32.vlgmr.msra.gmra.mxu3 %v3914_v61  ;;  %444 = vmatpush.msrb.mxu2 %v371_v62  ;;  %v353_v34 = vld [vmem:[#allocation3 + $0x268] sm:$0xff]  ;;  %v356_v36 = vld [vmem:[#allocation3 + $0x280] sm:$0xff]  ;;  %v351_v38 = vld [vmem:[#allocation3 + $0x258] sm:$0xff] }
  0x4e   :  { %464 = vmatpush.msrb.mxu3 %v403_v63  ;;  %272 = vmatpush.msra.mxu0 %v193_v4  ;;  %v385_v35 = vld [vmem:[#allocation3 + $0x368] sm:$0xff]  ;;  %v388_v37 = vld [vmem:[#allocation3 + $0x380] sm:$0xff]  ;;  %v383_v39 = vld [vmem:[#allocation3 + $0x358] sm:$0xff] }
  0x4f   :  { %445 = vmatpush.msrb.mxu2 %v369_v2  ;;  %292 = vmatpush.msra.mxu1 %v225_v5  ;;  %v354_v40 = vld [vmem:[#allocation3 + $0x270] sm:$0xff]  ;;  %v349_v42 = vld [vmem:[#allocation3 + $0x248] sm:$0xff]  ;;  %v352_v44 = vld [vmem:[#allocation3 + $0x260] sm:$0xff] }
  0x50   :  { %465 = vmatpush.msrb.mxu3 %v401_v3  ;;  %273 = vmatmul.f32.vlgmr.msra.gmra.mxu0 %v3909_v60  ;;  %v386_v41 = vld [vmem:[#allocation3 + $0x370] sm:$0xff]  ;;  %v381_v43 = vld [vmem:[#allocation3 + $0x348] sm:$0xff]  ;;  %v384_v45 = vld [vmem:[#allocation3 + $0x360] sm:$0xff] }
  0x51   :  { %446 = vmatpush.msrb.mxu2 %v367_v6  ;;  %293 = vmatmul.f32.vlgmr.msra.gmra.mxu1 %v3914_v61  ;;  %v347_v46 = vld [vmem:[#allocation3 + $0x238] sm:$0xff]  ;;  %v350_v48 = vld [vmem:[#allocation3 + $0x250] sm:$0xff]  ;;  %v345_v50 = vld [vmem:[#allocation3 + $0x228] sm:$0xff] }
  0x52   :  { %466 = vmatpush.msrb.mxu3 %v399_v7  ;;  %404 = vmatpush.msrb.mxu0 %v370_v8  ;;  %v379_v47 = vld [vmem:[#allocation3 + $0x338] sm:$0xff]  ;;  %v382_v49 = vld [vmem:[#allocation3 + $0x350] sm:$0xff]  ;;  %v377_v51 = vld [vmem:[#allocation3 + $0x328] sm:$0xff] }
  0x53   :  { %424 = vmatpush.msrb.mxu1 %v402_v9  ;;  %447 = vmatpush.msrb.mxu2 %v365_v10  ;;  %v348_v52 = vld [vmem:[#allocation3 + $0x240] sm:$0xff]  ;;  %v343_v54 = vld [vmem:[#allocation3 + $0x218] sm:$0xff]  ;;  %v346_v56 = vld [vmem:[#allocation3 + $0x230] sm:$0xff] }
  0x54   :  { %467 = vmatpush.msrb.mxu3 %v397_v11  ;;  %405 = vmatpush.msrb.mxu0 %v368_v12  ;;  %v380_v53 = vld [vmem:[#allocation3 + $0x340] sm:$0xff]  ;;  %v375_v55 = vld [vmem:[#allocation3 + $0x318] sm:$0xff]  ;;  %v378_v57 = vld [vmem:[#allocation3 + $0x330] sm:$0xff] }
  0x55   :  { %425 = vmatpush.msrb.mxu1 %v400_v13  ;;  %448 = vmatpush.msrb.mxu2 %v363_v14  ;;  %v341_v58 = vld [vmem:[#allocation3 + $0x208] sm:$0xff]  ;;  %v344_v62 = vld [vmem:[#allocation3 + $0x220] sm:$0xff]  ;;  %v342_v0 = vld [vmem:[#allocation3 + $0x210] sm:$0xff] }
  0x56   :  { %468 = vmatpush.msrb.mxu3 %v395_v15  ;;  %406 = vmatpush.msrb.mxu0 %v366_v16  ;;  %v373_v59 = vld [vmem:[#allocation3 + $0x308] sm:$0xff]  ;;  %v376_v63 = vld [vmem:[#allocation3 + $0x320] sm:$0xff]  ;;  %v374_v1 = vld [vmem:[#allocation3 + $0x310] sm:$0xff] }
  0x57   :  { %426 = vmatpush.msrb.mxu1 %v398_v17  ;;  %449 = vmatpush.msrb.mxu2 %v361_v18  ;;  %v340_v2 = vld [vmem:[#allocation3 + $0x200] sm:$0xff]  ;;  %v624_v9 = vld [vmem:[#allocation3 + $0x4f8] sm:$0xff]  ;;  %v622_v13 = vld [vmem:[#allocation3 + $0x4e8] sm:$0xff] }
  0x58   :  { %469 = vmatpush.msrb.mxu3 %v393_v19  ;;  %407 = vmatpush.msrb.mxu0 %v364_v20  ;;  %v372_v3 = vld [vmem:[#allocation3 + $0x300] sm:$0xff]  ;;  %v656_v11 = vld [vmem:[#allocation3 + $0x5f8] sm:$0xff]  ;;  %v654_v14 = vld [vmem:[#allocation3 + $0x5e8] sm:$0xff] }
  0x59   :  { %427 = vmatpush.msrb.mxu1 %v396_v21  ;;  %450 = vmatpush.msrb.mxu2 %v359_v22  ;;  %v337_v12 = vld [vmem:[#allocation6] sm:$0xff]  ;;  %v620_v15 = vld [vmem:[#allocation3 + $0x4d8] sm:$0xff]  ;;  %v618_v17 = vld [vmem:[#allocation3 + $0x4c8] sm:$0xff] }
  0x5a   :  { %470 = vmatpush.msrb.mxu3 %v391_v23  ;;  %408 = vmatpush.msrb.mxu0 %v362_v24  ;;  %v652_v16 = vld [vmem:[#allocation3 + $0x5d8] sm:$0xff]  ;;  %v650_v18 = vld [vmem:[#allocation3 + $0x5c8] sm:$0xff] }
  0x5b   :  { %428 = vmatpush.msrb.mxu1 %v394_v25  ;;  %451 = vmatpush.msrb.mxu2 %v357_v26  ;;  %v616_v19 = vld [vmem:[#allocation3 + $0x4b8] sm:$0xff]  ;;  %v338_v21 = vld [vmem:[#allocation6 + $0x8] sm:$0xff] }
  0x5c   :  { %471 = vmatpush.msrb.mxu3 %v389_v27  ;;  %409 = vmatpush.msrb.mxu0 %v360_v28  ;;  %v648_v20 = vld [vmem:[#allocation3 + $0x5b8] sm:$0xff]  ;;  %v614_v22 = vld [vmem:[#allocation3 + $0x4a8] sm:$0xff] }
  0x5d   :  { %429 = vmatpush.msrb.mxu1 %v392_v29  ;;  %452 = vmatpush.msrb.mxu2 %v355_v30  ;;  %v646_v23 = vld [vmem:[#allocation3 + $0x5a8] sm:$0xff]  ;;  %v612_v24 = vld [vmem:[#allocation3 + $0x498] sm:$0xff] }
  0x5e   :  { %472 = vmatpush.msrb.mxu3 %v387_v31  ;;  %410 = vmatpush.msrb.mxu0 %v358_v32  ;;  %v644_v25 = vld [vmem:[#allocation3 + $0x598] sm:$0xff]  ;;  %v610_v26 = vld [vmem:[#allocation3 + $0x488] sm:$0xff] }
  0x5f   :  { %430 = vmatpush.msrb.mxu1 %v390_v33  ;;  %453 = vmatpush.msrb.mxu2 %v353_v34  ;;  %v642_v27 = vld [vmem:[#allocation3 + $0x588] sm:$0xff]  ;;  %v608_v28 = vld [vmem:[#allocation3 + $0x478] sm:$0xff] }
  0x60   :  { %473 = vmatpush.msrb.mxu3 %v385_v35  ;;  %411 = vmatpush.msrb.mxu0 %v356_v36  ;;  %v640_v29 = vld [vmem:[#allocation3 + $0x578] sm:$0xff]  ;;  %v606_v30 = vld [vmem:[#allocation3 + $0x468] sm:$0xff] }
  0x61   :  { %431 = vmatpush.msrb.mxu1 %v388_v37  ;;  %454 = vmatpush.msrb.mxu2 %v351_v38  ;;  %v638_v31 = vld [vmem:[#allocation3 + $0x568] sm:$0xff]  ;;  %v604_v32 = vld [vmem:[#allocation3 + $0x458] sm:$0xff] }
  0x62   :  { %474 = vmatpush.msrb.mxu3 %v383_v39  ;;  %412 = vmatpush.msrb.mxu0 %v354_v40  ;;  %v636_v33 = vld [vmem:[#allocation3 + $0x558] sm:$0xff]  ;;  %v602_v34 = vld [vmem:[#allocation3 + $0x448] sm:$0xff] }
  0x63   :  { %432 = vmatpush.msrb.mxu1 %v386_v41  ;;  %455 = vmatpush.msrb.mxu2 %v349_v42  ;;  %v634_v35 = vld [vmem:[#allocation3 + $0x548] sm:$0xff]  ;;  %v600_v36 = vld [vmem:[#allocation3 + $0x438] sm:$0xff] }
  0x64   :  { %475 = vmatpush.msrb.mxu3 %v381_v43  ;;  %413 = vmatpush.msrb.mxu0 %v352_v44  ;;  %v632_v37 = vld [vmem:[#allocation3 + $0x538] sm:$0xff]  ;;  %v598_v38 = vld [vmem:[#allocation3 + $0x428] sm:$0xff] }
  0x65   :  { %433 = vmatpush.msrb.mxu1 %v384_v45  ;;  %456 = vmatpush.msrb.mxu2 %v347_v46  ;;  %v630_v39 = vld [vmem:[#allocation3 + $0x528] sm:$0xff]  ;;  %v596_v40 = vld [vmem:[#allocation3 + $0x418] sm:$0xff] }
  0x66   :  { %476 = vmatpush.msrb.mxu3 %v379_v47  ;;  %414 = vmatpush.msrb.mxu0 %v350_v48  ;;  %v628_v41 = vld [vmem:[#allocation3 + $0x518] sm:$0xff]  ;;  %v594_v42 = vld [vmem:[#allocation3 + $0x408] sm:$0xff] }
  0x67   :  { %434 = vmatpush.msrb.mxu1 %v382_v49  ;;  %457 = vmatpush.msrb.mxu2 %v345_v50  ;;  %v626_v43 = vld [vmem:[#allocation3 + $0x508] sm:$0xff]  ;;  %v623_v49 = vld [vmem:[#allocation3 + $0x4f0] sm:$0xff] }
  0x68   :  { %477 = vmatpush.msrb.mxu3 %v377_v51  ;;  %415 = vmatpush.msrb.mxu0 %v348_v52  ;;  %v655_v51 = vld [vmem:[#allocation3 + $0x5f0] sm:$0xff] }
  0x69   :  { %435 = vmatpush.msrb.mxu1 %v380_v53  ;;  %458 = vmatpush.msrb.mxu2 %v343_v54  ;;  %v827_v52 = vld [vmem:[#allocation3 + $0x6f0] sm:$0xff]  ;;  %v621_v54 = vld [vmem:[#allocation3 + $0x4e0] sm:$0xff] }
  0x6a   :  { %478 = vmatpush.msrb.mxu3 %v375_v55  ;;  %416 = vmatpush.msrb.mxu0 %v346_v56  ;;  %v859_v53 = vld [vmem:[#allocation3 + $0x7f0] sm:$0xff]  ;;  %v653_v55 = vld [vmem:[#allocation3 + $0x5e0] sm:$0xff] }
  0x6b   :  { %436 = vmatpush.msrb.mxu1 %v378_v57  ;;  %459 = vmatpush.msrb.mxu2 %v341_v58  ;;  %v825_v56 = vld [vmem:[#allocation3 + $0x6e0] sm:$0xff]  ;;  %v619_v58 = vld [vmem:[#allocation3 + $0x4d0] sm:$0xff] }
  0x6c   :  { %479 = vmatpush.msrb.mxu3 %v373_v59  ;;  %460 = vmatmul.f32.vlgmr.msrb.gmra.mxu2 %v3909_v60  ;;  %v857_v57 = vld [vmem:[#allocation3 + $0x7e0] sm:$0xff]  ;;  %v651_v59 = vld [vmem:[#allocation3 + $0x5d0] sm:$0xff] }
  0x6d   :  { %480 = vmatmul.f32.vlgmr.msrb.gmra.mxu3 %v3914_v61  ;;  %417 = vmatpush.msrb.mxu0 %v344_v62  ;;  %v823_v62 = vld [vmem:[#allocation3 + $0x6d0] sm:$0xff] }
  0x6e   :  { %437 = vmatpush.msrb.mxu1 %v376_v63  ;;  %v855_v63 = vld [vmem:[#allocation3 + $0x7d0] sm:$0xff] }
  0x6f   :  { %418 = vmatpush.msrb.mxu0 %v342_v0  ;;  %v617_v0 = vld [vmem:[#allocation3 + $0x4c0] sm:$0xff] }
  0x70   :  { %438 = vmatpush.msrb.mxu1 %v374_v1  ;;  %v649_v1 = vld [vmem:[#allocation3 + $0x5c0] sm:$0xff] }
  0x71   :  { %419 = vmatpush.msrb.mxu0 %v340_v2  ;;  %v821_v2 = vld [vmem:[#allocation3 + $0x6c0] sm:$0xff] }
  0x72   :  { %439 = vmatpush.msrb.mxu1 %v372_v3  ;;  %420 = vmatmul.f32.vlgmr.msrb.gmra.mxu0 %v3909_v60  ;;  %v853_v3 = vld [vmem:[#allocation3 + $0x7c0] sm:$0xff] }
  0x73   :  { %440 = vmatmul.f32.vlgmr.msrb.gmra.mxu1 %v3914_v61 }
  0xcd   :  { %v274_v4 = vpop.f32.mrf.mxu0 }
  0xce   :  { %v294_v5 = vpop.f32.mrf.mxu1 }
  0xcf   :  { %v295_v6 = vadd.f32 %v294_v5, %v274_v4  ;;  %v314_v7 = vpop.f32.mrf.mxu2  ;;  %v615_v4 = vld [vmem:[#allocation3 + $0x4b0] sm:$0xff] }
  0xd0   :  { %v334_v8 = vpop.f32.mrf.mxu3  ;;  %v647_v5 = vld [vmem:[#allocation3 + $0x5b0] sm:$0xff] }
  0xd1   :  { %v335_v10 = vadd.f32 %v334_v8, %v314_v7  ;;  %561 = vmatpush.msra.mxu2 %v295_v6  ;;  %v819_v6 = vld [vmem:[#allocation3 + $0x6b0] sm:$0xff]  ;;  %v613_v8 = vld [vmem:[#allocation3 + $0x4a0] sm:$0xff] }
  0xd2   :  { %3414 = vmatmul.msk.f32.vlgmr.msra.gmra.mxu2 %vm487_vm0, %v337_v12  ;;  %v851_v7 = vld [vmem:[#allocation3 + $0x7b0] sm:$0xff] }
  0xd3   :  { %584 = vmatpush.msra.mxu3 %v335_v10  ;;  %697 = vmatpush.msrb.mxu2 %v624_v9  ;;  %v645_v9 = vld [vmem:[#allocation3 + $0x5a0] sm:$0xff] }
  0xd4   :  { %3416 = vmatmul.msk.f32.vlgmr.msra.gmra.mxu3 %vm487_vm0, %v337_v12  ;;  %v817_v10 = vld [vmem:[#allocation3 + $0x6a0] sm:$0xff]  ;;  %v611_v12 = vld [vmem:[#allocation3 + $0x490] sm:$0xff] }
  0xd5   :  { %717 = vmatpush.msrb.mxu3 %v656_v11  ;;  %698 = vmatpush.msrb.mxu2 %v622_v13  ;;  %v849_v11 = vld [vmem:[#allocation3 + $0x7a0] sm:$0xff]  ;;  %v643_v13 = vld [vmem:[#allocation3 + $0x590] sm:$0xff] }
  0xd7   :  { %718 = vmatpush.msrb.mxu3 %v654_v14  ;;  %699 = vmatpush.msrb.mxu2 %v620_v15  ;;  %v815_v14 = vld [vmem:[#allocation3 + $0x690] sm:$0xff] }
  0xd8   :  { %v847_v15 = vld [vmem:[#allocation3 + $0x790] sm:$0xff] }
  0xd9   :  { %719 = vmatpush.msrb.mxu3 %v652_v16  ;;  %700 = vmatpush.msrb.mxu2 %v618_v17  ;;  %v609_v16 = vld [vmem:[#allocation3 + $0x480] sm:$0xff] }
  0xda   :  { %3415 = vmatmul.msk.f32.gmra.mxu2 %vm487_vm0, %v338_v21  ;;  %v641_v17 = vld [vmem:[#allocation3 + $0x580] sm:$0xff] }
  0xdb   :  { %720 = vmatpush.msrb.mxu3 %v650_v18  ;;  %701 = vmatpush.msrb.mxu2 %v616_v19  ;;  %v813_v18 = vld [vmem:[#allocation3 + $0x680] sm:$0xff] }
  0xdc   :  { %3417 = vmatmul.msk.f32.gmra.mxu3 %vm487_vm0, %v338_v21  ;;  %v845_v19 = vld [vmem:[#allocation3 + $0x780] sm:$0xff]  ;;  %v607_v21 = vld [vmem:[#allocation3 + $0x470] sm:$0xff] }
  0xdd   :  { %721 = vmatpush.msrb.mxu3 %v648_v20  ;;  %702 = vmatpush.msrb.mxu2 %v614_v22  ;;  %v485_v20 = vld [vmem:[#allocation6 + $0x10] sm:$0xff] }
  0xde   :  { %v639_v22 = vld [vmem:[#allocation3 + $0x570] sm:$0xff] }
  0xdf   :  { %722 = vmatpush.msrb.mxu3 %v646_v23  ;;  %703 = vmatpush.msrb.mxu2 %v612_v24  ;;  %v811_v23 = vld [vmem:[#allocation3 + $0x670] sm:$0xff] }
  0xe0   :  { %v843_v24 = vld [vmem:[#allocation3 + $0x770] sm:$0xff] }
  0xe1   :  { %723 = vmatpush.msrb.mxu3 %v644_v25  ;;  %704 = vmatpush.msrb.mxu2 %v610_v26  ;;  %v605_v25 = vld [vmem:[#allocation3 + $0x460] sm:$0xff] }
  0xe2   :  { %v637_v26 = vld [vmem:[#allocation3 + $0x560] sm:$0xff] }
  0xe3   :  { %724 = vmatpush.msrb.mxu3 %v642_v27  ;;  %705 = vmatpush.msrb.mxu2 %v608_v28  ;;  %v809_v27 = vld [vmem:[#allocation3 + $0x660] sm:$0xff] }
  0xe4   :  { %v841_v28 = vld [vmem:[#allocation3 + $0x760] sm:$0xff] }
  0xe5   :  { %725 = vmatpush.msrb.mxu3 %v640_v29  ;;  %706 = vmatpush.msrb.mxu2 %v606_v30  ;;  %v603_v29 = vld [vmem:[#allocation3 + $0x450] sm:$0xff] }
  0xe6   :  { %v635_v30 = vld [vmem:[#allocation3 + $0x550] sm:$0xff] }
  0xe7   :  { %726 = vmatpush.msrb.mxu3 %v638_v31  ;;  %707 = vmatpush.msrb.mxu2 %v604_v32  ;;  %v807_v31 = vld [vmem:[#allocation3 + $0x650] sm:$0xff] }
  0xe8   :  { %v839_v32 = vld [vmem:[#allocation3 + $0x750] sm:$0xff] }
  0xe9   :  { %727 = vmatpush.msrb.mxu3 %v636_v33  ;;  %708 = vmatpush.msrb.mxu2 %v602_v34  ;;  %v601_v33 = vld [vmem:[#allocation3 + $0x440] sm:$0xff] }
  0xea   :  { %v633_v34 = vld [vmem:[#allocation3 + $0x540] sm:$0xff] }
  0xeb   :  { %728 = vmatpush.msrb.mxu3 %v634_v35  ;;  %709 = vmatpush.msrb.mxu2 %v600_v36  ;;  %v805_v35 = vld [vmem:[#allocation3 + $0x640] sm:$0xff] }
  0xec   :  { %v837_v36 = vld [vmem:[#allocation3 + $0x740] sm:$0xff] }
  0xed   :  { %729 = vmatpush.msrb.mxu3 %v632_v37  ;;  %710 = vmatpush.msrb.mxu2 %v598_v38  ;;  %v486_v37 = vld [vmem:[#allocation6 + $0x18] sm:$0xff]  ;;  %v599_v38 = vld [vmem:[#allocation3 + $0x430] sm:$0xff] }
  0xef   :  { %730 = vmatpush.msrb.mxu3 %v630_v39  ;;  %711 = vmatpush.msrb.mxu2 %v596_v40  ;;  %v421_v44 = vpop.f32.mrf.mxu0  ;;  %v461_v47 = vpop.f32.mrf.mxu2  ;;  %v631_v39 = vld [vmem:[#allocation3 + $0x530] sm:$0xff] }
  0xf0   :  { %v441_v45 = vpop.f32.mrf.mxu1  ;;  %v481_v48 = vpop.f32.mrf.mxu3  ;;  %v803_v40 = vld [vmem:[#allocation3 + $0x630] sm:$0xff] }
  0xf1   :  { %731 = vmatpush.msrb.mxu3 %v628_v41  ;;  %v442_v46 = vadd.f32 %v441_v45, %v421_v44  ;;  %712 = vmatpush.msrb.mxu2 %v594_v42  ;;  %v482_v50 = vadd.f32 %v481_v48, %v461_v47  ;;  %v835_v41 = vld [vmem:[#allocation3 + $0x730] sm:$0xff]  ;;  %v597_v42 = vld [vmem:[#allocation3 + $0x420] sm:$0xff] }
  0xf2   :  { %713 = vmatmul.f32.vlgmr.msrb.gmra.mxu2 %v3909_v60  ;;  %v801_v44 = vld [vmem:[#allocation3 + $0x620] sm:$0xff]  ;;  %v627_v47 = vld [vmem:[#allocation3 + $0x510] sm:$0xff] }
  0xf3   :  { %732 = vmatpush.msrb.mxu3 %v626_v43  ;;  %509 = vmatpush.msra.mxu0 %v442_v46  ;;  %v629_v43 = vld [vmem:[#allocation3 + $0x520] sm:$0xff]  ;;  %v595_v46 = vld [vmem:[#allocation3 + $0x410] sm:$0xff] }
  0xf4   :  { %733 = vmatmul.f32.vlgmr.msrb.gmra.mxu3 %v3914_v61  ;;  %532 = vmatpush.msra.mxu1 %v482_v50  ;;  %v833_v45 = vld [vmem:[#allocation3 + $0x720] sm:$0xff]  ;;  %v799_v48 = vld [vmem:[#allocation3 + $0x610] sm:$0xff] }
  0xf5   :  { %657 = vmatpush.msrb.mxu0 %v623_v49  ;;  %861 = vmatpush.msra.mxu2 %v827_v52  ;;  %v831_v49 = vld [vmem:[#allocation3 + $0x710] sm:$0xff]  ;;  %v593_v50 = vld [vmem:[#allocation3 + $0x400] sm:$0xff] }
  0xf6   :  { %677 = vmatpush.msrb.mxu1 %v655_v51  ;;  %881 = vmatpush.msra.mxu3 %v859_v53  ;;  %v625_v51 = vld [vmem:[#allocation3 + $0x500] sm:$0xff] }
  0xf7   :  { %658 = vmatpush.msrb.mxu0 %v621_v54  ;;  %862 = vmatpush.msra.mxu2 %v825_v56  ;;  %v797_v52 = vld [vmem:[#allocation3 + $0x600] sm:$0xff] }
  0xf8   :  { %678 = vmatpush.msrb.mxu1 %v653_v55  ;;  %882 = vmatpush.msra.mxu3 %v857_v57  ;;  %v829_v53 = vld [vmem:[#allocation3 + $0x700] sm:$0xff] }
  0xf9   :  { %659 = vmatpush.msrb.mxu0 %v619_v58  ;;  %863 = vmatpush.msra.mxu2 %v823_v62 }
  0xfa   :  { %679 = vmatpush.msrb.mxu1 %v651_v59  ;;  %883 = vmatpush.msra.mxu3 %v855_v63  ;;  %v738_v63 = vld [vmem:[#allocation6 + $0x20] sm:$0xff] }
  0xfb   :  { %660 = vmatpush.msrb.mxu0 %v617_v0  ;;  %864 = vmatpush.msra.mxu2 %v821_v2  ;;  %v860_v0 = vld [vmem:[#allocation3 + $0x7f8] sm:$0xff] }
  0xfc   :  { %680 = vmatpush.msrb.mxu1 %v649_v1  ;;  %884 = vmatpush.msra.mxu3 %v853_v3  ;;  %v858_v1 = vld [vmem:[#allocation3 + $0x7e8] sm:$0xff]  ;;  %v856_v2 = vld [vmem:[#allocation3 + $0x7d8] sm:$0xff] }
  0xfd   :  { %661 = vmatpush.msrb.mxu0 %v615_v4  ;;  %865 = vmatpush.msra.mxu2 %v819_v6  ;;  %v854_v3 = vld [vmem:[#allocation3 + $0x7c8] sm:$0xff] }
  0xfe   :  { %681 = vmatpush.msrb.mxu1 %v647_v5  ;;  %885 = vmatpush.msra.mxu3 %v851_v7  ;;  %v739_v4 = vld [vmem:[#allocation6 + $0x28] sm:$0xff]  ;;  %v852_v5 = vld [vmem:[#allocation3 + $0x7b8] sm:$0xff] }
  0xff   :  { %662 = vmatpush.msrb.mxu0 %v613_v8  ;;  %866 = vmatpush.msra.mxu2 %v817_v10  ;;  %v850_v8 = vld [vmem:[#allocation3 + $0x7a8] sm:$0xff] }
 0x100   :  { %682 = vmatpush.msrb.mxu1 %v645_v9  ;;  %886 = vmatpush.msra.mxu3 %v849_v11  ;;  %v848_v9 = vld [vmem:[#allocation3 + $0x798] sm:$0xff]  ;;  %v846_v10 = vld [vmem:[#allocation3 + $0x788] sm:$0xff] }
 0x101   :  { %663 = vmatpush.msrb.mxu0 %v611_v12  ;;  %867 = vmatpush.msra.mxu2 %v815_v14  ;;  %v844_v11 = vld [vmem:[#allocation3 + $0x778] sm:$0xff] }
 0x102   :  { %683 = vmatpush.msrb.mxu1 %v643_v13  ;;  %887 = vmatpush.msra.mxu3 %v847_v15  ;;  %v842_v13 = vld [vmem:[#allocation3 + $0x768] sm:$0xff]  ;;  %v840_v15 = vld [vmem:[#allocation3 + $0x758] sm:$0xff] }
 0x103   :  { %664 = vmatpush.msrb.mxu0 %v609_v16  ;;  %868 = vmatpush.msra.mxu2 %v813_v18  ;;  %v838_v16 = vld [vmem:[#allocation3 + $0x748] sm:$0xff] }
 0x104   :  { %684 = vmatpush.msrb.mxu1 %v641_v17  ;;  %888 = vmatpush.msra.mxu3 %v845_v19  ;;  %v836_v17 = vld [vmem:[#allocation3 + $0x738] sm:$0xff]  ;;  %v834_v18 = vld [vmem:[#allocation3 + $0x728] sm:$0xff] }
 0x105   :  { %3410 = vmatmul.msk.f32.vlgmr.msra.gmra.mxu0 %vm487_vm0, %v485_v20  ;;  %3412 = vmatmul.msk.f32.vlgmr.msra.gmra.mxu1 %vm487_vm0, %v485_v20 }
 0x106   :  { %665 = vmatpush.msrb.mxu0 %v607_v21  ;;  %685 = vmatpush.msrb.mxu1 %v639_v22  ;;  %v832_v21 = vld [vmem:[#allocation3 + $0x718] sm:$0xff] }
 0x107   :  { %869 = vmatpush.msra.mxu2 %v811_v23  ;;  %889 = vmatpush.msra.mxu3 %v843_v24  ;;  %v828_v23 = vld [vmem:[#allocation3 + $0x6f8] sm:$0xff]  ;;  %v830_v24 = vld [vmem:[#allocation3 + $0x708] sm:$0xff] }
 0x108   :  { %666 = vmatpush.msrb.mxu0 %v605_v25  ;;  %686 = vmatpush.msrb.mxu1 %v637_v26  ;;  %v826_v25 = vld [vmem:[#allocation3 + $0x6e8] sm:$0xff]  ;;  %v1063_v26 = vld [vmem:[#allocation3 + $0x9f0] sm:$0xff] }
 0x109   :  { %870 = vmatpush.msra.mxu2 %v809_v27  ;;  %890 = vmatpush.msra.mxu3 %v841_v28  ;;  %v824_v28 = vld [vmem:[#allocation3 + $0x6d8] sm:$0xff] }
 0x10a   :  { %667 = vmatpush.msrb.mxu0 %v603_v29  ;;  %687 = vmatpush.msrb.mxu1 %v635_v30  ;;  %v1061_v29 = vld [vmem:[#allocation3 + $0x9e0] sm:$0xff] }
 0x10b   :  { %871 = vmatpush.msra.mxu2 %v807_v31  ;;  %891 = vmatpush.msra.mxu3 %v839_v32  ;;  %v822_v32 = vld [vmem:[#allocation3 + $0x6c8] sm:$0xff] }
 0x10c   :  { %668 = vmatpush.msrb.mxu0 %v601_v33  ;;  %688 = vmatpush.msrb.mxu1 %v633_v34  ;;  %v3958_v33 = vld [vmem:[#allocation6 + $0x30] sm:$0xff] }
 0x10d   :  { %872 = vmatpush.msra.mxu2 %v805_v35  ;;  %892 = vmatpush.msra.mxu3 %v837_v36  ;;  %v1059_v34 = vld [vmem:[#allocation3 + $0x9d0] sm:$0xff]  ;;  %v820_v35 = vld [vmem:[#allocation3 + $0x6b8] sm:$0xff]  ;;  %v1057_v36 = vld [vmem:[#allocation3 + $0x9c0] sm:$0xff] }
 0x10e   :  { %3411 = vmatmul.msk.f32.gmra.mxu0 %vm487_vm0, %v486_v37  ;;  %3413 = vmatmul.msk.f32.gmra.mxu1 %vm487_vm0, %v486_v37  ;;  %v818_v37 = vld [vmem:[#allocation3 + $0x6a8] sm:$0xff] }
 0x10f   :  { %669 = vmatpush.msrb.mxu0 %v599_v38  ;;  %689 = vmatpush.msrb.mxu1 %v631_v39  ;;  %v1055_v38 = vld [vmem:[#allocation3 + $0x9b0] sm:$0xff]  ;;  %v816_v39 = vld [vmem:[#allocation3 + $0x698] sm:$0xff] }
 0x110   :  { %873 = vmatpush.msra.mxu2 %v803_v40  ;;  %893 = vmatpush.msra.mxu3 %v835_v41  ;;  %v1053_v40 = vld [vmem:[#allocation3 + $0x9a0] sm:$0xff]  ;;  %v814_v41 = vld [vmem:[#allocation3 + $0x688] sm:$0xff] }
 0x111   :  { %670 = vmatpush.msrb.mxu0 %v597_v42  ;;  %690 = vmatpush.msrb.mxu1 %v629_v43  ;;  %v3963_v42 = vld [vmem:[#allocation6 + $0x38] sm:$0xff]  ;;  %v1051_v43 = vld [vmem:[#allocation3 + $0x990] sm:$0xff] }
 0x112   :  { %874 = vmatpush.msra.mxu2 %v801_v44  ;;  %894 = vmatpush.msra.mxu3 %v833_v45  ;;  %v812_v44 = vld [vmem:[#allocation3 + $0x678] sm:$0xff]  ;;  %v1049_v45 = vld [vmem:[#allocation3 + $0x980] sm:$0xff] }
 0x113   :  { %671 = vmatpush.msrb.mxu0 %v595_v46  ;;  %691 = vmatpush.msrb.mxu1 %v627_v47  ;;  %v810_v46 = vld [vmem:[#allocation3 + $0x668] sm:$0xff]  ;;  %v1047_v47 = vld [vmem:[#allocation3 + $0x970] sm:$0xff] }
 0x114   :  { %875 = vmatpush.msra.mxu2 %v799_v48  ;;  %895 = vmatpush.msra.mxu3 %v831_v49  ;;  %v808_v48 = vld [vmem:[#allocation3 + $0x658] sm:$0xff]  ;;  %v1045_v49 = vld [vmem:[#allocation3 + $0x960] sm:$0xff] }
 0x115   :  { %672 = vmatpush.msrb.mxu0 %v593_v50  ;;  %692 = vmatpush.msrb.mxu1 %v625_v51  ;;  %v806_v50 = vld [vmem:[#allocation3 + $0x648] sm:$0xff]  ;;  %v1043_v51 = vld [vmem:[#allocation3 + $0x950] sm:$0xff] }
 0x116   :  { %876 = vmatpush.msra.mxu2 %v797_v52  ;;  %896 = vmatpush.msra.mxu3 %v829_v53  ;;  %v804_v52 = vld [vmem:[#allocation3 + $0x638] sm:$0xff]  ;;  %v1041_v53 = vld [vmem:[#allocation3 + $0x940] sm:$0xff] }
 0x117   :  { %673 = vmatmul.f32.vlgmr.msrb.gmra.mxu0 %v3909_v60  ;;  %693 = vmatmul.f32.vlgmr.msrb.gmra.mxu1 %v3914_v61 }
 0x118   :  { %877 = vmatmul.f32.vlgmr.msra.gmra.mxu2 %v3909_v60  ;;  %897 = vmatmul.f32.vlgmr.msra.gmra.mxu3 %v3914_v61 }
 0x155   :  { %v3938_v54 = vpop.f32.mrf.mxu2 }
 0x157   :  { %v3940_v55 = vpop.f32.mrf.mxu3 }
 0x15d   :  { %v3942_v56 = vpop.f32.mrf.mxu2 }
 0x15f   :  { %v3944_v57 = vpop.f32.mrf.mxu3 }
 0x175   :  { %v714_v58 = vpop.f32.mrf.mxu2 }
 0x177   :  { %v734_v59 = vpop.f32.mrf.mxu3 }
 0x178   :  { %v735_v62 = vadd.f32 %v734_v59, %v714_v58  ;;  %v802_v58 = vld [vmem:[#allocation3 + $0x628] sm:$0xff]  ;;  %v1039_v59 = vld [vmem:[#allocation3 + $0x930] sm:$0xff] }
 0x17a   :  { %784 = vmatpush.msra.mxu1 %v735_v62  ;;  %v800_v62 = vld [vmem:[#allocation3 + $0x618] sm:$0xff] }
 0x17b   :  { %3420 = vmatmul.msk.f32.vlgmr.msra.gmra.mxu1 %vm487_vm0, %v738_v63 }
 0x17c   :  { %921 = vmatpush.msrb.mxu1 %v860_v0  ;;  %v798_v0 = vld [vmem:[#allocation3 + $0x608] sm:$0xff] }
 0x17e   :  { %922 = vmatpush.msrb.mxu1 %v858_v1  ;;  %v1035_v1 = vld [vmem:[#allocation3 + $0x910] sm:$0xff] }
 0x180   :  { %923 = vmatpush.msrb.mxu1 %v856_v2  ;;  %v1031_v2 = vld [vmem:[#allocation3 + $0x8f0] sm:$0xff] }
 0x182   :  { %v3947_v6 = vpop.f32.mrf.mxu0  ;;  %924 = vmatpush.msrb.mxu1 %v854_v3  ;;  %v3949_v7 = vpop.f32.mrf.mxu1  ;;  %v1033_v3 = vld [vmem:[#allocation3 + $0x900] sm:$0xff] }
 0x183   :  { %3421 = vmatmul.msk.f32.gmra.mxu1 %vm487_vm0, %v739_v4 }
 0x184   :  { %925 = vmatpush.msrb.mxu1 %v852_v5  ;;  %v1027_v5 = vld [vmem:[#allocation3 + $0x8d0] sm:$0xff] }
 0x186   :  { %926 = vmatpush.msrb.mxu1 %v850_v8  ;;  %v1025_v8 = vld [vmem:[#allocation3 + $0x8c0] sm:$0xff] }
 0x188   :  { %927 = vmatpush.msrb.mxu1 %v848_v9  ;;  %v1023_v9 = vld [vmem:[#allocation3 + $0x8b0] sm:$0xff] }
 0x18a   :  { %928 = vmatpush.msrb.mxu1 %v846_v10  ;;  %v1021_v10 = vld [vmem:[#allocation3 + $0x8a0] sm:$0xff] }
 0x18b   :  { %v3952_v12 = vpop.f32.mrf.mxu0  ;;  %v3954_v14 = vpop.f32.mrf.mxu1 }
 0x18c   :  { %929 = vmatpush.msrb.mxu1 %v844_v11  ;;  %v1019_v11 = vld [vmem:[#allocation3 + $0x890] sm:$0xff] }
 0x18e   :  { %930 = vmatpush.msrb.mxu1 %v842_v13  ;;  %v1017_v13 = vld [vmem:[#allocation3 + $0x880] sm:$0xff] }
 0x190   :  { %931 = vmatpush.msrb.mxu1 %v840_v15  ;;  %v1015_v15 = vld [vmem:[#allocation3 + $0x870] sm:$0xff] }
 0x192   :  { %932 = vmatpush.msrb.mxu1 %v838_v16  ;;  %v1011_v16 = vld [vmem:[#allocation3 + $0x850] sm:$0xff] }
 0x194   :  { %v674_v19 = vpop.f32.mrf.mxu0  ;;  %933 = vmatpush.msrb.mxu1 %v836_v17  ;;  %v694_v20 = vpop.f32.mrf.mxu1  ;;  %v1009_v17 = vld [vmem:[#allocation3 + $0x840] sm:$0xff] }
 0x195   :  { %v695_v22 = vadd.f32 %v694_v20, %v674_v19  ;;  %v1003_v19 = vld [vmem:[#allocation3 + $0x810] sm:$0xff]  ;;  %v1001_v20 = vld [vmem:[#allocation3 + $0x800] sm:$0xff] }
 0x196   :  { %934 = vmatpush.msrb.mxu1 %v834_v18  ;;  %v1007_v18 = vld [vmem:[#allocation3 + $0x830] sm:$0xff] }
 0x197   :  { %761 = vmatpush.msra.mxu0 %v695_v22  ;;  %v1032_v22 = vld [vmem:[#allocation3 + $0x8f8] sm:$0xff] }
 0x198   :  { %935 = vmatpush.msrb.mxu1 %v832_v21  ;;  %3418 = vmatmul.msk.f32.vlgmr.msra.gmra.mxu0 %vm487_vm0, %v738_v63  ;;  %v1037_v63 = vld [vmem:[#allocation3 + $0x920] sm:$0xff]  ;;  %v3972_v21 = vld [vmem:[%s4245_s0] sm:$0xff] }
 0x199   :  { %901 = vmatpush.msrb.mxu0 %v828_v23  ;;  %v1030_v23 = vld [vmem:[#allocation3 + $0x8e8] sm:$0xff] }
 0x19a   :  { %936 = vmatpush.msrb.mxu1 %v830_v24  ;;  %v1028_v24 = vld [vmem:[#allocation3 + $0x8d8] sm:$0xff] }
 0x19b   :  { %v878_v27 = vpop.f32.mrf.mxu2  ;;  %937 = vmatmul.f32.vlgmr.msrb.gmra.mxu1 %v3914_v61  ;;  %v898_v30 = vpop.f32.mrf.mxu3  ;;  %902 = vmatpush.msrb.mxu0 %v826_v25  ;;  %v1026_v25 = vld [vmem:[#allocation3 + $0x8c8] sm:$0xff] }
 0x19c   :  { %1085 = vmatpush.msra.mxu1 %v1063_v26  ;;  %v899_v31 = vadd.f32 %v898_v30, %v878_v27  ;;  %v1024_v27 = vld [vmem:[#allocation3 + $0x8b8] sm:$0xff] }
 0x19d   :  { %903 = vmatpush.msrb.mxu0 %v824_v28  ;;  %v1022_v28 = vld [vmem:[#allocation3 + $0x8a8] sm:$0xff]  ;;  %v1020_v30 = vld [vmem:[#allocation3 + $0x898] sm:$0xff] }
 0x19e   :  { %1086 = vmatpush.msra.mxu1 %v1061_v29  ;;  %965 = vmatpush.msrb.mxu2 %v899_v31  ;;  %v1018_v31 = vld [vmem:[#allocation3 + $0x888] sm:$0xff] }
 0x19f   :  { %904 = vmatpush.msrb.mxu0 %v822_v32  ;;  %3422 = vmatmul.msk.f32.vlgmr.msrb.gmra.mxu2 %vm487_vm0, %v3958_v33  ;;  %v1016_v32 = vld [vmem:[#allocation3 + $0x878] sm:$0xff] }
 0x1a0   :  { %3419 = vmatmul.msk.f32.gmra.mxu0 %vm487_vm0, %v739_v4  ;;  %1087 = vmatpush.msra.mxu1 %v1059_v34  ;;  %v1029_v4 = vld [vmem:[#allocation3 + $0x8e0] sm:$0xff]  ;;  %v1014_v34 = vld [vmem:[#allocation3 + $0x868] sm:$0xff] }
 0x1a1   :  { %905 = vmatpush.msrb.mxu0 %v820_v35  ;;  %1105 = vmatpush.msra.mxu2 %v1032_v22  ;;  %v1034_v22 = vld [vmem:[#allocation3 + $0x908] sm:$0xff] }
 0x1a2   :  { %1088 = vmatpush.msra.mxu1 %v1057_v36  ;;  %v1012_v36 = vld [vmem:[#allocation3 + $0x858] sm:$0xff] }
 0x1a3   :  { %906 = vmatpush.msrb.mxu0 %v818_v37  ;;  %1106 = vmatpush.msra.mxu2 %v1030_v23 }
 0x1a4   :  { %1089 = vmatpush.msra.mxu1 %v1055_v38  ;;  %v1010_v38 = vld [vmem:[#allocation3 + $0x848] sm:$0xff] }
 0x1a5   :  { %907 = vmatpush.msrb.mxu0 %v816_v39  ;;  %1107 = vmatpush.msra.mxu2 %v1028_v24  ;;  %v1008_v39 = vld [vmem:[#allocation3 + $0x838] sm:$0xff]  ;;  %v3988_v24 = vld [vmem:[#allocation6 + $0x40] sm:$0xff] }
 0x1a6   :  { %1090 = vmatpush.msra.mxu1 %v1053_v40  ;;  %v1006_v40 = vld [vmem:[#allocation3 + $0x828] sm:$0xff] }
 0x1a7   :  { %908 = vmatpush.msrb.mxu0 %v814_v41  ;;  %3423 = vmatmul.msk.f32.gmra.mxu2 %vm487_vm0, %v3963_v42 }
 0x1a8   :  { %1091 = vmatpush.msra.mxu1 %v1051_v43  ;;  %1108 = vmatpush.msra.mxu2 %v1026_v25  ;;  %v1267_v25 = vld [vmem:[#allocation3 + $0xbf0] sm:$0xff] }
 0x1a9   :  { %909 = vmatpush.msrb.mxu0 %v812_v44  ;;  %v1004_v44 = vld [vmem:[#allocation3 + $0x818] sm:$0xff] }
 0x1aa   :  { %1092 = vmatpush.msra.mxu1 %v1049_v45  ;;  %1109 = vmatpush.msra.mxu2 %v1024_v27  ;;  %v1205_v27 = vld [vmem:[#allocation3 + $0xa00] sm:$0xff] }
 0x1ab   :  { %910 = vmatpush.msrb.mxu0 %v810_v46  ;;  %v1002_v46 = vld [vmem:[#allocation3 + $0x808] sm:$0xff] }
 0x1ac   :  { %1093 = vmatpush.msra.mxu1 %v1047_v47  ;;  %1110 = vmatpush.msra.mxu2 %v1022_v28  ;;  %v1064_v47 = vld [vmem:[#allocation3 + $0x9f8] sm:$0xff] }
 0x1ad   :  { %911 = vmatpush.msrb.mxu0 %v808_v48  ;;  %v1235_v48 = vld [vmem:[#allocation3 + $0xaf0] sm:$0xff]  ;;  %v3993_v28 = vld [vmem:[%s4245_s0 + $0x8] sm:$0xff] }
 0x1ae   :  { %1094 = vmatpush.msra.mxu1 %v1045_v49  ;;  %1111 = vmatpush.msra.mxu2 %v1020_v30  ;;  %v1062_v49 = vld [vmem:[#allocation3 + $0x9e8] sm:$0xff]  ;;  %v1265_v30 = vld [vmem:[#allocation3 + $0xbe0] sm:$0xff] }
 0x1af   :  { %912 = vmatpush.msrb.mxu0 %v806_v50  ;;  %v1233_v50 = vld [vmem:[#allocation3 + $0xae0] sm:$0xff] }
 0x1b0   :  { %1095 = vmatpush.msra.mxu1 %v1043_v51  ;;  %1112 = vmatpush.msra.mxu2 %v1018_v31  ;;  %v1060_v51 = vld [vmem:[#allocation3 + $0x9d8] sm:$0xff]  ;;  %v1263_v31 = vld [vmem:[#allocation3 + $0xbd0] sm:$0xff] }
 0x1b1   :  { %913 = vmatpush.msrb.mxu0 %v804_v52  ;;  %v1231_v52 = vld [vmem:[#allocation3 + $0xad0] sm:$0xff] }
 0x1b2   :  { %1096 = vmatpush.msra.mxu1 %v1041_v53  ;;  %1113 = vmatpush.msra.mxu2 %v1016_v32  ;;  %v1058_v53 = vld [vmem:[#allocation3 + $0x9c8] sm:$0xff]  ;;  %v1261_v32 = vld [vmem:[#allocation3 + $0xbc0] sm:$0xff] }
 0x1b3   :  { %914 = vmatpush.msrb.mxu0 %v802_v58  ;;  %v1229_v58 = vld [vmem:[#allocation3 + $0xac0] sm:$0xff] }
 0x1b4   :  { %1097 = vmatpush.msra.mxu1 %v1039_v59  ;;  %1114 = vmatpush.msra.mxu2 %v1014_v34  ;;  %v1056_v59 = vld [vmem:[#allocation3 + $0x9b8] sm:$0xff]  ;;  %v3999_v34 = vld [vmem:[#allocation6 + $0x48] sm:$0xff] }
 0x1b5   :  { %915 = vmatpush.msrb.mxu0 %v800_v62  ;;  %v1227_v62 = vld [vmem:[#allocation3 + $0xab0] sm:$0xff] }
 0x1b6   :  { %1098 = vmatpush.msra.mxu1 %v1037_v63  ;;  %1115 = vmatpush.msra.mxu2 %v1012_v36  ;;  %v1225_v63 = vld [vmem:[#allocation3 + $0xaa0] sm:$0xff]  ;;  %v1259_v36 = vld [vmem:[#allocation3 + $0xbb0] sm:$0xff] }
 0x1b7   :  { %916 = vmatpush.msrb.mxu0 %v798_v0  ;;  %v1052_v0 = vld [vmem:[#allocation3 + $0x998] sm:$0xff] }
 0x1b8   :  { %917 = vmatmul.f32.vlgmr.msrb.gmra.mxu0 %v3909_v60  ;;  %1099 = vmatpush.msra.mxu1 %v1035_v1  ;;  %v1013_v60 = vld [vmem:[#allocation3 + $0x860] sm:$0xff]  ;;  %v1223_v1 = vld [vmem:[#allocation3 + $0xa90] sm:$0xff] }
 0x1b9   :  { %1065 = vmatpush.msra.mxu0 %v1031_v2  ;;  %1116 = vmatpush.msra.mxu2 %v1010_v38  ;;  %v1050_v2 = vld [vmem:[#allocation3 + $0x988] sm:$0xff]  ;;  %v1257_v38 = vld [vmem:[#allocation3 + $0xba0] sm:$0xff] }
 0x1ba   :  { %1100 = vmatpush.msra.mxu1 %v1033_v3  ;;  %v1221_v3 = vld [vmem:[#allocation3 + $0xa80] sm:$0xff] }
 0x1bb   :  { %1066 = vmatpush.msra.mxu0 %v1029_v4  ;;  %1101 = vmatmul.f32.vlgmr.msra.gmra.mxu1 %v3914_v61  ;;  %v1005_v61 = vld [vmem:[#allocation3 + $0x820] sm:$0xff]  ;;  %v1048_v4 = vld [vmem:[#allocation3 + $0x978] sm:$0xff] }
 0x1bc   :  { %1117 = vmatpush.msra.mxu2 %v1008_v39  ;;  %v1255_v39 = vld [vmem:[#allocation3 + $0xb90] sm:$0xff] }
 0x1bd   :  { %1067 = vmatpush.msra.mxu0 %v1027_v5  ;;  %v1219_v5 = vld [vmem:[#allocation3 + $0xa70] sm:$0xff] }
 0x1be   :  { %1118 = vmatpush.msra.mxu2 %v1006_v40  ;;  %v1253_v40 = vld [vmem:[#allocation3 + $0xb80] sm:$0xff] }
 0x1bf   :  { %1068 = vmatpush.msra.mxu0 %v1025_v8  ;;  %v1046_v8 = vld [vmem:[#allocation3 + $0x968] sm:$0xff] }
 0x1c0   :  { %1119 = vmatpush.msra.mxu2 %v1004_v44  ;;  %v1247_v44 = vld [vmem:[#allocation3 + $0xb50] sm:$0xff] }
 0x1c1   :  { %1069 = vmatpush.msra.mxu0 %v1023_v9  ;;  %v1044_v9 = vld [vmem:[#allocation3 + $0x958] sm:$0xff] }
 0x1c2   :  { %1120 = vmatpush.msra.mxu2 %v1002_v46  ;;  %v1243_v46 = vld [vmem:[#allocation3 + $0xb30] sm:$0xff] }
 0x1c3   :  { %1070 = vmatpush.msra.mxu0 %v1021_v10  ;;  %1121 = vmatmul.f32.vlgmr.msra.gmra.mxu2 %v3972_v21  ;;  %v1215_v10 = vld [vmem:[#allocation3 + $0xa50] sm:$0xff] }
 0x1c4   :  { %1269 = vmatpush.msrb.mxu2 %v1235_v48  ;;  %v1239_v48 = vld [vmem:[#allocation3 + $0xb10] sm:$0xff] }
 0x1c5   :  { %1071 = vmatpush.msra.mxu0 %v1019_v11  ;;  %v1042_v11 = vld [vmem:[#allocation3 + $0x948] sm:$0xff] }
 0x1c6   :  { %1270 = vmatpush.msrb.mxu2 %v1233_v50  ;;  %v1236_v50 = vld [vmem:[#allocation3 + $0xaf8] sm:$0xff] }
 0x1c7   :  { %1072 = vmatpush.msra.mxu0 %v1017_v13  ;;  %v1213_v13 = vld [vmem:[#allocation3 + $0xa40] sm:$0xff] }
 0x1c8   :  { %1271 = vmatpush.msrb.mxu2 %v1231_v52  ;;  %v1232_v52 = vld [vmem:[#allocation3 + $0xad8] sm:$0xff] }
 0x1c9   :  { %1073 = vmatpush.msra.mxu0 %v1015_v15  ;;  %v1040_v15 = vld [vmem:[#allocation3 + $0x938] sm:$0xff] }
 0x1ca   :  { %1272 = vmatpush.msrb.mxu2 %v1229_v58 }
 0x1cb   :  { %1074 = vmatpush.msra.mxu0 %v1013_v60  ;;  %v1211_v60 = vld [vmem:[#allocation3 + $0xa30] sm:$0xff] }
 0x1cc   :  { %1273 = vmatpush.msrb.mxu2 %v1227_v62 }
 0x1cd   :  { %1075 = vmatpush.msra.mxu0 %v1011_v16  ;;  %v1038_v16 = vld [vmem:[#allocation3 + $0x928] sm:$0xff] }
 0x1ce   :  { %1274 = vmatpush.msrb.mxu2 %v1225_v63  ;;  %v1224_v63 = vld [vmem:[#allocation3 + $0xa98] sm:$0xff] }
 0x1cf   :  { %1076 = vmatpush.msra.mxu0 %v1009_v17  ;;  %v1209_v17 = vld [vmem:[#allocation3 + $0xa20] sm:$0xff] }
 0x1d0   :  { %1275 = vmatpush.msrb.mxu2 %v1223_v1  ;;  %v1220_v1 = vld [vmem:[#allocation3 + $0xa78] sm:$0xff] }
 0x1d1   :  { %1077 = vmatpush.msra.mxu0 %v1007_v18 }
 0x1d2   :  { %1276 = vmatpush.msrb.mxu2 %v1221_v3 }
 0x1d3   :  { %1078 = vmatpush.msra.mxu0 %v1005_v61  ;;  %v1036_v61 = vld [vmem:[#allocation3 + $0x918] sm:$0xff] }
 0x1d4   :  { %1277 = vmatpush.msrb.mxu2 %v1219_v5 }
 0x1d5   :  { %1079 = vmatpush.msra.mxu0 %v1003_v19  ;;  %v1207_v19 = vld [vmem:[#allocation3 + $0xa10] sm:$0xff] }
 0x1d7   :  { %1080 = vmatpush.msra.mxu0 %v1001_v20 }
 0x1d8   :  { %1081 = vmatmul.f32.vlgmr.msra.gmra.mxu0 %v3972_v21 }
 0x1f8   :  { %v3975_v26 = vpop.f32.mrf.mxu1 }
 0x200   :  { %v3979_v35 = vpop.f32.mrf.mxu1 }
 0x215   :  { %v3977_v29 = vpop.f32.mrf.mxu0 }
 0x218   :  { %v938_v41 = vpop.f32.mrf.mxu1 }
 0x21d   :  { %v3981_v37 = vpop.f32.mrf.mxu0 }
 0x222   :  { %v4004_v58 = vpop.f32.mrf.mxu2 }
 0x22a   :  { %v4008_v3 = vpop.f32.mrf.mxu2 }
 0x235   :  { %v918_v43 = vpop.f32.mrf.mxu0 }
 0x236   :  { %v939_v45 = vadd.f32 %v938_v41, %v918_v43  ;;  %v1251_v41 = vld [vmem:[#allocation3 + $0xb70] sm:$0xff]  ;;  %v1249_v43 = vld [vmem:[#allocation3 + $0xb60] sm:$0xff] }
 0x238   :  { %988 = vmatpush.msrb.mxu3 %v939_v45  ;;  %v1102_v18 = vpop.f32.mrf.mxu1  ;;  %v1245_v45 = vld [vmem:[#allocation3 + $0xb40] sm:$0xff] }
 0x239   :  { %3424 = vmatmul.msk.f32.vlgmr.msrb.gmra.mxu3 %vm487_vm0, %v3958_v33  ;;  %v1054_v33 = vld [vmem:[#allocation3 + $0x9a8] sm:$0xff] }
 0x23a   :  { %1125 = vmatpush.msra.mxu3 %v1064_v47  ;;  %v1241_v47 = vld [vmem:[#allocation3 + $0xb20] sm:$0xff] }
 0x23c   :  { %1126 = vmatpush.msra.mxu3 %v1062_v49  ;;  %v1237_v49 = vld [vmem:[#allocation3 + $0xb00] sm:$0xff] }
 0x23e   :  { %1127 = vmatpush.msra.mxu3 %v1060_v51  ;;  %v1234_v51 = vld [vmem:[#allocation3 + $0xae8] sm:$0xff] }
 0x240   :  { %1128 = vmatpush.msra.mxu3 %v1058_v53  ;;  %v1230_v53 = vld [vmem:[#allocation3 + $0xac8] sm:$0xff] }
 0x241   :  { %3425 = vmatmul.msk.f32.gmra.mxu3 %vm487_vm0, %v3963_v42  ;;  %v1217_v42 = vld [vmem:[#allocation3 + $0xa60] sm:$0xff] }
 0x242   :  { %1129 = vmatpush.msra.mxu3 %v1056_v59  ;;  %1278 = vmatpush.msrb.mxu2 %v1217_v42  ;;  %v1228_v59 = vld [vmem:[#allocation3 + $0xab8] sm:$0xff] }
 0x243   :  { %v1212_v42 = vld [vmem:[#allocation3 + $0xa38] sm:$0xff] }
 0x244   :  { %1130 = vmatpush.msra.mxu3 %v1054_v33  ;;  %1279 = vmatpush.msrb.mxu2 %v1215_v10  ;;  %v1226_v33 = vld [vmem:[#allocation3 + $0xaa8] sm:$0xff] }
 0x246   :  { %1131 = vmatpush.msra.mxu3 %v1052_v0  ;;  %1280 = vmatpush.msrb.mxu2 %v1213_v13  ;;  %v1222_v0 = vld [vmem:[#allocation3 + $0xa88] sm:$0xff]  ;;  %v1122_v10 = vpop.f32.mrf.mxu2  ;;  %v1208_v13 = vld [vmem:[#allocation3 + $0xa18] sm:$0xff] }
 0x248   :  { %1132 = vmatpush.msra.mxu3 %v1050_v2  ;;  %1281 = vmatpush.msrb.mxu2 %v1211_v60  ;;  %v1218_v2 = vld [vmem:[#allocation3 + $0xa68] sm:$0xff] }
 0x249   :  { %v1206_v60 = vld [vmem:[#allocation3 + $0xa08] sm:$0xff] }
 0x24a   :  { %1133 = vmatpush.msra.mxu3 %v1048_v4  ;;  %1282 = vmatpush.msrb.mxu2 %v1209_v17  ;;  %v1216_v4 = vld [vmem:[#allocation3 + $0xa58] sm:$0xff]  ;;  %v1439_v17 = vld [vmem:[#allocation3 + $0xcf0] sm:$0xff] }
 0x24c   :  { %1134 = vmatpush.msra.mxu3 %v1046_v8  ;;  %1283 = vmatpush.msrb.mxu2 %v1207_v19  ;;  %v1214_v8 = vld [vmem:[#allocation3 + $0xa48] sm:$0xff]  ;;  %v1264_v19 = vld [vmem:[#allocation3 + $0xbd8] sm:$0xff] }
 0x24e   :  { %1135 = vmatpush.msra.mxu3 %v1044_v9  ;;  %1284 = vmatpush.msrb.mxu2 %v1205_v27  ;;  %v1210_v9 = vld [vmem:[#allocation3 + $0xa28] sm:$0xff]  ;;  %v1431_v27 = vld [vmem:[#allocation3 + $0xcb0] sm:$0xff] }
 0x24f   :  { %1285 = vmatmul.f32.vlgmr.msrb.gmra.mxu2 %v3972_v21 }
 0x250   :  { %1136 = vmatpush.msra.mxu3 %v1042_v11 }
 0x252   :  { %1137 = vmatpush.msra.mxu3 %v1040_v15 }
 0x254   :  { %1138 = vmatpush.msra.mxu3 %v1038_v16  ;;  %v1268_v16 = vld [vmem:[#allocation3 + $0xbf8] sm:$0xff] }
 0x255   :  { %v1082_v20 = vpop.f32.mrf.mxu0 }
 0x256   :  { %v1103_v23 = vadd.f32 %v1102_v18, %v1082_v20  ;;  %1139 = vmatpush.msra.mxu3 %v1036_v61  ;;  %v1266_v18 = vld [vmem:[#allocation3 + $0xbe8] sm:$0xff]  ;;  %v1437_v61 = vld [vmem:[#allocation3 + $0xce0] sm:$0xff]  ;;  %v1435_v20 = vld [vmem:[#allocation3 + $0xcd0] sm:$0xff] }
 0x258   :  { %1140 = vmatpush.msra.mxu3 %v1034_v22  ;;  %1169 = vmatpush.msrb.mxu0 %v1103_v23  ;;  %v1262_v22 = vld [vmem:[#allocation3 + $0xbc8] sm:$0xff]  ;;  %v1433_v23 = vld [vmem:[#allocation3 + $0xcc0] sm:$0xff] }
 0x259   :  { %1141 = vmatmul.f32.vlgmr.msra.gmra.mxu3 %v3993_v28  ;;  %3426 = vmatmul.msk.f32.vlgmr.msrb.gmra.mxu0 %vm487_vm0, %v3988_v24 }
 0x25a   :  { %1289 = vmatpush.msrb.mxu3 %v1267_v25  ;;  %1309 = vmatpush.msra.mxu0 %v1236_v50  ;;  %v1260_v25 = vld [vmem:[#allocation3 + $0xbb8] sm:$0xff]  ;;  %v1413_v50 = vld [vmem:[#allocation3 + $0xc20] sm:$0xff] }
 0x25c   :  { %1290 = vmatpush.msrb.mxu3 %v1265_v30  ;;  %1310 = vmatpush.msra.mxu0 %v1234_v51  ;;  %v1429_v30 = vld [vmem:[#allocation3 + $0xca0] sm:$0xff] }
 0x25e   :  { %1291 = vmatpush.msrb.mxu3 %v1263_v31  ;;  %1311 = vmatpush.msra.mxu0 %v1232_v52  ;;  %v1256_v31 = vld [vmem:[#allocation3 + $0xb98] sm:$0xff] }
 0x25f   :  { %v1240_v52 = vld [vmem:[#allocation3 + $0xb18] sm:$0xff] }
 0x260   :  { %1292 = vmatpush.msrb.mxu3 %v1261_v32  ;;  %1312 = vmatpush.msra.mxu0 %v1230_v53  ;;  %v1427_v32 = vld [vmem:[#allocation3 + $0xc90] sm:$0xff] }
 0x261   :  { %3427 = vmatmul.msk.f32.gmra.mxu0 %vm487_vm0, %v3999_v34  ;;  %v1411_v53 = vld [vmem:[#allocation3 + $0xc10] sm:$0xff] }
 0x262   :  { %1293 = vmatpush.msrb.mxu3 %v1259_v36  ;;  %1313 = vmatpush.msra.mxu0 %v1228_v59  ;;  %v1254_v36 = vld [vmem:[#allocation3 + $0xb88] sm:$0xff] }
 0x264   :  { %1294 = vmatpush.msrb.mxu3 %v1257_v38  ;;  %1314 = vmatpush.msra.mxu0 %v1226_v33  ;;  %v1425_v38 = vld [vmem:[#allocation3 + $0xc80] sm:$0xff]  ;;  %v1238_v33 = vld [vmem:[#allocation3 + $0xb08] sm:$0xff] }
 0x266   :  { %1295 = vmatpush.msrb.mxu3 %v1255_v39  ;;  %1315 = vmatpush.msra.mxu0 %v1224_v63  ;;  %v1252_v39 = vld [vmem:[#allocation3 + $0xb78] sm:$0xff] }
 0x268   :  { %1296 = vmatpush.msrb.mxu3 %v1253_v40  ;;  %1316 = vmatpush.msra.mxu0 %v1222_v0  ;;  %v1423_v40 = vld [vmem:[#allocation3 + $0xc70] sm:$0xff] }
 0x269   :  { %v4017_v0 = vld [vmem:[#allocation6 + $0x50] sm:$0xff] }
 0x26a   :  { %1297 = vmatpush.msrb.mxu3 %v1251_v41  ;;  %1317 = vmatpush.msra.mxu0 %v1220_v1  ;;  %v1250_v41 = vld [vmem:[#allocation3 + $0xb68] sm:$0xff]  ;;  %v1471_v1 = vld [vmem:[#allocation3 + $0xdf0] sm:$0xff] }
 0x26c   :  { %1298 = vmatpush.msrb.mxu3 %v1249_v43  ;;  %1318 = vmatpush.msra.mxu0 %v1218_v2  ;;  %v1248_v43 = vld [vmem:[#allocation3 + $0xb58] sm:$0xff]  ;;  %v1409_v2 = vld [vmem:[#allocation3 + $0xc00] sm:$0xff] }
 0x26e   :  { %1299 = vmatpush.msrb.mxu3 %v1247_v44  ;;  %1319 = vmatpush.msra.mxu0 %v1216_v4  ;;  %v1419_v44 = vld [vmem:[#allocation3 + $0xc50] sm:$0xff]  ;;  %v1469_v4 = vld [vmem:[#allocation3 + $0xde0] sm:$0xff] }
 0x270   :  { %1300 = vmatpush.msrb.mxu3 %v1245_v45  ;;  %1320 = vmatpush.msra.mxu0 %v1214_v8  ;;  %v1246_v45 = vld [vmem:[#allocation3 + $0xb48] sm:$0xff]  ;;  %v1467_v8 = vld [vmem:[#allocation3 + $0xdd0] sm:$0xff] }
 0x272   :  { %1301 = vmatpush.msrb.mxu3 %v1243_v46  ;;  %1321 = vmatpush.msra.mxu0 %v1212_v42  ;;  %v1417_v46 = vld [vmem:[#allocation3 + $0xc40] sm:$0xff] }
 0x273   :  { %v1465_v42 = vld [vmem:[#allocation3 + $0xdc0] sm:$0xff] }
 0x274   :  { %1302 = vmatpush.msrb.mxu3 %v1241_v47  ;;  %1322 = vmatpush.msra.mxu0 %v1210_v9  ;;  %v1244_v47 = vld [vmem:[#allocation3 + $0xb38] sm:$0xff] }
 0x275   :  { %v4023_v9 = vld [vmem:[#allocation6 + $0x58] sm:$0xff] }
 0x276   :  { %1303 = vmatpush.msrb.mxu3 %v1239_v48  ;;  %1323 = vmatpush.msra.mxu0 %v1208_v13  ;;  %v1415_v48 = vld [vmem:[#allocation3 + $0xc30] sm:$0xff] }
 0x277   :  { %v1459_v13 = vld [vmem:[#allocation3 + $0xd90] sm:$0xff] }
 0x278   :  { %1304 = vmatpush.msrb.mxu3 %v1237_v49  ;;  %1324 = vmatpush.msra.mxu0 %v1206_v60  ;;  %v1242_v49 = vld [vmem:[#allocation3 + $0xb28] sm:$0xff]  ;;  %v1455_v60 = vld [vmem:[#allocation3 + $0xd70] sm:$0xff] }
 0x279   :  { %1305 = vmatmul.f32.vlgmr.msrb.gmra.mxu3 %v3993_v28  ;;  %1325 = vmatmul.f32.vlgmr.msra.gmra.mxu0 %v3972_v21 }
 0x27a   :  { %1473 = vmatpush.msrb.mxu0 %v1439_v17  ;;  %v1451_v17 = vld [vmem:[#allocation3 + $0xd50] sm:$0xff] }
 0x27c   :  { %1474 = vmatpush.msrb.mxu0 %v1437_v61  ;;  %v1447_v61 = vld [vmem:[#allocation3 + $0xd30] sm:$0xff] }
 0x27e   :  { %1475 = vmatpush.msrb.mxu0 %v1435_v20  ;;  %v1443_v20 = vld [vmem:[#allocation3 + $0xd10] sm:$0xff] }
 0x280   :  { %1476 = vmatpush.msrb.mxu0 %v1433_v23  ;;  %v1440_v23 = vld [vmem:[#allocation3 + $0xcf8] sm:$0xff] }
 0x282   :  { %1477 = vmatpush.msrb.mxu0 %v1431_v27  ;;  %v1434_v27 = vld [vmem:[#allocation3 + $0xcc8] sm:$0xff] }
 0x284   :  { %1478 = vmatpush.msrb.mxu0 %v1429_v30 }
 0x286   :  { %1479 = vmatpush.msrb.mxu0 %v1427_v32 }
 0x288   :  { %1480 = vmatpush.msrb.mxu0 %v1425_v38  ;;  %v1428_v38 = vld [vmem:[#allocation3 + $0xc98] sm:$0xff] }
 0x28a   :  { %1481 = vmatpush.msrb.mxu0 %v1423_v40  ;;  %v1424_v40 = vld [vmem:[#allocation3 + $0xc78] sm:$0xff] }
 0x2bc   :  { %v4006_v62 = vpop.f32.mrf.mxu3 }
 0x2c4   :  { %v4010_v5 = vpop.f32.mrf.mxu3 }
 0x2d2   :  { %v1286_v51 = vpop.f32.mrf.mxu2 }
 0x2d6   :  { %v4028_v30 = vpop.f32.mrf.mxu0 }
 0x2dc   :  { %v1142_v11 = vpop.f32.mrf.mxu3 }
 0x2dd   :  { %v1143_v15 = vadd.f32 %v1142_v11, %v1122_v10  ;;  %v1463_v10 = vld [vmem:[#allocation3 + $0xdb0] sm:$0xff]  ;;  %v1461_v11 = vld [vmem:[#allocation3 + $0xda0] sm:$0xff] }
 0x2df   :  { %1192 = vmatpush.msrb.mxu1 %v1143_v15  ;;  %v1457_v15 = vld [vmem:[#allocation3 + $0xd80] sm:$0xff] }
 0x2e0   :  { %3428 = vmatmul.msk.f32.vlgmr.msrb.gmra.mxu1 %vm487_vm0, %v3988_v24  ;;  %v1258_v24 = vld [vmem:[#allocation3 + $0xba8] sm:$0xff] }
 0x2e1   :  { %1329 = vmatpush.msra.mxu1 %v1268_v16  ;;  %v1453_v16 = vld [vmem:[#allocation3 + $0xd60] sm:$0xff] }
 0x2e3   :  { %1330 = vmatpush.msra.mxu1 %v1266_v18  ;;  %v1449_v18 = vld [vmem:[#allocation3 + $0xd40] sm:$0xff] }
 0x2e5   :  { %1331 = vmatpush.msra.mxu1 %v1264_v19  ;;  %v1445_v19 = vld [vmem:[#allocation3 + $0xd20] sm:$0xff] }
 0x2e7   :  { %1332 = vmatpush.msra.mxu1 %v1262_v22  ;;  %v1441_v22 = vld [vmem:[#allocation3 + $0xd00] sm:$0xff] }
 0x2e8   :  { %3429 = vmatmul.msk.f32.gmra.mxu1 %vm487_vm0, %v3999_v34  ;;  %v1421_v34 = vld [vmem:[#allocation3 + $0xc60] sm:$0xff] }
 0x2e9   :  { %1333 = vmatpush.msra.mxu1 %v1260_v25  ;;  %1482 = vmatpush.msrb.mxu0 %v1421_v34  ;;  %v1438_v25 = vld [vmem:[#allocation3 + $0xce8] sm:$0xff]  ;;  %v4032_v34 = vpop.f32.mrf.mxu0 }
 0x2eb   :  { %1334 = vmatpush.msra.mxu1 %v1258_v24  ;;  %1483 = vmatpush.msrb.mxu0 %v1419_v44  ;;  %v1436_v24 = vld [vmem:[#allocation3 + $0xcd8] sm:$0xff] }
 0x2ed   :  { %1335 = vmatpush.msra.mxu1 %v1256_v31  ;;  %1484 = vmatpush.msrb.mxu0 %v1417_v46  ;;  %v1432_v31 = vld [vmem:[#allocation3 + $0xcb8] sm:$0xff] }
 0x2ee   :  { %v1416_v46 = vld [vmem:[#allocation3 + $0xc38] sm:$0xff] }
 0x2ef   :  { %1336 = vmatpush.msra.mxu1 %v1254_v36  ;;  %1485 = vmatpush.msrb.mxu0 %v1415_v48  ;;  %v1430_v36 = vld [vmem:[#allocation3 + $0xca8] sm:$0xff] }
 0x2f1   :  { %1337 = vmatpush.msra.mxu1 %v1252_v39  ;;  %1486 = vmatpush.msrb.mxu0 %v1413_v50  ;;  %v1426_v39 = vld [vmem:[#allocation3 + $0xc88] sm:$0xff]  ;;  %v1412_v50 = vld [vmem:[#allocation3 + $0xc18] sm:$0xff] }
 0x2f3   :  { %1338 = vmatpush.msra.mxu1 %v1250_v41  ;;  %1487 = vmatpush.msrb.mxu0 %v1411_v53  ;;  %v1422_v41 = vld [vmem:[#allocation3 + $0xc68] sm:$0xff]  ;;  %v1472_v53 = vld [vmem:[#allocation3 + $0xdf8] sm:$0xff] }
 0x2f5   :  { %1339 = vmatpush.msra.mxu1 %v1248_v43  ;;  %1488 = vmatpush.msrb.mxu0 %v1409_v2  ;;  %v1420_v43 = vld [vmem:[#allocation3 + $0xc58] sm:$0xff]  ;;  %v1639_v2 = vld [vmem:[#allocation3 + $0xed0] sm:$0xff] }
 0x2f6   :  { %1489 = vmatmul.f32.vlgmr.msrb.gmra.mxu0 %v3972_v21  ;;  %v1326_v48 = vpop.f32.mrf.mxu0 }
 0x2f7   :  { %1340 = vmatpush.msra.mxu1 %v1246_v45  ;;  %v1418_v45 = vld [vmem:[#allocation3 + $0xc48] sm:$0xff] }
 0x2f9   :  { %1341 = vmatpush.msra.mxu1 %v1244_v47  ;;  %v1414_v47 = vld [vmem:[#allocation3 + $0xc28] sm:$0xff] }
 0x2fb   :  { %1342 = vmatpush.msra.mxu1 %v1242_v49 }
 0x2fc   :  { %v1306_v59 = vpop.f32.mrf.mxu3 }
 0x2fd   :  { %v1307_v63 = vadd.f32 %v1306_v59, %v1286_v51  ;;  %1343 = vmatpush.msra.mxu1 %v1240_v52  ;;  %v1410_v52 = vld [vmem:[#allocation3 + $0xc08] sm:$0xff]  ;;  %v1643_v59 = vld [vmem:[#allocation3 + $0xef0] sm:$0xff] }
 0x2ff   :  { %1344 = vmatpush.msra.mxu1 %v1238_v33  ;;  %1373 = vmatpush.msra.mxu2 %v1307_v63  ;;  %v1470_v33 = vld [vmem:[#allocation3 + $0xde8] sm:$0xff]  ;;  %v1641_v63 = vld [vmem:[#allocation3 + $0xee0] sm:$0xff] }
 0x300   :  { %1345 = vmatmul.f32.vlgmr.msra.gmra.mxu1 %v3993_v28  ;;  %3430 = vmatmul.msk.f32.vlgmr.msra.gmra.mxu2 %vm487_vm0, %v4017_v0 }
 0x301   :  { %1493 = vmatpush.msrb.mxu1 %v1471_v1  ;;  %1513 = vmatpush.msrb.mxu2 %v1440_v23  ;;  %v1468_v1 = vld [vmem:[#allocation3 + $0xdd8] sm:$0xff]  ;;  %v1621_v23 = vld [vmem:[#allocation3 + $0xe40] sm:$0xff] }
 0x303   :  { %1494 = vmatpush.msrb.mxu1 %v1469_v4  ;;  %1514 = vmatpush.msrb.mxu2 %v1438_v25  ;;  %v1466_v4 = vld [vmem:[#allocation3 + $0xdc8] sm:$0xff]  ;;  %v1448_v25 = vld [vmem:[#allocation3 + $0xd38] sm:$0xff] }
 0x305   :  { %1495 = vmatpush.msrb.mxu1 %v1467_v8  ;;  %1515 = vmatpush.msrb.mxu2 %v1436_v24  ;;  %v1637_v8 = vld [vmem:[#allocation3 + $0xec0] sm:$0xff]  ;;  %v1619_v24 = vld [vmem:[#allocation3 + $0xe30] sm:$0xff] }
 0x307   :  { %1496 = vmatpush.msrb.mxu1 %v1465_v42  ;;  %1516 = vmatpush.msrb.mxu2 %v1434_v27  ;;  %v1464_v42 = vld [vmem:[#allocation3 + $0xdb8] sm:$0xff]  ;;  %v1446_v27 = vld [vmem:[#allocation3 + $0xd28] sm:$0xff] }
 0x308   :  { %3431 = vmatmul.msk.f32.gmra.mxu2 %vm487_vm0, %v4023_v9 }
 0x309   :  { %1497 = vmatpush.msrb.mxu1 %v1463_v10  ;;  %1517 = vmatpush.msrb.mxu2 %v1432_v31  ;;  %v1635_v10 = vld [vmem:[#allocation3 + $0xeb0] sm:$0xff]  ;;  %v1617_v31 = vld [vmem:[#allocation3 + $0xe20] sm:$0xff] }
 0x30b   :  { %1498 = vmatpush.msrb.mxu1 %v1461_v11  ;;  %1518 = vmatpush.msrb.mxu2 %v1430_v36  ;;  %v1633_v11 = vld [vmem:[#allocation3 + $0xea0] sm:$0xff] }
 0x30d   :  { %1499 = vmatpush.msrb.mxu1 %v1459_v13  ;;  %1519 = vmatpush.msrb.mxu2 %v1428_v38  ;;  %v1460_v13 = vld [vmem:[#allocation3 + $0xd98] sm:$0xff] }
 0x30e   :  { %v1444_v38 = vld [vmem:[#allocation3 + $0xd18] sm:$0xff] }
 0x30f   :  { %1500 = vmatpush.msrb.mxu1 %v1457_v15  ;;  %1520 = vmatpush.msrb.mxu2 %v1426_v39  ;;  %v1631_v15 = vld [vmem:[#allocation3 + $0xe90] sm:$0xff] }
 0x310   :  { %v1615_v39 = vld [vmem:[#allocation3 + $0xe10] sm:$0xff] }
 0x311   :  { %1501 = vmatpush.msrb.mxu1 %v1455_v60  ;;  %1521 = vmatpush.msrb.mxu2 %v1424_v40  ;;  %v1458_v60 = vld [vmem:[#allocation3 + $0xd88] sm:$0xff] }
 0x313   :  { %1502 = vmatpush.msrb.mxu1 %v1453_v16  ;;  %1522 = vmatpush.msrb.mxu2 %v1422_v41  ;;  %v1629_v16 = vld [vmem:[#allocation3 + $0xe80] sm:$0xff]  ;;  %v1442_v41 = vld [vmem:[#allocation3 + $0xd08] sm:$0xff] }
 0x315   :  { %1503 = vmatpush.msrb.mxu1 %v1451_v17  ;;  %1523 = vmatpush.msrb.mxu2 %v1420_v43  ;;  %v1456_v17 = vld [vmem:[#allocation3 + $0xd78] sm:$0xff] }
 0x317   :  { %1504 = vmatpush.msrb.mxu1 %v1449_v18  ;;  %1524 = vmatpush.msrb.mxu2 %v1418_v45  ;;  %v1627_v18 = vld [vmem:[#allocation3 + $0xe70] sm:$0xff]  ;;  %v4041_v45 = vld [vmem:[#allocation6 + $0x60] sm:$0xff] }
 0x319   :  { %1505 = vmatpush.msrb.mxu1 %v1447_v61  ;;  %1525 = vmatpush.msrb.mxu2 %v1416_v46  ;;  %v1454_v61 = vld [vmem:[#allocation3 + $0xd68] sm:$0xff]  ;;  %v1675_v46 = vld [vmem:[#allocation3 + $0xff0] sm:$0xff] }
 0x31b   :  { %1506 = vmatpush.msrb.mxu1 %v1445_v19  ;;  %1526 = vmatpush.msrb.mxu2 %v1414_v47  ;;  %v1452_v19 = vld [vmem:[#allocation3 + $0xd58] sm:$0xff]  ;;  %v1613_v47 = vld [vmem:[#allocation3 + $0xe00] sm:$0xff] }
 0x31d   :  { %1507 = vmatpush.msrb.mxu1 %v1443_v20  ;;  %1527 = vmatpush.msrb.mxu2 %v1412_v50  ;;  %v1623_v20 = vld [vmem:[#allocation3 + $0xe50] sm:$0xff]  ;;  %v1669_v50 = vld [vmem:[#allocation3 + $0xfc0] sm:$0xff] }
 0x31f   :  { %1508 = vmatpush.msrb.mxu1 %v1441_v22  ;;  %1528 = vmatpush.msrb.mxu2 %v1410_v52  ;;  %v1450_v22 = vld [vmem:[#allocation3 + $0xd48] sm:$0xff]  ;;  %v1667_v52 = vld [vmem:[#allocation3 + $0xfb0] sm:$0xff] }
 0x320   :  { %1509 = vmatmul.f32.vlgmr.msrb.gmra.mxu1 %v3993_v28  ;;  %1529 = vmatmul.f32.vlgmr.msrb.gmra.mxu2 %v3972_v21 }
 0x321   :  { %1677 = vmatpush.msra.mxu2 %v1643_v59  ;;  %v1663_v59 = vld [vmem:[#allocation3 + $0xf90] sm:$0xff] }
 0x323   :  { %1678 = vmatpush.msra.mxu2 %v1641_v63  ;;  %v1659_v63 = vld [vmem:[#allocation3 + $0xf70] sm:$0xff] }
 0x325   :  { %1679 = vmatpush.msra.mxu2 %v1639_v2  ;;  %v1653_v2 = vld [vmem:[#allocation3 + $0xf40] sm:$0xff] }
 0x327   :  { %1680 = vmatpush.msra.mxu2 %v1637_v8  ;;  %v1649_v8 = vld [vmem:[#allocation3 + $0xf20] sm:$0xff] }
 0x329   :  { %1681 = vmatpush.msra.mxu2 %v1635_v10  ;;  %v587_v10 = vadd.f32 %v3940_v55, %v3949_v7  ;;  %v1640_v7 = vld [vmem:[#allocation3 + $0xed8] sm:$0xff] }
 0x32b   :  { %1682 = vmatpush.msra.mxu2 %v1633_v11  ;;  %v793_v11 = vadd.f32 %v3975_v26, %v587_v10  ;;  %v1660_v10 = vld [vmem:[#allocation3 + $0xf78] sm:$0xff] }
 0x32d   :  { %1683 = vmatpush.msra.mxu2 %v1631_v15 }
 0x32f   :  { %1684 = vmatpush.msra.mxu2 %v1629_v16  ;;  %v590_v16 = vadd.f32 %v3944_v57, %v3954_v14  ;;  %v1636_v14 = vld [vmem:[#allocation3 + $0xeb8] sm:$0xff] }
 0x331   :  { %1685 = vmatpush.msra.mxu2 %v1627_v18  ;;  %v795_v18 = vadd.f32 %v3979_v35, %v590_v16  ;;  %v1632_v35 = vld [vmem:[#allocation3 + $0xe98] sm:$0xff]  ;;  %v1654_v16 = vld [vmem:[#allocation3 + $0xf48] sm:$0xff] }
 0x35d   :  { %v4030_v32 = vpop.f32.mrf.mxu1 }
 0x365   :  { %v4034_v44 = vpop.f32.mrf.mxu1 }
 0x373   :  { %v1490_v36 = vpop.f32.mrf.mxu0 }
 0x37d   :  { %v1346_v49 = vpop.f32.mrf.mxu1 }
 0x37e   :  { %v1347_v51 = vadd.f32 %v1346_v49, %v1326_v48  ;;  %v1673_v48 = vld [vmem:[#allocation3 + $0xfe0] sm:$0xff]  ;;  %v1671_v49 = vld [vmem:[#allocation3 + $0xfd0] sm:$0xff] }
 0x380   :  { %1396 = vmatpush.msra.mxu3 %v1347_v51  ;;  %v4047_v51 = vld [vmem:[#allocation6 + $0x68] sm:$0xff] }
 0x381   :  { %3432 = vmatmul.msk.f32.vlgmr.msra.gmra.mxu3 %vm487_vm0, %v4017_v0  ;;  %v1462_v0 = vld [vmem:[#allocation3 + $0xda8] sm:$0xff] }
 0x382   :  { %1533 = vmatpush.msrb.mxu3 %v1472_v53  ;;  %v1665_v53 = vld [vmem:[#allocation3 + $0xfa0] sm:$0xff] }
 0x383   :  { %v1375_v57 = vpop.f32.mrf.mxu2 }
 0x384   :  { %1534 = vmatpush.msrb.mxu3 %v1470_v33  ;;  %v1661_v33 = vld [vmem:[#allocation3 + $0xf80] sm:$0xff] }
 0x386   :  { %1535 = vmatpush.msrb.mxu3 %v1468_v1  ;;  %v1657_v1 = vld [vmem:[#allocation3 + $0xf60] sm:$0xff] }
 0x388   :  { %1536 = vmatpush.msrb.mxu3 %v1466_v4  ;;  %v1651_v4 = vld [vmem:[#allocation3 + $0xf30] sm:$0xff] }
 0x389   :  { %3433 = vmatmul.msk.f32.gmra.mxu3 %vm487_vm0, %v4023_v9  ;;  %v1625_v9 = vld [vmem:[#allocation3 + $0xe60] sm:$0xff] }
 0x38a   :  { %1537 = vmatpush.msrb.mxu3 %v1464_v42  ;;  %1686 = vmatpush.msra.mxu2 %v1625_v9  ;;  %v1647_v42 = vld [vmem:[#allocation3 + $0xf10] sm:$0xff]  ;;  %v999_v9 = vadd.f32 %v4010_v5, %v795_v18  ;;  %v564_v5 = vadd.f32 %v3938_v54, %v3947_v6  ;;  %v1825_v18 = vld [vmem:[#allocation3 + $0x1040] sm:$0xff] }
 0x38c   :  { %1538 = vmatpush.msrb.mxu3 %v1462_v0  ;;  %1687 = vmatpush.msra.mxu2 %v1623_v20  ;;  %v1645_v0 = vld [vmem:[#allocation3 + $0xf00] sm:$0xff]  ;;  %v1203_v55 = vadd.f32 %v4034_v44, %v999_v9  ;;  %v1634_v20 = vld [vmem:[#allocation3 + $0xea8] sm:$0xff]  ;;  %v792_v44 = vadd.f32 %v3977_v29, %v564_v5  ;;  %v1620_v29 = vld [vmem:[#allocation3 + $0xe38] sm:$0xff] }
 0x38d   :  { %v1823_v9 = vld [vmem:[#allocation3 + $0x1030] sm:$0xff] }
 0x38e   :  { %1539 = vmatpush.msrb.mxu3 %v1460_v13  ;;  %1688 = vmatpush.msra.mxu2 %v1621_v23  ;;  %v997_v13 = vadd.f32 %v4006_v62, %v793_v11  ;;  %v1628_v23 = vld [vmem:[#allocation3 + $0xe78] sm:$0xff]  ;;  %v1831_v11 = vld [vmem:[#allocation3 + $0x1070] sm:$0xff] }
 0x38f   :  { %v1879_v5 = vld [vmem:[#allocation3 + $0x11f0] sm:$0xff] }
 0x390   :  { %1540 = vmatpush.msrb.mxu3 %v1458_v60  ;;  %1689 = vmatpush.msra.mxu2 %v1619_v24  ;;  %v1201_v15 = vadd.f32 %v4030_v32, %v997_v13  ;;  %v1638_v32 = vld [vmem:[#allocation3 + $0xec8] sm:$0xff] }
 0x391   :  { %v1626_v24 = vld [vmem:[#allocation3 + $0xe68] sm:$0xff] }
 0x392   :  { %1541 = vmatpush.msrb.mxu3 %v1456_v17  ;;  %1690 = vmatpush.msra.mxu2 %v1617_v31  ;;  %v1658_v13 = vld [vmem:[#allocation3 + $0xf68] sm:$0xff] }
 0x394   :  { %1542 = vmatpush.msrb.mxu3 %v1454_v61  ;;  %1691 = vmatpush.msra.mxu2 %v1615_v39  ;;  %v1644_v61 = vld [vmem:[#allocation3 + $0xef8] sm:$0xff]  ;;  %v1622_v39 = vld [vmem:[#allocation3 + $0xe48] sm:$0xff] }
 0x396   :  { %1543 = vmatpush.msrb.mxu3 %v1452_v19  ;;  %1692 = vmatpush.msra.mxu2 %v1613_v47  ;;  %v1642_v19 = vld [vmem:[#allocation3 + $0xee8] sm:$0xff] }
 0x397   :  { %1693 = vmatmul.f32.vlgmr.msra.gmra.mxu2 %v3972_v21  ;;  %v1655_v21 = vld [vmem:[#allocation3 + $0xf50] sm:$0xff]  ;;  %v1614_v47 = vld [vmem:[#allocation3 + $0xe08] sm:$0xff] }
 0x398   :  { %1544 = vmatpush.msrb.mxu3 %v1450_v22  ;;  %v1630_v22 = vld [vmem:[#allocation3 + $0xe88] sm:$0xff] }
 0x39a   :  { %1545 = vmatpush.msrb.mxu3 %v1448_v25  ;;  %v996_v25 = vadd.f32 %v4004_v58, %v792_v44  ;;  %v1877_v44 = vld [vmem:[#allocation3 + $0x11e0] sm:$0xff] }
 0x39c   :  { %1546 = vmatpush.msrb.mxu3 %v1446_v27  ;;  %v4070_v27 = vpop.f32.mrf.mxu2  ;;  %v1200_v31 = vadd.f32 %v4028_v30, %v996_v25  ;;  %v1676_v30 = vld [vmem:[#allocation3 + $0xff8] sm:$0xff]  ;;  %v1873_v25 = vld [vmem:[#allocation3 + $0x11c0] sm:$0xff] }
 0x39d   :  { %v1510_v40 = vpop.f32.mrf.mxu1 }
 0x39e   :  { %v1511_v43 = vadd.f32 %v1510_v40, %v1490_v36  ;;  %1547 = vmatpush.msrb.mxu3 %v1444_v38  ;;  %v1624_v36 = vld [vmem:[#allocation3 + $0xe58] sm:$0xff]  ;;  %v1404_v38 = vadd.f32 %v1375_v57, %v1200_v31  ;;  %v1618_v40 = vld [vmem:[#allocation3 + $0xe28] sm:$0xff]  ;;  %v1871_v31 = vld [vmem:[#allocation3 + $0x11b0] sm:$0xff] }
 0x3a0   :  { %1548 = vmatpush.msrb.mxu3 %v1442_v41  ;;  %1577 = vmatpush.msra.mxu0 %v1511_v43  ;;  %v1616_v43 = vld [vmem:[#allocation3 + $0xe18] sm:$0xff] }
 0x3a1   :  { %1549 = vmatmul.f32.vlgmr.msrb.gmra.mxu3 %v3993_v28  ;;  %3434 = vmatmul.msk.f32.vlgmr.msra.gmra.mxu0 %vm487_vm0, %v4041_v45 }
 0x3a2   :  { %1697 = vmatpush.msra.mxu3 %v1675_v46  ;;  %1717 = vmatpush.msrb.mxu0 %v1644_v61  ;;  %v1652_v61 = vld [vmem:[#allocation3 + $0xf38] sm:$0xff] }
 0x3a4   :  { %1698 = vmatpush.msra.mxu3 %v1673_v48  ;;  %1718 = vmatpush.msrb.mxu0 %v1642_v19  ;;  %v1530_v41 = vpop.f32.mrf.mxu2  ;;  %v1847_v48 = vld [vmem:[#allocation3 + $0x10f0] sm:$0xff]  ;;  %v1650_v19 = vld [vmem:[#allocation3 + $0xf28] sm:$0xff] }
 0x3a6   :  { %1699 = vmatpush.msra.mxu3 %v1671_v49  ;;  %1719 = vmatpush.msrb.mxu0 %v1640_v7  ;;  %v1674_v49 = vld [vmem:[#allocation3 + $0xfe8] sm:$0xff] }
 0x3a8   :  { %1700 = vmatpush.msra.mxu3 %v1669_v50  ;;  %1720 = vmatpush.msrb.mxu0 %v1638_v32  ;;  %v4080_v50 = vld [vmem:[%s4245_s0] sm:$0xff] }
 0x3a9   :  { %3435 = vmatmul.msk.f32.gmra.mxu0 %vm487_vm0, %v4047_v51  ;;  %v1819_v32 = vld [vmem:[#allocation3 + $0x1010] sm:$0xff] }
 0x3aa   :  { %1701 = vmatpush.msra.mxu3 %v1667_v52  ;;  %1721 = vmatpush.msrb.mxu0 %v1636_v14  ;;  %v1845_v52 = vld [vmem:[#allocation3 + $0x10e0] sm:$0xff]  ;;  %v1646_v14 = vld [vmem:[#allocation3 + $0xf08] sm:$0xff] }
 0x3ac   :  { %1702 = vmatpush.msra.mxu3 %v1665_v53  ;;  %1722 = vmatpush.msrb.mxu0 %v1634_v20  ;;  %v1672_v53 = vld [vmem:[#allocation3 + $0xfd8] sm:$0xff] }
 0x3ae   :  { %1703 = vmatpush.msra.mxu3 %v1663_v59  ;;  %1723 = vmatpush.msrb.mxu0 %v1632_v35  ;;  %v1843_v59 = vld [vmem:[#allocation3 + $0x10d0] sm:$0xff] }
 0x3af   :  { %v4085_v35 = vld [vmem:[#allocation6 + $0x70] sm:$0xff] }
 0x3b0   :  { %1704 = vmatpush.msra.mxu3 %v1661_v33  ;;  %1724 = vmatpush.msrb.mxu0 %v1630_v22  ;;  %v1670_v33 = vld [vmem:[#allocation3 + $0xfc8] sm:$0xff]  ;;  %v1817_v22 = vld [vmem:[#allocation3 + $0x1000] sm:$0xff] }
 0x3b2   :  { %1705 = vmatpush.msra.mxu3 %v1659_v63  ;;  %1725 = vmatpush.msrb.mxu0 %v1628_v23  ;;  %v1841_v63 = vld [vmem:[#allocation3 + $0x10c0] sm:$0xff]  ;;  %v1875_v23 = vld [vmem:[#allocation3 + $0x11d0] sm:$0xff] }
 0x3b4   :  { %1706 = vmatpush.msra.mxu3 %v1657_v1  ;;  %1726 = vmatpush.msrb.mxu0 %v1626_v24  ;;  %v1666_v1 = vld [vmem:[#allocation3 + $0xfa8] sm:$0xff]  ;;  %v4091_v24 = vld [vmem:[#allocation6 + $0x78] sm:$0xff] }
 0x3b6   :  { %1707 = vmatpush.msra.mxu3 %v1655_v21  ;;  %1727 = vmatpush.msrb.mxu0 %v1624_v36  ;;  %v1839_v21 = vld [vmem:[#allocation3 + $0x10b0] sm:$0xff]  ;;  %v1869_v36 = vld [vmem:[#allocation3 + $0x11a0] sm:$0xff] }
 0x3b8   :  { %1708 = vmatpush.msra.mxu3 %v1653_v2  ;;  %1728 = vmatpush.msrb.mxu0 %v1622_v39  ;;  %v1837_v2 = vld [vmem:[#allocation3 + $0x10a0] sm:$0xff] }
 0x3b9   :  { %v1865_v39 = vld [vmem:[#allocation3 + $0x1180] sm:$0xff] }
 0x3ba   :  { %1709 = vmatpush.msra.mxu3 %v1651_v4  ;;  %1729 = vmatpush.msrb.mxu0 %v1620_v29  ;;  %v1664_v4 = vld [vmem:[#allocation3 + $0xf98] sm:$0xff]  ;;  %v1861_v29 = vld [vmem:[#allocation3 + $0x1160] sm:$0xff] }
 0x3bc   :  { %1710 = vmatpush.msra.mxu3 %v1649_v8  ;;  %1730 = vmatpush.msrb.mxu0 %v1618_v40  ;;  %v1835_v8 = vld [vmem:[#allocation3 + $0x1090] sm:$0xff] }
 0x3bd   :  { %v1859_v40 = vld [vmem:[#allocation3 + $0x1150] sm:$0xff] }
 0x3be   :  { %1711 = vmatpush.msra.mxu3 %v1647_v42  ;;  %1731 = vmatpush.msrb.mxu0 %v1616_v43  ;;  %v1662_v42 = vld [vmem:[#allocation3 + $0xf88] sm:$0xff]  ;;  %v1853_v43 = vld [vmem:[#allocation3 + $0x1120] sm:$0xff] }
 0x3c0   :  { %1712 = vmatpush.msra.mxu3 %v1645_v0  ;;  %1732 = vmatpush.msrb.mxu0 %v1614_v47  ;;  %v1833_v0 = vld [vmem:[#allocation3 + $0x1080] sm:$0xff] }
 0x3c1   :  { %1713 = vmatmul.f32.vlgmr.msra.gmra.mxu3 %v3993_v28  ;;  %1733 = vmatmul.f32.vlgmr.msrb.gmra.mxu0 %v4080_v50  ;;  %v1849_v47 = vld [vmem:[#allocation3 + $0x1100] sm:$0xff] }
 0x3c2   :  { %1881 = vmatpush.msra.mxu0 %v1847_v48 }
 0x3c4   :  { %1882 = vmatpush.msra.mxu0 %v1845_v52  ;;  %v1846_v52 = vld [vmem:[#allocation3 + $0x10e8] sm:$0xff] }
 0x3c6   :  { %1883 = vmatpush.msra.mxu0 %v1843_v59 }
 0x3c8   :  { %1884 = vmatpush.msra.mxu0 %v1841_v63  ;;  %v1842_v63 = vld [vmem:[#allocation3 + $0x10c8] sm:$0xff] }
 0x3ca   :  { %1885 = vmatpush.msra.mxu0 %v1839_v21  ;;  %v1832_v21 = vld [vmem:[#allocation3 + $0x1078] sm:$0xff] }
 0x3cc   :  { %1886 = vmatpush.msra.mxu0 %v1837_v2  ;;  %v1830_v2 = vld [vmem:[#allocation3 + $0x1068] sm:$0xff] }
 0x3ce   :  { %1887 = vmatpush.msra.mxu0 %v1835_v8  ;;  %v1828_v8 = vld [vmem:[#allocation3 + $0x1058] sm:$0xff] }
 0x3d0   :  { %1888 = vmatpush.msra.mxu0 %v1833_v0  ;;  %v1822_v0 = vld [vmem:[#allocation3 + $0x1028] sm:$0xff] }
 0x3d2   :  { %1889 = vmatpush.msra.mxu0 %v1831_v11 }
 0x404   :  { %v1398_v60 = vpop.f32.mrf.mxu3 }
 0x405   :  { %v4059_v17 = vadd.f32 %v1398_v60, %v1201_v15  ;;  %v1656_v15 = vld [vmem:[#allocation3 + $0xf58] sm:$0xff]  ;;  %v1827_v60 = vld [vmem:[#allocation3 + $0x1050] sm:$0xff] }
 0x40c   :  { %v1401_v26 = vpop.f32.mrf.mxu3 }
 0x40d   :  { %v4064_v62 = vadd.f32 %v1401_v26, %v1203_v55  ;;  %v1821_v55 = vld [vmem:[#allocation3 + $0x1020] sm:$0xff]  ;;  %v1648_v26 = vld [vmem:[#allocation3 + $0xf18] sm:$0xff] }
 0x41a   :  { %v1694_v7 = vpop.f32.mrf.mxu2 }
 0x41e   :  { %v1579_v54 = vpop.f32.mrf.mxu0 }
 0x41f   :  { %v4073_v6 = vadd.f32 %v1579_v54, %v1404_v38  ;;  %v1867_v38 = vld [vmem:[#allocation3 + $0x1190] sm:$0xff] }
 0x420   :  { %v1863_v54 = vld [vmem:[#allocation3 + $0x1170] sm:$0xff] }
 0x424   :  { %v1550_v58 = vpop.f32.mrf.mxu3 }
 0x425   :  { %v1551_v46 = vadd.f32 %v1550_v58, %v1530_v41  ;;  %v1857_v41 = vld [vmem:[#allocation3 + $0x1140] sm:$0xff]  ;;  %v1855_v58 = vld [vmem:[#allocation3 + $0x1130] sm:$0xff] }
 0x427   :  { %1600 = vmatpush.msra.mxu1 %v1551_v46  ;;  %v1851_v46 = vld [vmem:[#allocation3 + $0x1110] sm:$0xff] }
 0x428   :  { %3436 = vmatmul.msk.f32.vlgmr.msra.gmra.mxu1 %vm487_vm0, %v4041_v45  ;;  %v1668_v45 = vld [vmem:[#allocation3 + $0xfb8] sm:$0xff] }
 0x429   :  { %1737 = vmatpush.msrb.mxu1 %v1676_v30 }
 0x42b   :  { %1738 = vmatpush.msrb.mxu1 %v1674_v49  ;;  %v1848_v49 = vld [vmem:[#allocation3 + $0x10f8] sm:$0xff] }
 0x42d   :  { %1739 = vmatpush.msrb.mxu1 %v1672_v53  ;;  %v1844_v53 = vld [vmem:[#allocation3 + $0x10d8] sm:$0xff] }
 0x42f   :  { %1740 = vmatpush.msrb.mxu1 %v1670_v33 }
 0x430   :  { %3437 = vmatmul.msk.f32.gmra.mxu1 %vm487_vm0, %v4047_v51  ;;  %v1829_v51 = vld [vmem:[#allocation3 + $0x1060] sm:$0xff] }
 0x431   :  { %1741 = vmatpush.msrb.mxu1 %v1668_v45  ;;  %1890 = vmatpush.msra.mxu0 %v1829_v51  ;;  %v1840_v45 = vld [vmem:[#allocation3 + $0x10b8] sm:$0xff] }
 0x433   :  { %1742 = vmatpush.msrb.mxu1 %v1666_v1  ;;  %1891 = vmatpush.msra.mxu0 %v1827_v60  ;;  %v1838_v1 = vld [vmem:[#allocation3 + $0x10a8] sm:$0xff]  ;;  %v1880_v60 = vld [vmem:[#allocation3 + $0x11f8] sm:$0xff] }
 0x435   :  { %1743 = vmatpush.msrb.mxu1 %v1664_v4  ;;  %1892 = vmatpush.msra.mxu0 %v1825_v18  ;;  %v4102_v4 = vpop.f32.mrf.mxu0  ;;  %v1876_v18 = vld [vmem:[#allocation3 + $0x11d8] sm:$0xff] }
 0x437   :  { %1744 = vmatpush.msrb.mxu1 %v1662_v42  ;;  %1893 = vmatpush.msra.mxu0 %v1823_v9  ;;  %v1824_v42 = vld [vmem:[#allocation3 + $0x1038] sm:$0xff] }
 0x438   :  { %v1872_v9 = vld [vmem:[#allocation3 + $0x11b8] sm:$0xff] }
 0x439   :  { %1745 = vmatpush.msrb.mxu1 %v1660_v10  ;;  %1894 = vmatpush.msra.mxu0 %v1821_v55  ;;  %v2020_v55 = vld [vmem:[#allocation8] sm:$0xff] }
 0x43b   :  { %1746 = vmatpush.msrb.mxu1 %v1658_v13  ;;  %1895 = vmatpush.msra.mxu0 %v1819_v32  ;;  %v1820_v13 = vld [vmem:[#allocation3 + $0x1018] sm:$0xff] }
 0x43c   :  { %v1864_v32 = vld [vmem:[#allocation3 + $0x1178] sm:$0xff] }
 0x43d   :  { %1747 = vmatpush.msrb.mxu1 %v1656_v15  ;;  %1896 = vmatpush.msra.mxu0 %v1817_v22  ;;  %v1818_v15 = vld [vmem:[#allocation3 + $0x1008] sm:$0xff] }
 0x43e   :  { %1897 = vmatmul.f32.vlgmr.msra.gmra.mxu0 %v4080_v50  ;;  %v1734_v10 = vpop.f32.mrf.mxu0  ;;  %v1854_v22 = vld [vmem:[#allocation3 + $0x1128] sm:$0xff] }
 0x43f   :  { %1748 = vmatpush.msrb.mxu1 %v1654_v16  ;;  %v1878_v16 = vld [vmem:[#allocation3 + $0x11e8] sm:$0xff] }
 0x441   :  { %1749 = vmatpush.msrb.mxu1 %v1652_v61  ;;  %v1874_v61 = vld [vmem:[#allocation3 + $0x11c8] sm:$0xff] }
 0x443   :  { %1750 = vmatpush.msrb.mxu1 %v1650_v19  ;;  %v1870_v19 = vld [vmem:[#allocation3 + $0x11a8] sm:$0xff] }
 0x444   :  { %v1714_v57 = vpop.f32.mrf.mxu3 }
 0x445   :  { %v1715_v20 = vadd.f32 %v1714_v57, %v1694_v7  ;;  %1751 = vmatpush.msrb.mxu1 %v1648_v26  ;;  %v3793_v7 = vmov 0   ;;  %v1868_v26 = vld [vmem:[#allocation3 + $0x1198] sm:$0xff] }
 0x446   :  { %3489 = vset.pattern.permute.xlu0 %v3793_v7  ;;  %3490 = vset.pattern.permute.xlu1 %v3793_v7  ;;  %v2021_v57 = vld [vmem:[#allocation8 + $0x8] sm:$0xff]  ;;  %v2041_v7 = vld [vmem:[#allocation9 + $0x8] sm:$0xff] }
 0x447   :  { %1752 = vmatpush.msrb.mxu1 %v1646_v14  ;;  %1781 = vmatpush.msrb.mxu2 %v1715_v20  ;;  %v1862_v14 = vld [vmem:[#allocation3 + $0x1168] sm:$0xff]  ;;  %v1860_v20 = vld [vmem:[#allocation3 + $0x1158] sm:$0xff] }
 0x448   :  { %1753 = vmatmul.f32.vlgmr.msrb.gmra.mxu1 %v3993_v28  ;;  %3438 = vmatmul.msk.f32.vlgmr.msrb.gmra.mxu2 %vm487_vm0, %v4085_v35 }
 0x449   :  { %1901 = vmatpush.msra.mxu1 %v1879_v5  ;;  %1921 = vmatpush.msra.mxu2 %v1848_v49  ;;  %v1856_v5 = vld [vmem:[#allocation3 + $0x1138] sm:$0xff] }
 0x44a   :  { %2024 = vperm.xlu0 %3489, %v2020_v55   ;;  %v2128_v49 = vld [vmem:[#allocation9 + $0x138] sm:$0xff]  ;;  %v2272_v55 = vld [vmem:[#allocation9 + $0x250] sm:$0xff] }
 0x44b   :  { %1902 = vmatpush.msra.mxu1 %v1877_v44  ;;  %1922 = vmatpush.msra.mxu2 %v1846_v52  ;;  %v2054_v52 = vld [vmem:[#allocation9 + $0x70] sm:$0xff] }
 0x44d   :  { %1903 = vmatpush.msra.mxu1 %v1875_v23  ;;  %1923 = vmatpush.msra.mxu2 %v1844_v53  ;;  %v1852_v23 = vld [vmem:[#allocation3 + $0x1118] sm:$0xff]  ;;  %v2127_v53 = vld [vmem:[#allocation9 + $0x130] sm:$0xff] }
 0x44f   :  { %1904 = vmatpush.msra.mxu1 %v1873_v25  ;;  %1924 = vmatpush.msra.mxu2 %v1842_v63  ;;  %v2126_v63 = vld [vmem:[#allocation9 + $0x128] sm:$0xff] }
 0x450   :  { %3439 = vmatmul.msk.f32.gmra.mxu2 %vm487_vm0, %v4091_v24 }
 0x451   :  { %1905 = vmatpush.msra.mxu1 %v1871_v31  ;;  %1925 = vmatpush.msra.mxu2 %v1840_v45  ;;  %v2052_v45 = vld [vmem:[#allocation9 + $0x60] sm:$0xff] }
 0x452   :  { %2029 = vperm.xlu0 %3489, %v2021_v57  }
 0x453   :  { %1906 = vmatpush.msra.mxu1 %v1869_v36  ;;  %1926 = vmatpush.msra.mxu2 %v1838_v1  ;;  %v4109_v36 = vld [vmem:[#allocation6 + $0x80] sm:$0xff] }
 0x454   :  { %v2125_v1 = vld [vmem:[#allocation9 + $0x120] sm:$0xff] }
 0x455   :  { %1907 = vmatpush.msra.mxu1 %v1867_v38  ;;  %v2136_v38 = vld [vmem:[#allocation9 + $0x178] sm:$0xff] }
 0x457   :  { %1908 = vmatpush.msra.mxu1 %v1865_v39  ;;  %v3500_v39 = vld [vmem:[%s4245_s0 + $0x8] sm:$0xff]  ;;  %s3794_s0 = smov [#allocation20]  }
 0x458   :  { %s3393_s4 = sshll.u32 %s3794_s0, 4  ;;  %s3394_s4 = int_to_ptr.vmem [resolvable:$true] %s3393_s4 }
 0x459   :  { %1909 = vmatpush.msra.mxu1 %v1863_v54  ;;  %v2135_v54 = vld [vmem:[#allocation9 + $0x170] sm:$0xff] }
 0x45b   :  { %1910 = vmatpush.msra.mxu1 %v1861_v29  ;;  %v2134_v29 = vld [vmem:[#allocation9 + $0x168] sm:$0xff] }
 0x45d   :  { %1911 = vmatpush.msra.mxu1 %v1859_v40  ;;  %v2133_v40 = vld [vmem:[#allocation9 + $0x160] sm:$0xff] }
 0x45f   :  { %1912 = vmatpush.msra.mxu1 %v1857_v41  ;;  %v4116_v41 = vld [vmem:[#allocation6 + $0x88] sm:$0xff] }
 0x461   :  { %1913 = vmatpush.msra.mxu1 %v1855_v58  ;;  %v2132_v58 = vld [vmem:[#allocation9 + $0x158] sm:$0xff] }
 0x463   :  { %1914 = vmatpush.msra.mxu1 %v1853_v43  ;;  %v2131_v43 = vld [vmem:[#allocation9 + $0x150] sm:$0xff] }
 0x465   :  { %1915 = vmatpush.msra.mxu1 %v1851_v46  ;;  %v2130_v46 = vld [vmem:[#allocation9 + $0x148] sm:$0xff] }
 0x467   :  { %1916 = vmatpush.msra.mxu1 %v1849_v47  ;;  %v2129_v47 = vld [vmem:[#allocation9 + $0x140] sm:$0xff] }
 0x468   :  { %1917 = vmatmul.f32.vlgmr.msra.gmra.mxu1 %v3993_v28  ;;  %v1836_v28 = vld [vmem:[#allocation3 + $0x1098] sm:$0xff] }
 0x469   :  { %1927 = vmatpush.msra.mxu2 %v1836_v28  ;;  %v2051_v28 = vld [vmem:[#allocation9 + $0x58] sm:$0xff] }
 0x4a5   :  { %v1602_v30 = vpop.f32.mrf.mxu1 }
 0x4a6   :  { %v4097_v48 = vadd.f32 %v1602_v30, %v4059_v17  ;;  %v1834_v17 = vld [vmem:[#allocation3 + $0x1088] sm:$0xff]  ;;  %v2055_v30 = vld [vmem:[#allocation9 + $0x78] sm:$0xff] }
 0x4a7   :  { %1928 = vmatpush.msra.mxu2 %v1834_v17  ;;  %v2124_v17 = vld [vmem:[#allocation9 + $0x118] sm:$0xff] }
 0x4a9   :  { %1929 = vmatpush.msra.mxu2 %v1832_v21  ;;  %v2050_v21 = vld [vmem:[#allocation9 + $0x50] sm:$0xff] }
 0x4ab   :  { %1930 = vmatpush.msra.mxu2 %v1830_v2  ;;  %v2123_v2 = vld [vmem:[#allocation9 + $0x110] sm:$0xff] }
 0x4ad   :  { %v1605_v59 = vpop.f32.mrf.mxu1  ;;  %1931 = vmatpush.msra.mxu2 %v1828_v8  ;;  %v2049_v8 = vld [vmem:[#allocation9 + $0x48] sm:$0xff] }
 0x4ae   :  { %v4100_v33 = vadd.f32 %v1605_v59, %v4064_v62  ;;  %v1826_v62 = vld [vmem:[#allocation3 + $0x1048] sm:$0xff] }
 0x4af   :  { %1932 = vmatpush.msra.mxu2 %v1826_v62  ;;  %v2053_v59 = vld [vmem:[#allocation9 + $0x68] sm:$0xff] }
 0x4b0   :  { %v2122_v62 = vld [vmem:[#allocation9 + $0x108] sm:$0xff] }
 0x4b1   :  { %1933 = vmatpush.msra.mxu2 %v1824_v42  ;;  %v2048_v42 = vld [vmem:[#allocation9 + $0x40] sm:$0xff] }
 0x4b3   :  { %1934 = vmatpush.msra.mxu2 %v1822_v0  ;;  %v2121_v0 = vld [vmem:[#allocation9 + $0x100] sm:$0xff] }
 0x4b5   :  { %1935 = vmatpush.msra.mxu2 %v1820_v13  ;;  %v2046_v13 = vld [vmem:[#allocation9 + $0x30] sm:$0xff] }
 0x4b7   :  { %1936 = vmatpush.msra.mxu2 %v1818_v15  ;;  %v2045_v15 = vld [vmem:[#allocation9 + $0x28] sm:$0xff] }
 0x4b8   :  { %1937 = vmatmul.f32.vlgmr.msra.gmra.mxu2 %v4080_v50  ;;  %v1866_v50 = vld [vmem:[#allocation3 + $0x1188] sm:$0xff] }
 0x4b9   :  { %2072 = vmatpush.msrb.mxu2 %v2055_v30 }
 0x4bb   :  { %v1898_v44 = vpop.f32.mrf.mxu0  ;;  %2073 = vmatpush.msrb.mxu2 %v2054_v52 }
 0x4bd   :  { %2074 = vmatpush.msrb.mxu2 %v2053_v59 }
 0x4bf   :  { %2075 = vmatpush.msrb.mxu2 %v2052_v45 }
 0x4c1   :  { %2076 = vmatpush.msrb.mxu2 %v2051_v28 }
 0x4c3   :  { %2077 = vmatpush.msrb.mxu2 %v2050_v21  ;;  %v2069_v21 = vld [vmem:[#allocation9 + $0xe8] sm:$0xff] }
 0x4c5   :  { %v1754_v11 = vpop.f32.mrf.mxu1  ;;  %2078 = vmatpush.msrb.mxu2 %v2049_v8  ;;  %v2148_v8 = vld [vmem:[#allocation9 + $0x1d8] sm:$0xff] }
 0x4c6   :  { %v1755_v51 = vadd.f32 %v1754_v11, %v1734_v10  ;;  %v2047_v10 = vld [vmem:[#allocation9 + $0x38] sm:$0xff] }
 0x4c7   :  { %v2277_v11 = vld [vmem:[#allocation9 + $0x278] sm:$0xff]  ;;  %2079 = vmatpush.msrb.mxu2 %v2048_v42  ;;  %v2147_v42 = vld [vmem:[#allocation9 + $0x1d0] sm:$0xff] }
 0x4c8   :  { %1804 = vmatpush.msrb.mxu3 %v1755_v51  ;;  %v2276_v51 = vld [vmem:[#allocation9 + $0x270] sm:$0xff] }
 0x4c9   :  { %3440 = vmatmul.msk.f32.vlgmr.msrb.gmra.mxu3 %vm487_vm0, %v4085_v35  ;;  %v1858_v35 = vld [vmem:[#allocation3 + $0x1148] sm:$0xff]  ;;  %2080 = vmatpush.msrb.mxu2 %v2047_v10 }
 0x4ca   :  { %1941 = vmatpush.msra.mxu3 %v1880_v60  ;;  %v2275_v60 = vld [vmem:[#allocation9 + $0x268] sm:$0xff] }
 0x4cb   :  { %2081 = vmatpush.msrb.mxu2 %v2046_v13  ;;  %v2146_v10 = vld [vmem:[#allocation9 + $0x1c8] sm:$0xff]  ;;  %v2145_v13 = vld [vmem:[#allocation9 + $0x1c0] sm:$0xff] }
 0x4cc   :  { %1942 = vmatpush.msra.mxu3 %v1878_v16  ;;  %v2044_v16 = vld [vmem:[#allocation9 + $0x20] sm:$0xff] }
 0x4cd   :  { %2082 = vmatpush.msrb.mxu2 %v2045_v15  ;;  %v2144_v15 = vld [vmem:[#allocation9 + $0x1b8] sm:$0xff] }
 0x4ce   :  { %1943 = vmatpush.msra.mxu3 %v1876_v18  ;;  %v2274_v18 = vld [vmem:[#allocation9 + $0x260] sm:$0xff] }
 0x4cf   :  { %2083 = vmatpush.msrb.mxu2 %v2044_v16  ;;  %v2062_v16 = vld [vmem:[#allocation9 + $0xb0] sm:$0xff] }
 0x4d0   :  { %1944 = vmatpush.msra.mxu3 %v1874_v61  ;;  %v2043_v61 = vld [vmem:[#allocation9 + $0x18] sm:$0xff] }
 0x4d1   :  { %3441 = vmatmul.msk.f32.gmra.mxu3 %vm487_vm0, %v4091_v24  ;;  %v1850_v24 = vld [vmem:[#allocation3 + $0x1108] sm:$0xff]  ;;  %2084 = vmatpush.msrb.mxu2 %v2043_v61 }
 0x4d2   :  { %1945 = vmatpush.msra.mxu3 %v1872_v9  ;;  %v2273_v9 = vld [vmem:[#allocation9 + $0x258] sm:$0xff]  ;;  %v2061_v61 = vld [vmem:[#allocation9 + $0xa8] sm:$0xff] }
 0x4d4   :  { %1946 = vmatpush.msra.mxu3 %v1870_v19  ;;  %v2042_v19 = vld [vmem:[#allocation9 + $0x10] sm:$0xff] }
 0x4d5   :  { %2085 = vmatpush.msrb.mxu2 %v2042_v19  ;;  %v2140_v19 = vld [vmem:[#allocation9 + $0x198] sm:$0xff] }
 0x4d6   :  { %1947 = vmatpush.msra.mxu3 %v1868_v26  ;;  %v2271_v26 = vld [vmem:[#allocation9 + $0x248] sm:$0xff] }
 0x4d7   :  { %2086 = vmatpush.msrb.mxu2 %v2041_v7  ;;  %v2138_v7 = vld [vmem:[#allocation9 + $0x188] sm:$0xff] }
 0x4d8   :  { %1948 = vmatpush.msra.mxu3 %v1866_v50  ;;  %v2040_v50 = vld [vmem:[#allocation9] sm:$0xff] }
 0x4d9   :  { %2087 = vmatpush.msrb.mxu2 %v2040_v50  ;;  %v2293_v50 = vld [vmem:[#allocation9 + $0x2f8] sm:$0xff] }
 0x4da   :  { %1949 = vmatpush.msra.mxu3 %v1864_v32  ;;  %v2270_v32 = vld [vmem:[#allocation9 + $0x240] sm:$0xff] }
 0x4dc   :  { %1950 = vmatpush.msra.mxu3 %v1862_v14 }
 0x4de   :  { %1951 = vmatpush.msra.mxu3 %v1860_v20  ;;  %v2269_v20 = vld [vmem:[#allocation9 + $0x238] sm:$0xff] }
 0x4e0   :  { %1952 = vmatpush.msra.mxu3 %v1858_v35  ;;  %v2268_v35 = vld [vmem:[#allocation9 + $0x230] sm:$0xff] }
 0x4e2   :  { %1953 = vmatpush.msra.mxu3 %v1856_v5  ;;  %v2267_v5 = vld [vmem:[#allocation9 + $0x228] sm:$0xff] }
 0x4e4   :  { %1954 = vmatpush.msra.mxu3 %v1854_v22  ;;  %v2266_v22 = vld [vmem:[#allocation9 + $0x220] sm:$0xff] }
 0x4e5   :  { %v1918_v25 = vpop.f32.mrf.mxu1 }
 0x4e6   :  { %v1919_v31 = vadd.f32 %v1918_v25, %v1898_v44  ;;  %1955 = vmatpush.msra.mxu3 %v1852_v23  ;;  %v2265_v25 = vld [vmem:[#allocation9 + $0x218] sm:$0xff] }
 0x4e8   :  { %1956 = vmatpush.msra.mxu3 %v1850_v24  ;;  %1985 = vmatpush.msrb.mxu0 %v1919_v31  ;;  %v2264_v24 = vld [vmem:[#allocation9 + $0x210] sm:$0xff]  ;;  %v1783_v31 = vpop.f32.mrf.mxu2 }
 0x4e9   :  { %1957 = vmatmul.f32.vlgmr.msra.gmra.mxu3 %v3500_v39  ;;  %3442 = vmatmul.msk.f32.vlgmr.msrb.gmra.mxu0 %vm487_vm0, %v4109_v36  ;;  %v567_v39 = vadd.f32 %v3942_v56, %v3952_v12 }
 0x4ea   :  { %2153 = vmatpush.msra.mxu0 %v2136_v38  ;;  %v2263_v38 = vld [vmem:[#allocation9 + $0x208] sm:$0xff] }
 0x4ec   :  { %2154 = vmatpush.msra.mxu0 %v2135_v54 }
 0x4ee   :  { %2155 = vmatpush.msra.mxu0 %v2134_v29  ;;  %v794_v29 = vadd.f32 %v3981_v37, %v567_v39  ;;  %v2059_v39 = vld [vmem:[#allocation9 + $0x98] sm:$0xff] }
 0x4f0   :  { %2156 = vmatpush.msra.mxu0 %v2133_v40  ;;  %v1786_v54 = vpop.f32.mrf.mxu2  ;;  %v4129_v40 = vpop.permute.xlu0 %2024 }
 0x4f1   :  { %3443 = vmatmul.msk.f32.gmra.mxu0 %vm487_vm0, %v4116_v41 }
 0x4f2   :  { %2157 = vmatpush.msra.mxu0 %v2132_v58  ;;  %v1812_v58 = vadd.f32 %v1783_v31, %v4073_v6  ;;  %v2283_v31 = vld [vmem:[#allocation9 + $0x2a8] sm:$0xff] }
 0x4f4   :  { %2158 = vmatpush.msra.mxu0 %v2131_v43 }
 0x4f6   :  { %2159 = vmatpush.msra.mxu0 %v2130_v46 }
 0x4f8   :  { %2160 = vmatpush.msra.mxu0 %v2129_v47  ;;  %v4141_v6 = vpop.permute.xlu0 %2029 }
 0x4fa   :  { %2161 = vmatpush.msra.mxu0 %v2128_v49 }
 0x4fc   :  { %2162 = vmatpush.msra.mxu0 %v2127_v53 }
 0x4fe   :  { %2163 = vmatpush.msra.mxu0 %v2126_v63 }
 0x500   :  { %2164 = vmatpush.msra.mxu0 %v2125_v1  ;;  %v2070_v1 = vld [vmem:[#allocation9 + $0xf0] sm:$0xff] }
 0x502   :  { %2165 = vmatpush.msra.mxu0 %v2124_v17  ;;  %v2150_v17 = vld [vmem:[#allocation9 + $0x1e8] sm:$0xff] }
 0x504   :  { %2166 = vmatpush.msra.mxu0 %v2123_v2  ;;  %v2149_v2 = vld [vmem:[#allocation9 + $0x1e0] sm:$0xff] }
 0x506   :  { %2167 = vmatpush.msra.mxu0 %v2122_v62  ;;  %v2067_v62 = vld [vmem:[#allocation9 + $0xd8] sm:$0xff] }
 0x508   :  { %2168 = vmatpush.msra.mxu0 %v2121_v0  ;;  %v2066_v0 = vld [vmem:[#allocation9 + $0xd0] sm:$0xff] }
 0x50a   :  { %2294 = vmatpush.msrb.mxu0 %v2277_v11  ;;  %v2065_v11 = vld [vmem:[#allocation9 + $0xc8] sm:$0xff] }
 0x50c   :  { %2295 = vmatpush.msrb.mxu0 %v2276_v51  ;;  %v2064_v51 = vld [vmem:[#allocation9 + $0xc0] sm:$0xff] }
 0x50e   :  { %2296 = vmatpush.msrb.mxu0 %v2275_v60  ;;  %v2143_v60 = vld [vmem:[#allocation9 + $0x1b0] sm:$0xff] }
 0x510   :  { %2297 = vmatpush.msrb.mxu0 %v2274_v18  ;;  %v2142_v18 = vld [vmem:[#allocation9 + $0x1a8] sm:$0xff] }
 0x512   :  { %2298 = vmatpush.msrb.mxu0 %v2273_v9  ;;  %v2141_v9 = vld [vmem:[#allocation9 + $0x1a0] sm:$0xff] }
 0x514   :  { %2299 = vmatpush.msrb.mxu0 %v2272_v55  ;;  %v2139_v55 = vld [vmem:[#allocation9 + $0x190] sm:$0xff] }
 0x516   :  { %2300 = vmatpush.msrb.mxu0 %v2271_v26  ;;  %v2137_v26 = vld [vmem:[#allocation9 + $0x180] sm:$0xff] }
 0x518   :  { %2301 = vmatpush.msrb.mxu0 %v2270_v32  ;;  %v2292_v32 = vld [vmem:[#allocation9 + $0x2f0] sm:$0xff] }
 0x51a   :  { %2302 = vmatpush.msrb.mxu0 %v2269_v20  ;;  %v2290_v20 = vld [vmem:[#allocation9 + $0x2e0] sm:$0xff] }
 0x51c   :  { %2303 = vmatpush.msrb.mxu0 %v2268_v35  ;;  %v2289_v35 = vld [vmem:[#allocation9 + $0x2d8] sm:$0xff] }
 0x51e   :  { %2304 = vmatpush.msrb.mxu0 %v2267_v5  ;;  %v2288_v5 = vld [vmem:[#allocation9 + $0x2d0] sm:$0xff] }
 0x520   :  { %2305 = vmatpush.msrb.mxu0 %v2266_v22  ;;  %v2287_v22 = vld [vmem:[#allocation9 + $0x2c8] sm:$0xff] }
 0x522   :  { %2306 = vmatpush.msrb.mxu0 %v2265_v25  ;;  %v2285_v25 = vld [vmem:[#allocation9 + $0x2b8] sm:$0xff] }
 0x524   :  { %2307 = vmatpush.msrb.mxu0 %v2264_v24  ;;  %v2284_v24 = vld [vmem:[#allocation9 + $0x2b0] sm:$0xff] }
 0x526   :  { %2308 = vmatpush.msrb.mxu0 %v2263_v38  ;;  %v2060_v38 = vld [vmem:[#allocation9 + $0xa0] sm:$0xff] }
 0x53b   :  { %v1938_v52 = vpop.f32.mrf.mxu2 }
 0x54c   :  { %v1806_v57 = vpop.f32.mrf.mxu3 }
 0x54d   :  { %v4121_v14 = vadd.f32 %v1806_v57, %v4097_v48  ;;  %v2262_v48 = vld [vmem:[#allocation9 + $0x200] sm:$0xff]  ;;  %v2291_v57 = vld [vmem:[#allocation9 + $0x2e8] sm:$0xff] }
 0x54e   :  { %2309 = vmatpush.msrb.mxu0 %v2262_v48  ;;  %v2282_v48 = vld [vmem:[#allocation9 + $0x2a0] sm:$0xff] }
 0x554   :  { %v1809_v44 = vpop.f32.mrf.mxu3 }
 0x555   :  { %v4124_v23 = vadd.f32 %v1809_v44, %v4100_v33  ;;  %v998_v33 = vadd.f32 %v4008_v3, %v794_v29  ;;  %v2286_v44 = vld [vmem:[#allocation9 + $0x2c0] sm:$0xff]  ;;  %v2058_v29 = vld [vmem:[#allocation9 + $0x90] sm:$0xff] }
 0x557   :  { %v1202_v46 = vadd.f32 %v4032_v34, %v998_v33  ;;  %v2152_v34 = vld [vmem:[#allocation9 + $0x1f8] sm:$0xff]  ;;  %v2280_v33 = vld [vmem:[#allocation9 + $0x290] sm:$0xff] }
 0x559   :  { %v1406_v30 = vadd.f32 %v4070_v27, %v1202_v46  ;;  %v2071_v27 = vld [vmem:[#allocation9 + $0xf8] sm:$0xff]  ;;  %v2056_v46 = vld [vmem:[#allocation9 + $0x80] sm:$0xff] }
 0x55a   :  { %2095 = vmatpush.msrb.mxu3 %v2071_v27  ;;  %v2500_v27 = vld [vmem:[#allocation9 + $0x460] sm:$0xff] }
 0x55b   :  { %v1610_v56 = vadd.f32 %v4102_v4, %v1406_v30  ;;  %v2151_v4 = vld [vmem:[#allocation9 + $0x1f0] sm:$0xff] }
 0x55c   :  { %2096 = vmatpush.msrb.mxu3 %v2070_v1  ;;  %v2496_v1 = vld [vmem:[#allocation9 + $0x440] sm:$0xff] }
 0x55d   :  { %v1814_v53 = vadd.f32 %v1786_v54, %v1610_v56  ;;  %v2281_v54 = vld [vmem:[#allocation9 + $0x298] sm:$0xff] }
 0x55e   :  { %2097 = vmatpush.msrb.mxu3 %v2069_v21  ;;  %v2492_v21 = vld [vmem:[#allocation9 + $0x420] sm:$0xff] }
 0x566   :  { %v1987_v43 = vpop.f32.mrf.mxu0 }
 0x567   :  { %v2016_v47 = vadd.f32 %v1987_v43, %v1812_v58  ;;  %v2057_v58 = vld [vmem:[#allocation9 + $0x88] sm:$0xff] }
 0x568   :  { %v2279_v43 = vld [vmem:[#allocation9 + $0x288] sm:$0xff] }
 0x569   :  { %v2032_v49 = vadd.f32 %v4129_v40, %v2016_v47  ;;  %v2278_v47 = vld [vmem:[#allocation9 + $0x280] sm:$0xff] }
 0x56b   :  { %v4137_v12 = vmax.f32 %v2032_v49, 0.0 }
 0x56c   :  { %v1958_v37 = vpop.f32.mrf.mxu3 }
 0x56d   :  { %v1959_v59 = vadd.f32 %v1958_v37, %v1938_v52  ;;  %2088 = vmatmul.f32.vlgmr.msrb.gmra.mxu2 %v4137_v12  ;;  %2169 = vmatmul.f32.vlgmr.msra.gmra.mxu0 %v4137_v12  ;;  %v2503_v37 = vld [vmem:[#allocation9 + $0x478] sm:$0xff] }
 0x56e   :  { %v1990_v3 = vpop.f32.mrf.mxu0 }
 0x56f   :  { %v2018_v63 = vadd.f32 %v1990_v3, %v1814_v53  ;;  %2008 = vmatpush.msrb.mxu1 %v1959_v59  ;;  %v2502_v53 = vld [vmem:[#allocation9 + $0x470] sm:$0xff] }
 0x570   :  { %3444 = vmatmul.msk.f32.vlgmr.msrb.gmra.mxu1 %vm487_vm0, %v4109_v36  ;;  %v2068_v36 = vld [vmem:[#allocation9 + $0xe0] sm:$0xff] }
 0x571   :  { %v2034_v45 = vadd.f32 %v4141_v6, %v2018_v63  ;;  %2176 = vmatpush.msra.mxu1 %v2152_v34  ;;  %2098 = vmatpush.msrb.mxu3 %v2068_v36  ;;  %v2501_v34 = vld [vmem:[#allocation9 + $0x468] sm:$0xff]  ;;  %v2490_v36 = vld [vmem:[#allocation9 + $0x410] sm:$0xff] }
 0x573   :  { %v4146_v28 = vmax.f32 %v2034_v45, 0.0  ;;  %2177 = vmatpush.msra.mxu1 %v2151_v4  ;;  %2099 = vmatpush.msrb.mxu3 %v2067_v62  ;;  %v2498_v4 = vld [vmem:[#allocation9 + $0x450] sm:$0xff]  ;;  %v2497_v45 = vld [vmem:[#allocation9 + $0x448] sm:$0xff]  ;;  %v2488_v62 = vld [vmem:[#allocation9 + $0x400] sm:$0xff] }
 0x575   :  { %2091 = vmatmul.f32.gmra.mxu2 %v4146_v28  ;;  %2172 = vmatmul.f32.gmra.mxu0 %v4146_v28 }
 0x576   :  { %2178 = vmatpush.msra.mxu1 %v2150_v17  ;;  %2100 = vmatpush.msrb.mxu3 %v2066_v0  ;;  %v2493_v17 = vld [vmem:[#allocation9 + $0x428] sm:$0xff] }
 0x578   :  { %3445 = vmatmul.msk.f32.gmra.mxu1 %vm487_vm0, %v4116_v41  ;;  %2101 = vmatpush.msrb.mxu3 %v2065_v11  ;;  %v2063_v41 = vld [vmem:[#allocation9 + $0xb8] sm:$0xff] }
 0x579   :  { %2179 = vmatpush.msra.mxu1 %v2149_v2  ;;  %v2491_v2 = vld [vmem:[#allocation9 + $0x418] sm:$0xff] }
 0x57a   :  { %2102 = vmatpush.msrb.mxu3 %v2064_v51 }
 0x57b   :  { %2180 = vmatpush.msra.mxu1 %v2148_v8  ;;  %v2489_v8 = vld [vmem:[#allocation9 + $0x408] sm:$0xff] }
 0x57c   :  { %2103 = vmatpush.msrb.mxu3 %v2063_v41 }
 0x57d   :  { %2310 = vmatmul.f32.vlgmr.msrb.gmra.mxu0 %v4137_v12  ;;  %2181 = vmatpush.msra.mxu1 %v2147_v42 }
 0x57e   :  { %2104 = vmatpush.msrb.mxu3 %v2062_v16 }
 0x57f   :  { %2182 = vmatpush.msra.mxu1 %v2146_v10 }
 0x580   :  { %2105 = vmatpush.msrb.mxu3 %v2061_v61 }
 0x581   :  { %2183 = vmatpush.msra.mxu1 %v2145_v13 }
 0x582   :  { %2106 = vmatpush.msrb.mxu3 %v2060_v38  ;;  %v2406_v38 = vld [vmem:[#allocation9 + $0x3f8] sm:$0xff] }
 0x583   :  { %2184 = vmatpush.msra.mxu1 %v2144_v15 }
 0x584   :  { %2107 = vmatpush.msrb.mxu3 %v2059_v39  ;;  %v2384_v39 = vld [vmem:[#allocation9 + $0x348] sm:$0xff] }
 0x585   :  { %2313 = vmatmul.f32.gmra.mxu0 %v4146_v28  ;;  %2185 = vmatpush.msra.mxu1 %v2143_v60  ;;  %v2200_v60 = vld [vmem:[#allocation11 + $0x10] sm:$0xff] }
 0x586   :  { %2108 = vmatpush.msrb.mxu3 %v2058_v29  ;;  %v2383_v29 = vld [vmem:[#allocation9 + $0x340] sm:$0xff] }
 0x587   :  { %2186 = vmatpush.msra.mxu1 %v2142_v18 }
 0x588   :  { %2109 = vmatpush.msrb.mxu3 %v2057_v58  ;;  %v2382_v58 = vld [vmem:[#allocation9 + $0x338] sm:$0xff] }
 0x589   :  { %2187 = vmatpush.msra.mxu1 %v2141_v9 }
 0x58a   :  { %2110 = vmatpush.msrb.mxu3 %v2056_v46  ;;  %v2381_v46 = vld [vmem:[#allocation9 + $0x330] sm:$0xff] }
 0x58b   :  { %2188 = vmatpush.msra.mxu1 %v2140_v19 }
 0x58d   :  { %2189 = vmatpush.msra.mxu1 %v2139_v55 }
 0x58f   :  { %2190 = vmatpush.msra.mxu1 %v2138_v7  ;;  %v2390_v7 = vld [vmem:[#allocation9 + $0x378] sm:$0xff] }
 0x591   :  { %2191 = vmatpush.msra.mxu1 %v2137_v26  ;;  %v2118_v26 = vld [vmem:[#allocation11] sm:$0xff] }
 0x593   :  { %2317 = vmatpush.msrb.mxu1 %v2293_v50  ;;  %v2389_v50 = vld [vmem:[#allocation9 + $0x370] sm:$0xff] }
 0x595   :  { %2318 = vmatpush.msrb.mxu1 %v2292_v32  ;;  %v2201_v32 = vld [vmem:[#allocation11 + $0x18] sm:$0xff] }
 0x597   :  { %2319 = vmatpush.msrb.mxu1 %v2291_v57  ;;  %v2388_v57 = vld [vmem:[#allocation9 + $0x368] sm:$0xff] }
 0x599   :  { %2320 = vmatpush.msrb.mxu1 %v2290_v20  ;;  %v2387_v20 = vld [vmem:[#allocation9 + $0x360] sm:$0xff] }
 0x59b   :  { %2321 = vmatpush.msrb.mxu1 %v2289_v35 }
 0x59d   :  { %2322 = vmatpush.msrb.mxu1 %v2288_v5 }
 0x59f   :  { %2323 = vmatpush.msrb.mxu1 %v2287_v22 }
 0x5a1   :  { %2324 = vmatpush.msrb.mxu1 %v2286_v44  ;;  %v2386_v44 = vld [vmem:[#allocation9 + $0x358] sm:$0xff] }
 0x5a3   :  { %2325 = vmatpush.msrb.mxu1 %v2285_v25  ;;  %v2119_v25 = vld [vmem:[#allocation11 + $0x8] sm:$0xff] }
 0x5a5   :  { %2326 = vmatpush.msrb.mxu1 %v2284_v24 }
 0x5a7   :  { %2327 = vmatpush.msrb.mxu1 %v2283_v31  ;;  %v2385_v31 = vld [vmem:[#allocation9 + $0x350] sm:$0xff] }
 0x5a9   :  { %2328 = vmatpush.msrb.mxu1 %v2282_v48  ;;  %v2341_v48 = vld [vmem:[#allocation11 + $0x20] sm:$0xff] }
 0x5ab   :  { %2329 = vmatpush.msrb.mxu1 %v2281_v54  ;;  %v2405_v54 = vld [vmem:[#allocation9 + $0x3f0] sm:$0xff] }
 0x5ad   :  { %2330 = vmatpush.msrb.mxu1 %v2280_v33  ;;  %v2404_v33 = vld [vmem:[#allocation9 + $0x3e8] sm:$0xff] }
 0x5af   :  { %2331 = vmatpush.msrb.mxu1 %v2279_v43  ;;  %v2403_v43 = vld [vmem:[#allocation9 + $0x3e0] sm:$0xff] }
 0x5b1   :  { %2332 = vmatpush.msrb.mxu1 %v2278_v47  ;;  %v2402_v47 = vld [vmem:[#allocation9 + $0x3d8] sm:$0xff] }
 0x5ea   :  { %v2170_v42 = vpop.f32.mrf.mxu0 }
 0x5ed   :  { %v2010_v30 = vpop.f32.mrf.mxu1 }
 0x5ee   :  { %v2017_v49 = vadd.f32 %v2010_v30, %v4121_v14  ;;  %v2342_v30 = vld [vmem:[#allocation11 + $0x28] sm:$0xff] }
 0x5f0   :  { %v2033_v52 = vadd.f32 %v4129_v40, %v2017_v49  ;;  %v2499_v40 = vld [vmem:[#allocation9 + $0x458] sm:$0xff]  ;;  %v2089_v10 = vpop.f32.mrf.mxu2  ;;  %v2380_v49 = vld [vmem:[#allocation9 + $0x328] sm:$0xff] }
 0x5f2   :  { %v4156_v56 = vmax.f32 %v2033_v52, 0.0  ;;  %v2173_v11 = vpop.f32.mrf.mxu0  ;;  %v2401_v52 = vld [vmem:[#allocation9 + $0x3d0] sm:$0xff] }
 0x5f4   :  { %2111 = vmatmul.f32.vlgmr.msrb.gmra.mxu3 %v4156_v56  ;;  %2192 = vmatmul.f32.vlgmr.msra.gmra.mxu1 %v4156_v56 }
 0x5f5   :  { %v2013_v59 = vpop.f32.mrf.mxu1  ;;  %2520 = vmatpush.msra.mxu1 %v2503_v37  ;;  %v2379_v37 = vld [vmem:[#allocation9 + $0x320] sm:$0xff] }
 0x5f6   :  { %v2019_v3 = vadd.f32 %v2013_v59, %v4124_v23  ;;  %v2495_v23 = vld [vmem:[#allocation9 + $0x438] sm:$0xff] }
 0x5f7   :  { %2521 = vmatpush.msra.mxu1 %v2502_v53  ;;  %v2400_v53 = vld [vmem:[#allocation9 + $0x3c8] sm:$0xff]  ;;  %v2378_v59 = vld [vmem:[#allocation9 + $0x318] sm:$0xff] }
 0x5f8   :  { %v2035_v63 = vadd.f32 %v4141_v6, %v2019_v3  ;;  %v2494_v6 = vld [vmem:[#allocation9 + $0x430] sm:$0xff]  ;;  %v2092_v16 = vpop.f32.mrf.mxu2  ;;  %v2399_v3 = vld [vmem:[#allocation9 + $0x3c0] sm:$0xff] }
 0x5f9   :  { %2522 = vmatpush.msra.mxu1 %v2501_v34  ;;  %v2377_v34 = vld [vmem:[#allocation9 + $0x310] sm:$0xff] }
 0x5fa   :  { %v4162_v14 = vmax.f32 %v2035_v63, 0.0  ;;  %v2311_v18 = vpop.f32.mrf.mxu0  ;;  %v2398_v63 = vld [vmem:[#allocation9 + $0x3b8] sm:$0xff] }
 0x5fb   :  { %2523 = vmatpush.msra.mxu1 %v2500_v27  ;;  %v2376_v27 = vld [vmem:[#allocation9 + $0x308] sm:$0xff] }
 0x5fc   :  { %2114 = vmatmul.f32.gmra.mxu3 %v4162_v14  ;;  %2195 = vmatmul.f32.gmra.mxu1 %v4162_v14 }
 0x5fd   :  { %2524 = vmatpush.msra.mxu1 %v2499_v40  ;;  %v2397_v40 = vld [vmem:[#allocation9 + $0x3b0] sm:$0xff] }
 0x5ff   :  { %2525 = vmatpush.msra.mxu1 %v2498_v4  ;;  %v2375_v4 = vld [vmem:[#allocation9 + $0x300] sm:$0xff] }
 0x601   :  { %2526 = vmatpush.msra.mxu1 %v2497_v45  ;;  %v2396_v45 = vld [vmem:[#allocation9 + $0x3a8] sm:$0xff] }
 0x602   :  { %v2314_v35 = vpop.f32.mrf.mxu0 }
 0x603   :  { %2527 = vmatpush.msra.mxu1 %v2496_v1  ;;  %v2519_v1 = vld [vmem:[#allocation9 + $0x4f8] sm:$0xff] }
 0x604   :  { %2333 = vmatmul.f32.vlgmr.msrb.gmra.mxu1 %v4156_v56 }
 0x605   :  { %2528 = vmatpush.msra.mxu1 %v2495_v23  ;;  %v2395_v23 = vld [vmem:[#allocation9 + $0x3a0] sm:$0xff] }
 0x607   :  { %2529 = vmatpush.msra.mxu1 %v2494_v6  ;;  %v2518_v6 = vld [vmem:[#allocation9 + $0x4f0] sm:$0xff] }
 0x609   :  { %2530 = vmatpush.msra.mxu1 %v2493_v17  ;;  %v2394_v17 = vld [vmem:[#allocation9 + $0x398] sm:$0xff] }
 0x60b   :  { %2531 = vmatpush.msra.mxu1 %v2492_v21  ;;  %v2517_v21 = vld [vmem:[#allocation9 + $0x4e8] sm:$0xff] }
 0x60c   :  { %2336 = vmatmul.f32.gmra.mxu1 %v4162_v14 }
 0x60d   :  { %2532 = vmatpush.msra.mxu1 %v2491_v2  ;;  %v2393_v2 = vld [vmem:[#allocation9 + $0x390] sm:$0xff] }
 0x60f   :  { %2533 = vmatpush.msra.mxu1 %v2490_v36  ;;  %v2516_v36 = vld [vmem:[#allocation9 + $0x4e0] sm:$0xff] }
 0x611   :  { %2534 = vmatpush.msra.mxu1 %v2489_v8  ;;  %v2392_v8 = vld [vmem:[#allocation9 + $0x388] sm:$0xff] }
 0x613   :  { %2535 = vmatpush.msra.mxu1 %v2488_v62  ;;  %v2515_v62 = vld [vmem:[#allocation9 + $0x4d8] sm:$0xff] }
 0x614   :  { %2536 = vmatmul.f32.vlgmr.msra.gmra.mxu1 %v4137_v12 }
 0x61c   :  { %2539 = vmatmul.f32.gmra.mxu1 %v4146_v28 }
 0x671   :  { %v2193_v0 = vpop.f32.mrf.mxu1 }
 0x672   :  { %v2194_v41 = vadd.f32 %v2193_v0, %v2170_v42  ;;  %v2391_v42 = vld [vmem:[#allocation9 + $0x380] sm:$0xff]  ;;  %v2514_v0 = vld [vmem:[#allocation9 + $0x4d0] sm:$0xff] }
 0x677   :  { %v2112_v13 = vpop.f32.mrf.mxu3 }
 0x678   :  { %v2113_v55 = vadd.f32 %v2112_v13, %v2089_v10  ;;  %v2616_v10 = vld [vmem:[#allocation9 + $0x578] sm:$0xff]  ;;  %v2615_v13 = vld [vmem:[#allocation9 + $0x570] sm:$0xff] }
 0x679   :  { %v2196_v51 = vpop.f32.mrf.mxu1 }
 0x67a   :  { %v2197_v15 = vadd.f32 %v2196_v51, %v2173_v11  ;;  %v2513_v11 = vld [vmem:[#allocation9 + $0x4c8] sm:$0xff]  ;;  %v2512_v51 = vld [vmem:[#allocation9 + $0x4c0] sm:$0xff] }
 0x67c   :  { %2223 = vmatpush.msra.mxu2 %v2197_v15  ;;  %v2614_v15 = vld [vmem:[#allocation9 + $0x568] sm:$0xff] }
 0x67e   :  { %2224 = vmatpush.msra.mxu2 %v2194_v41  ;;  %v2511_v41 = vld [vmem:[#allocation9 + $0x4b8] sm:$0xff] }
 0x67f   :  { %v2115_v61 = vpop.f32.mrf.mxu3  ;;  %3446 = vmatmul.msk.f32.vlgmr.msra.gmra.mxu2 %vm2202_vm1, %v2200_v60  ;;  %v2613_v60 = vld [vmem:[#allocation9 + $0x560] sm:$0xff] }
 0x680   :  { %v2116_v9 = vadd.f32 %v2115_v61, %v2092_v16  ;;  %v2510_v16 = vld [vmem:[#allocation9 + $0x4b0] sm:$0xff]  ;;  %v2509_v61 = vld [vmem:[#allocation9 + $0x4a8] sm:$0xff] }
 0x681   :  { %v2334_v19 = vpop.f32.mrf.mxu1 }
 0x682   :  { %2252 = vmatpush.msra.mxu3 %v2116_v9  ;;  %v2335_v24 = vadd.f32 %v2334_v19, %v2311_v18  ;;  %v2612_v18 = vld [vmem:[#allocation9 + $0x558] sm:$0xff]  ;;  %v2611_v9 = vld [vmem:[#allocation9 + $0x550] sm:$0xff]  ;;  %v2508_v19 = vld [vmem:[#allocation9 + $0x4a0] sm:$0xff] }
 0x684   :  { %2253 = vmatpush.msra.mxu3 %v2113_v55  ;;  %v2610_v55 = vld [vmem:[#allocation9 + $0x548] sm:$0xff] }
 0x685   :  { %3448 = vmatmul.msk.f32.vlgmr.msra.gmra.mxu3 %vm2202_vm1, %v2118_v26  ;;  %v2609_v26 = vld [vmem:[#allocation9 + $0x540] sm:$0xff] }
 0x686   :  { %2407 = vmatpush.msrb.mxu3 %v2390_v7  ;;  %v2507_v7 = vld [vmem:[#allocation9 + $0x498] sm:$0xff] }
 0x687   :  { %3447 = vmatmul.msk.f32.gmra.mxu2 %vm2202_vm1, %v2201_v32  ;;  %v2608_v32 = vld [vmem:[#allocation9 + $0x538] sm:$0xff] }
 0x688   :  { %2408 = vmatpush.msrb.mxu3 %v2389_v50  ;;  %v2506_v50 = vld [vmem:[#allocation9 + $0x490] sm:$0xff] }
 0x689   :  { %v2337_v5 = vpop.f32.mrf.mxu1 }
 0x68a   :  { %2409 = vmatpush.msrb.mxu3 %v2388_v57  ;;  %v2338_v22 = vadd.f32 %v2337_v5, %v2314_v35  ;;  %v2505_v57 = vld [vmem:[#allocation9 + $0x488] sm:$0xff]  ;;  %v2504_v35 = vld [vmem:[#allocation9 + $0x480] sm:$0xff] }
 0x68b   :  { %v2606_v5 = vld [vmem:[#allocation9 + $0x528] sm:$0xff] }
 0x68c   :  { %2410 = vmatpush.msrb.mxu3 %v2387_v20  ;;  %2363 = vmatpush.msrb.mxu2 %v2338_v22  ;;  %v2607_v20 = vld [vmem:[#allocation9 + $0x530] sm:$0xff]  ;;  %v2729_v22 = vld [vmem:[#allocation9 + $0x678] sm:$0xff] }
 0x68d   :  { %3449 = vmatmul.msk.f32.gmra.mxu3 %vm2202_vm1, %v2119_v25  ;;  %v2728_v25 = vld [vmem:[#allocation9 + $0x670] sm:$0xff] }
 0x68e   :  { %2411 = vmatpush.msrb.mxu3 %v2386_v44  ;;  %2364 = vmatpush.msrb.mxu2 %v2335_v24  ;;  %v2605_v44 = vld [vmem:[#allocation9 + $0x520] sm:$0xff]  ;;  %v2604_v24 = vld [vmem:[#allocation9 + $0x518] sm:$0xff] }
 0x68f   :  { %3450 = vmatmul.msk.f32.vlgmr.msrb.gmra.mxu2 %vm2202_vm1, %v2341_v48  ;;  %v2726_v48 = vld [vmem:[#allocation9 + $0x660] sm:$0xff] }
 0x690   :  { %2412 = vmatpush.msrb.mxu3 %v2385_v31  ;;  %2430 = vmatpush.msra.mxu2 %v2406_v38  ;;  %v2727_v31 = vld [vmem:[#allocation9 + $0x668] sm:$0xff]  ;;  %v2603_v38 = vld [vmem:[#allocation9 + $0x510] sm:$0xff] }
 0x692   :  { %2413 = vmatpush.msrb.mxu3 %v2384_v39  ;;  %2431 = vmatpush.msra.mxu2 %v2405_v54  ;;  %v2602_v39 = vld [vmem:[#allocation9 + $0x508] sm:$0xff]  ;;  %v2725_v54 = vld [vmem:[#allocation9 + $0x658] sm:$0xff] }
 0x694   :  { %2414 = vmatpush.msrb.mxu3 %v2383_v29  ;;  %2432 = vmatpush.msra.mxu2 %v2404_v33  ;;  %v2601_v29 = vld [vmem:[#allocation9 + $0x500] sm:$0xff]  ;;  %v2724_v33 = vld [vmem:[#allocation9 + $0x650] sm:$0xff] }
 0x696   :  { %2415 = vmatpush.msrb.mxu3 %v2382_v58  ;;  %2433 = vmatpush.msra.mxu2 %v2403_v43  ;;  %v2723_v58 = vld [vmem:[#allocation9 + $0x648] sm:$0xff]  ;;  %v2722_v43 = vld [vmem:[#allocation9 + $0x640] sm:$0xff] }
 0x697   :  { %3451 = vmatmul.msk.f32.gmra.mxu2 %vm2202_vm1, %v2342_v30  ;;  %v2719_v30 = vld [vmem:[#allocation9 + $0x628] sm:$0xff] }
 0x698   :  { %2416 = vmatpush.msrb.mxu3 %v2381_v46  ;;  %2434 = vmatpush.msra.mxu2 %v2402_v47  ;;  %v2721_v46 = vld [vmem:[#allocation9 + $0x638] sm:$0xff]  ;;  %v2720_v47 = vld [vmem:[#allocation9 + $0x630] sm:$0xff] }
 0x69a   :  { %2417 = vmatpush.msrb.mxu3 %v2380_v49  ;;  %2435 = vmatpush.msra.mxu2 %v2401_v52  ;;  %v2718_v49 = vld [vmem:[#allocation9 + $0x620] sm:$0xff]  ;;  %v2717_v52 = vld [vmem:[#allocation9 + $0x618] sm:$0xff] }
 0x69c   :  { %2418 = vmatpush.msrb.mxu3 %v2379_v37  ;;  %2436 = vmatpush.msra.mxu2 %v2400_v53  ;;  %v2716_v37 = vld [vmem:[#allocation9 + $0x610] sm:$0xff]  ;;  %v2715_v53 = vld [vmem:[#allocation9 + $0x608] sm:$0xff] }
 0x69e   :  { %2419 = vmatpush.msrb.mxu3 %v2378_v59  ;;  %2437 = vmatpush.msra.mxu2 %v2399_v3  ;;  %v2714_v59 = vld [vmem:[#allocation9 + $0x600] sm:$0xff] }
 0x6a0   :  { %2420 = vmatpush.msrb.mxu3 %v2377_v34  ;;  %2438 = vmatpush.msra.mxu2 %v2398_v63 }
 0x6a2   :  { %2421 = vmatpush.msrb.mxu3 %v2376_v27  ;;  %2439 = vmatpush.msra.mxu2 %v2397_v40 }
 0x6a4   :  { %2422 = vmatpush.msrb.mxu3 %v2375_v4  ;;  %2440 = vmatpush.msra.mxu2 %v2396_v45 }
 0x6a5   :  { %2423 = vmatmul.f32.vlgmr.msrb.gmra.mxu3 %v4137_v12 }
 0x6a6   :  { %2543 = vmatpush.msra.mxu3 %v2519_v1  ;;  %2441 = vmatpush.msra.mxu2 %v2395_v23 }
 0x6a8   :  { %2544 = vmatpush.msra.mxu3 %v2518_v6  ;;  %2442 = vmatpush.msra.mxu2 %v2394_v17 }
 0x6aa   :  { %2545 = vmatpush.msra.mxu3 %v2517_v21  ;;  %2443 = vmatpush.msra.mxu2 %v2393_v2 }
 0x6ac   :  { %2546 = vmatpush.msra.mxu3 %v2516_v36  ;;  %2444 = vmatpush.msra.mxu2 %v2392_v8 }
 0x6ad   :  { %2426 = vmatmul.f32.gmra.mxu3 %v4146_v28 }
 0x6ae   :  { %2547 = vmatpush.msra.mxu3 %v2515_v62  ;;  %2445 = vmatpush.msra.mxu2 %v2391_v42  ;;  %v2454_v42 = vld [vmem:[#allocation11 + $0x30] sm:$0xff] }
 0x6af   :  { %2446 = vmatmul.f32.vlgmr.msra.gmra.mxu2 %v4156_v56 }
 0x6b0   :  { %2548 = vmatpush.msra.mxu3 %v2514_v0  ;;  %2633 = vmatpush.msrb.mxu2 %v2616_v10  ;;  %v2455_v0 = vld [vmem:[#allocation11 + $0x38] sm:$0xff]  ;;  %v2537_v10 = vpop.f32.mrf.mxu1 }
 0x6b2   :  { %2549 = vmatpush.msra.mxu3 %v2513_v11  ;;  %2634 = vmatpush.msrb.mxu2 %v2615_v13 }
 0x6b4   :  { %2550 = vmatpush.msra.mxu3 %v2512_v51  ;;  %2635 = vmatpush.msrb.mxu2 %v2614_v15 }
 0x6b6   :  { %2551 = vmatpush.msra.mxu3 %v2511_v41  ;;  %2636 = vmatpush.msrb.mxu2 %v2613_v60  ;;  %v2567_v60 = vld [vmem:[#allocation11 + $0x40] sm:$0xff] }
 0x6b7   :  { %2449 = vmatmul.f32.gmra.mxu2 %v4162_v14 }
 0x6b8   :  { %2552 = vmatpush.msra.mxu3 %v2510_v16  ;;  %2637 = vmatpush.msrb.mxu2 %v2612_v18  ;;  %v2540_v13 = vpop.f32.mrf.mxu1  ;;  %v2632_v16 = vld [vmem:[#allocation9 + $0x5f8] sm:$0xff]  ;;  %v2631_v18 = vld [vmem:[#allocation9 + $0x5f0] sm:$0xff] }
 0x6ba   :  { %2553 = vmatpush.msra.mxu3 %v2509_v61  ;;  %2638 = vmatpush.msrb.mxu2 %v2611_v9  ;;  %v2630_v61 = vld [vmem:[#allocation9 + $0x5e8] sm:$0xff]  ;;  %v2629_v9 = vld [vmem:[#allocation9 + $0x5e0] sm:$0xff] }
 0x6bc   :  { %2554 = vmatpush.msra.mxu3 %v2508_v19  ;;  %2639 = vmatpush.msrb.mxu2 %v2610_v55  ;;  %v2568_v19 = vld [vmem:[#allocation11 + $0x48] sm:$0xff]  ;;  %v2628_v55 = vld [vmem:[#allocation9 + $0x5d8] sm:$0xff] }
 0x6be   :  { %2555 = vmatpush.msra.mxu3 %v2507_v7  ;;  %2640 = vmatpush.msrb.mxu2 %v2609_v26  ;;  %v2627_v7 = vld [vmem:[#allocation9 + $0x5d0] sm:$0xff]  ;;  %v2626_v26 = vld [vmem:[#allocation9 + $0x5c8] sm:$0xff] }
 0x6c0   :  { %2556 = vmatpush.msra.mxu3 %v2506_v50  ;;  %2641 = vmatpush.msrb.mxu2 %v2608_v32  ;;  %v2625_v50 = vld [vmem:[#allocation9 + $0x5c0] sm:$0xff]  ;;  %v2624_v32 = vld [vmem:[#allocation9 + $0x5b8] sm:$0xff] }
 0x6c2   :  { %2557 = vmatpush.msra.mxu3 %v2505_v57  ;;  %2642 = vmatpush.msrb.mxu2 %v2607_v20  ;;  %v2623_v57 = vld [vmem:[#allocation9 + $0x5b0] sm:$0xff]  ;;  %v2622_v20 = vld [vmem:[#allocation9 + $0x5a8] sm:$0xff] }
 0x6c4   :  { %2558 = vmatpush.msra.mxu3 %v2504_v35  ;;  %2643 = vmatpush.msrb.mxu2 %v2606_v5  ;;  %v2621_v35 = vld [vmem:[#allocation9 + $0x5a0] sm:$0xff]  ;;  %v2620_v5 = vld [vmem:[#allocation9 + $0x598] sm:$0xff] }
 0x6c5   :  { %2559 = vmatmul.f32.vlgmr.msra.gmra.mxu3 %v4156_v56 }
 0x6c6   :  { %2746 = vmatpush.msrb.mxu3 %v2729_v22  ;;  %2644 = vmatpush.msrb.mxu2 %v2605_v44  ;;  %v2619_v22 = vld [vmem:[#allocation9 + $0x590] sm:$0xff]  ;;  %v2618_v44 = vld [vmem:[#allocation9 + $0x588] sm:$0xff] }
 0x6c8   :  { %2747 = vmatpush.msrb.mxu3 %v2728_v25  ;;  %2645 = vmatpush.msrb.mxu2 %v2604_v24  ;;  %v2617_v25 = vld [vmem:[#allocation9 + $0x580] sm:$0xff]  ;;  %v2842_v24 = vld [vmem:[#allocation9 + $0x778] sm:$0xff] }
 0x6ca   :  { %2748 = vmatpush.msrb.mxu3 %v2727_v31  ;;  %2646 = vmatpush.msrb.mxu2 %v2603_v38  ;;  %v2841_v31 = vld [vmem:[#allocation9 + $0x770] sm:$0xff]  ;;  %v2840_v38 = vld [vmem:[#allocation9 + $0x768] sm:$0xff] }
 0x6cc   :  { %2749 = vmatpush.msrb.mxu3 %v2726_v48  ;;  %2647 = vmatpush.msrb.mxu2 %v2602_v39  ;;  %v2839_v48 = vld [vmem:[#allocation9 + $0x760] sm:$0xff]  ;;  %v2838_v39 = vld [vmem:[#allocation9 + $0x758] sm:$0xff] }
 0x6cd   :  { %2562 = vmatmul.f32.gmra.mxu3 %v4162_v14 }
 0x6ce   :  { %2750 = vmatpush.msrb.mxu3 %v2725_v54  ;;  %2648 = vmatpush.msrb.mxu2 %v2601_v29  ;;  %v2837_v54 = vld [vmem:[#allocation9 + $0x750] sm:$0xff]  ;;  %v2836_v29 = vld [vmem:[#allocation9 + $0x748] sm:$0xff] }
 0x6cf   :  { %2649 = vmatmul.f32.vlgmr.msrb.gmra.mxu2 %v4137_v12 }
 0x6d0   :  { %2751 = vmatpush.msrb.mxu3 %v2724_v33  ;;  %v2835_v33 = vld [vmem:[#allocation9 + $0x740] sm:$0xff] }
 0x6d2   :  { %2752 = vmatpush.msrb.mxu3 %v2723_v58  ;;  %v2834_v58 = vld [vmem:[#allocation9 + $0x738] sm:$0xff] }
 0x6d4   :  { %2753 = vmatpush.msrb.mxu3 %v2722_v43  ;;  %v2833_v43 = vld [vmem:[#allocation9 + $0x730] sm:$0xff] }
 0x6d6   :  { %2754 = vmatpush.msrb.mxu3 %v2721_v46  ;;  %v2832_v46 = vld [vmem:[#allocation9 + $0x728] sm:$0xff] }
 0x6d7   :  { %2652 = vmatmul.f32.gmra.mxu2 %v4146_v28 }
 0x6d8   :  { %2755 = vmatpush.msrb.mxu3 %v2720_v47  ;;  %v2831_v47 = vld [vmem:[#allocation9 + $0x720] sm:$0xff] }
 0x6da   :  { %2756 = vmatpush.msrb.mxu3 %v2719_v30  ;;  %v2830_v30 = vld [vmem:[#allocation9 + $0x718] sm:$0xff] }
 0x6dc   :  { %2757 = vmatpush.msrb.mxu3 %v2718_v49  ;;  %v2829_v49 = vld [vmem:[#allocation9 + $0x710] sm:$0xff] }
 0x6de   :  { %2758 = vmatpush.msrb.mxu3 %v2717_v52  ;;  %v2828_v52 = vld [vmem:[#allocation9 + $0x708] sm:$0xff] }
 0x6e0   :  { %2759 = vmatpush.msrb.mxu3 %v2716_v37  ;;  %v2827_v37 = vld [vmem:[#allocation9 + $0x700] sm:$0xff] }
 0x6e2   :  { %2760 = vmatpush.msrb.mxu3 %v2715_v53 }
 0x6e4   :  { %2761 = vmatpush.msrb.mxu3 %v2714_v59 }
 0x6e5   :  { %2762 = vmatmul.f32.vlgmr.msrb.gmra.mxu3 %v4137_v12 }
 0x6ed   :  { %2765 = vmatmul.f32.gmra.mxu3 %v4146_v28 }
 0x702   :  { %v2226_v3 = vpop.f32.mrf.mxu2 }
 0x708   :  { %v2255_v34 = vpop.f32.mrf.mxu3 }
 0x709   :  { %v2256_v63 = vadd.f32 %v2255_v34, %v2226_v3 }
 0x70a   :  { %v2229_v27 = vpop.f32.mrf.mxu2 }
 0x710   :  { %v2258_v40 = vpop.f32.mrf.mxu3 }
 0x711   :  { %v2259_v4 = vadd.f32 %v2258_v40, %v2229_v27 }
 0x712   :  { %v2366_v45 = vpop.f32.mrf.mxu2 }
 0x713   :  { %v4186_v1 = vadd.f32 %v2366_v45, %v2256_v63 }
 0x71a   :  { %v2369_v23 = vpop.f32.mrf.mxu2 }
 0x71b   :  { %v4188_v6 = vadd.f32 %v2369_v23, %v2259_v4 }
 0x728   :  { %v2424_v17 = vpop.f32.mrf.mxu3 }
 0x730   :  { %v2427_v2 = vpop.f32.mrf.mxu3 }
 0x732   :  { %v2447_v21 = vpop.f32.mrf.mxu2 }
 0x733   :  { %v2448_v62 = vadd.f32 %v2447_v21, %v2424_v17 }
 0x73a   :  { %v2450_v36 = vpop.f32.mrf.mxu2 }
 0x73b   :  { %v2451_v8 = vadd.f32 %v2450_v36, %v2427_v2 }
 0x73d   :  { %2476 = vmatpush.msra.mxu0 %v2451_v8  ;;  %v2680_v8 = vld [vmem:[#allocation11 + $0x50] sm:$0xff] }
 0x73f   :  { %2477 = vmatpush.msra.mxu0 %v2448_v62  ;;  %v2745_v62 = vld [vmem:[#allocation9 + $0x6f8] sm:$0xff] }
 0x740   :  { %3452 = vmatmul.msk.f32.vlgmr.msra.gmra.mxu0 %vm2202_vm1, %v2454_v42  ;;  %v2742_v42 = vld [vmem:[#allocation9 + $0x6e0] sm:$0xff] }
 0x748   :  { %v2560_v11 = vpop.f32.mrf.mxu3  ;;  %3453 = vmatmul.msk.f32.gmra.mxu0 %vm2202_vm1, %v2455_v0  ;;  %v2681_v0 = vld [vmem:[#allocation11 + $0x58] sm:$0xff] }
 0x749   :  { %v2561_v41 = vadd.f32 %v2560_v11, %v2537_v10  ;;  %v2741_v10 = vld [vmem:[#allocation9 + $0x6d8] sm:$0xff]  ;;  %v2740_v11 = vld [vmem:[#allocation9 + $0x6d0] sm:$0xff] }
 0x750   :  { %v2563_v51 = vpop.f32.mrf.mxu3 }
 0x751   :  { %v2564_v15 = vadd.f32 %v2563_v51, %v2540_v13  ;;  %v2739_v13 = vld [vmem:[#allocation9 + $0x6c8] sm:$0xff]  ;;  %v2738_v51 = vld [vmem:[#allocation9 + $0x6c0] sm:$0xff] }
 0x752   :  { %v2650_v45 = vpop.f32.mrf.mxu2 }
 0x753   :  { %2589 = vmatpush.msrb.mxu0 %v2564_v15  ;;  %v2737_v15 = vld [vmem:[#allocation9 + $0x6b8] sm:$0xff] }
 0x755   :  { %2590 = vmatpush.msrb.mxu0 %v2561_v41  ;;  %v2736_v41 = vld [vmem:[#allocation9 + $0x6b0] sm:$0xff] }
 0x756   :  { %3454 = vmatmul.msk.f32.vlgmr.msrb.gmra.mxu0 %vm2202_vm1, %v2567_v60  ;;  %v2735_v60 = vld [vmem:[#allocation9 + $0x6a8] sm:$0xff] }
 0x757   :  { %2656 = vmatpush.msra.mxu0 %v2632_v16  ;;  %v2734_v16 = vld [vmem:[#allocation9 + $0x6a0] sm:$0xff] }
 0x759   :  { %2657 = vmatpush.msra.mxu0 %v2631_v18  ;;  %v2733_v18 = vld [vmem:[#allocation9 + $0x698] sm:$0xff] }
 0x75a   :  { %v2653_v17 = vpop.f32.mrf.mxu2 }
 0x75b   :  { %2658 = vmatpush.msra.mxu0 %v2630_v61  ;;  %v2732_v61 = vld [vmem:[#allocation9 + $0x690] sm:$0xff] }
 0x75d   :  { %2659 = vmatpush.msra.mxu0 %v2629_v9  ;;  %v2731_v9 = vld [vmem:[#allocation9 + $0x688] sm:$0xff] }
 0x75e   :  { %3455 = vmatmul.msk.f32.gmra.mxu0 %vm2202_vm1, %v2568_v19  ;;  %v2730_v19 = vld [vmem:[#allocation9 + $0x680] sm:$0xff] }
 0x75f   :  { %2660 = vmatpush.msra.mxu0 %v2628_v55  ;;  %v2955_v55 = vld [vmem:[#allocation9 + $0x878] sm:$0xff] }
 0x761   :  { %2661 = vmatpush.msra.mxu0 %v2627_v7  ;;  %v2954_v7 = vld [vmem:[#allocation9 + $0x870] sm:$0xff] }
 0x763   :  { %2662 = vmatpush.msra.mxu0 %v2626_v26  ;;  %v2953_v26 = vld [vmem:[#allocation9 + $0x868] sm:$0xff] }
 0x765   :  { %2663 = vmatpush.msra.mxu0 %v2625_v50  ;;  %v2952_v50 = vld [vmem:[#allocation9 + $0x860] sm:$0xff] }
 0x767   :  { %2664 = vmatpush.msra.mxu0 %v2624_v32  ;;  %v2951_v32 = vld [vmem:[#allocation9 + $0x858] sm:$0xff] }
 0x769   :  { %2665 = vmatpush.msra.mxu0 %v2623_v57  ;;  %v2950_v57 = vld [vmem:[#allocation9 + $0x850] sm:$0xff] }
 0x76b   :  { %2666 = vmatpush.msra.mxu0 %v2622_v20  ;;  %v2949_v20 = vld [vmem:[#allocation9 + $0x848] sm:$0xff] }
 0x76d   :  { %2667 = vmatpush.msra.mxu0 %v2621_v35  ;;  %v2948_v35 = vld [vmem:[#allocation9 + $0x840] sm:$0xff] }
 0x76f   :  { %2668 = vmatpush.msra.mxu0 %v2620_v5  ;;  %v2947_v5 = vld [vmem:[#allocation9 + $0x838] sm:$0xff] }
 0x771   :  { %2669 = vmatpush.msra.mxu0 %v2619_v22  ;;  %v2946_v22 = vld [vmem:[#allocation9 + $0x830] sm:$0xff] }
 0x773   :  { %2670 = vmatpush.msra.mxu0 %v2618_v44  ;;  %v2945_v44 = vld [vmem:[#allocation9 + $0x828] sm:$0xff] }
 0x775   :  { %2671 = vmatpush.msra.mxu0 %v2617_v25  ;;  %v2944_v25 = vld [vmem:[#allocation9 + $0x820] sm:$0xff] }
 0x776   :  { %2672 = vmatmul.f32.vlgmr.msra.gmra.mxu0 %v4156_v56 }
 0x777   :  { %2859 = vmatpush.msrb.mxu0 %v2842_v24  ;;  %v2943_v24 = vld [vmem:[#allocation9 + $0x818] sm:$0xff] }
 0x779   :  { %2860 = vmatpush.msrb.mxu0 %v2841_v31  ;;  %v2942_v31 = vld [vmem:[#allocation9 + $0x810] sm:$0xff] }
 0x77b   :  { %2861 = vmatpush.msrb.mxu0 %v2840_v38  ;;  %v2941_v38 = vld [vmem:[#allocation9 + $0x808] sm:$0xff] }
 0x77d   :  { %2862 = vmatpush.msrb.mxu0 %v2839_v48  ;;  %v2940_v48 = vld [vmem:[#allocation9 + $0x800] sm:$0xff] }
 0x77e   :  { %2675 = vmatmul.f32.gmra.mxu0 %v4162_v14 }
 0x77f   :  { %2863 = vmatpush.msrb.mxu0 %v2838_v39 }
 0x781   :  { %2864 = vmatpush.msrb.mxu0 %v2837_v54 }
 0x783   :  { %2865 = vmatpush.msrb.mxu0 %v2836_v29 }
 0x785   :  { %2866 = vmatpush.msrb.mxu0 %v2835_v33 }
 0x787   :  { %2867 = vmatpush.msrb.mxu0 %v2834_v58  ;;  %v2763_v58 = vpop.f32.mrf.mxu3 }
 0x789   :  { %2868 = vmatpush.msrb.mxu0 %v2833_v43 }
 0x78b   :  { %2869 = vmatpush.msrb.mxu0 %v2832_v46 }
 0x78d   :  { %2870 = vmatpush.msrb.mxu0 %v2831_v47 }
 0x78f   :  { %2871 = vmatpush.msrb.mxu0 %v2830_v30  ;;  %v2766_v46 = vpop.f32.mrf.mxu3 }
 0x791   :  { %2872 = vmatpush.msrb.mxu0 %v2829_v49 }
 0x793   :  { %2873 = vmatpush.msrb.mxu0 %v2828_v52  ;;  %v2793_v52 = vld [vmem:[#allocation11 + $0x60] sm:$0xff] }
 0x795   :  { %2874 = vmatpush.msrb.mxu0 %v2827_v37  ;;  %v2858_v37 = vld [vmem:[#allocation9 + $0x7f8] sm:$0xff] }
 0x796   :  { %2875 = vmatmul.f32.vlgmr.msrb.gmra.mxu0 %v4137_v12 }
 0x79e   :  { %2878 = vmatmul.f32.gmra.mxu0 %v4146_v28 }
 0x7bd   :  { %v2479_v53 = vpop.f32.mrf.mxu0 }
 0x7be   :  { %v2485_v59 = vadd.f32 %v2479_v53, %v4186_v1  ;;  %v2744_v1 = vld [vmem:[#allocation9 + $0x6f0] sm:$0xff]  ;;  %v2855_v53 = vld [vmem:[#allocation9 + $0x7e0] sm:$0xff] }
 0x7c5   :  { %v2482_v3 = vpop.f32.mrf.mxu0 }
 0x7c6   :  { %v2486_v34 = vadd.f32 %v2482_v3, %v4188_v6  ;;  %v2743_v6 = vld [vmem:[#allocation9 + $0x6e8] sm:$0xff]  ;;  %v2854_v3 = vld [vmem:[#allocation9 + $0x7d8] sm:$0xff] }
 0x7d3   :  { %v2592_v63 = vpop.f32.mrf.mxu0 }
 0x7d4   :  { %v4200_v27 = vadd.f32 %v2592_v63, %v2485_v59  ;;  %v2794_v59 = vld [vmem:[#allocation11 + $0x68] sm:$0xff] }
 0x7d5   :  { %v2852_v63 = vld [vmem:[#allocation9 + $0x7c8] sm:$0xff] }
 0x7db   :  { %v2595_v40 = vpop.f32.mrf.mxu0 }
 0x7dc   :  { %v4202_v4 = vadd.f32 %v2595_v40, %v2486_v34  ;;  %v2853_v34 = vld [vmem:[#allocation9 + $0x7d0] sm:$0xff]  ;;  %v2850_v40 = vld [vmem:[#allocation9 + $0x7b8] sm:$0xff] }
 0x7f3   :  { %v2673_v23 = vpop.f32.mrf.mxu0 }
 0x7f4   :  { %v2674_v36 = vadd.f32 %v2673_v23, %v2650_v45  ;;  %v2848_v45 = vld [vmem:[#allocation9 + $0x7a8] sm:$0xff]  ;;  %v2847_v23 = vld [vmem:[#allocation9 + $0x7a0] sm:$0xff] }
 0x7fb   :  { %v2676_v21 = vpop.f32.mrf.mxu0 }
 0x7fc   :  { %v2677_v2 = vadd.f32 %v2676_v21, %v2653_v17  ;;  %v2846_v17 = vld [vmem:[#allocation9 + $0x798] sm:$0xff]  ;;  %v2845_v21 = vld [vmem:[#allocation9 + $0x790] sm:$0xff] }
 0x7fe   :  { %2702 = vmatpush.msrb.mxu1 %v2677_v2  ;;  %v2844_v2 = vld [vmem:[#allocation9 + $0x788] sm:$0xff] }
 0x800   :  { %2703 = vmatpush.msrb.mxu1 %v2674_v36  ;;  %v2843_v36 = vld [vmem:[#allocation9 + $0x780] sm:$0xff] }
 0x801   :  { %3456 = vmatmul.msk.f32.vlgmr.msrb.gmra.mxu1 %vm2202_vm1, %v2680_v8 }
 0x802   :  { %2769 = vmatpush.msra.mxu1 %v2745_v62 }
 0x804   :  { %2770 = vmatpush.msra.mxu1 %v2744_v1 }
 0x806   :  { %2771 = vmatpush.msra.mxu1 %v2743_v6 }
 0x808   :  { %2772 = vmatpush.msra.mxu1 %v2742_v42 }
 0x809   :  { %3457 = vmatmul.msk.f32.gmra.mxu1 %vm2202_vm1, %v2681_v0 }
 0x80a   :  { %2773 = vmatpush.msra.mxu1 %v2741_v10 }
 0x80c   :  { %2774 = vmatpush.msra.mxu1 %v2740_v11 }
 0x80e   :  { %2775 = vmatpush.msra.mxu1 %v2739_v13 }
 0x810   :  { %2776 = vmatpush.msra.mxu1 %v2738_v51 }
 0x812   :  { %2777 = vmatpush.msra.mxu1 %v2737_v15  ;;  %v2906_v15 = vld [vmem:[#allocation11 + $0x70] sm:$0xff] }
 0x813   :  { %v2876_v42 = vpop.f32.mrf.mxu0 }
 0x814   :  { %2778 = vmatpush.msra.mxu1 %v2736_v41  ;;  %v2971_v41 = vld [vmem:[#allocation9 + $0x8f8] sm:$0xff] }
 0x816   :  { %2779 = vmatpush.msra.mxu1 %v2735_v60  ;;  %v2970_v60 = vld [vmem:[#allocation9 + $0x8f0] sm:$0xff] }
 0x818   :  { %2780 = vmatpush.msra.mxu1 %v2734_v16  ;;  %v2969_v16 = vld [vmem:[#allocation9 + $0x8e8] sm:$0xff] }
 0x81a   :  { %2781 = vmatpush.msra.mxu1 %v2733_v18  ;;  %v2968_v18 = vld [vmem:[#allocation9 + $0x8e0] sm:$0xff] }
 0x81b   :  { %v2879_v10 = vpop.f32.mrf.mxu0 }
 0x81c   :  { %2782 = vmatpush.msra.mxu1 %v2732_v61  ;;  %v2907_v61 = vld [vmem:[#allocation11 + $0x78] sm:$0xff] }
 0x81e   :  { %2783 = vmatpush.msra.mxu1 %v2731_v9  ;;  %v2967_v9 = vld [vmem:[#allocation9 + $0x8d8] sm:$0xff] }
 0x820   :  { %2784 = vmatpush.msra.mxu1 %v2730_v19  ;;  %v2966_v19 = vld [vmem:[#allocation9 + $0x8d0] sm:$0xff] }
 0x821   :  { %2785 = vmatmul.f32.vlgmr.msra.gmra.mxu1 %v4156_v56 }
 0x822   :  { %2972 = vmatpush.msrb.mxu1 %v2955_v55  ;;  %v2965_v55 = vld [vmem:[#allocation9 + $0x8c8] sm:$0xff] }
 0x824   :  { %2973 = vmatpush.msrb.mxu1 %v2954_v7  ;;  %v2964_v7 = vld [vmem:[#allocation9 + $0x8c0] sm:$0xff] }
 0x826   :  { %2974 = vmatpush.msrb.mxu1 %v2953_v26  ;;  %v2963_v26 = vld [vmem:[#allocation9 + $0x8b8] sm:$0xff] }
 0x828   :  { %2975 = vmatpush.msrb.mxu1 %v2952_v50  ;;  %v2962_v50 = vld [vmem:[#allocation9 + $0x8b0] sm:$0xff] }
 0x829   :  { %2788 = vmatmul.f32.gmra.mxu1 %v4162_v14 }
 0x82a   :  { %2976 = vmatpush.msrb.mxu1 %v2951_v32  ;;  %v2961_v32 = vld [vmem:[#allocation9 + $0x8a8] sm:$0xff] }
 0x82c   :  { %2977 = vmatpush.msrb.mxu1 %v2950_v57  ;;  %v2960_v57 = vld [vmem:[#allocation9 + $0x8a0] sm:$0xff] }
 0x82e   :  { %2978 = vmatpush.msrb.mxu1 %v2949_v20  ;;  %v2959_v20 = vld [vmem:[#allocation9 + $0x898] sm:$0xff] }
 0x830   :  { %2979 = vmatpush.msrb.mxu1 %v2948_v35  ;;  %v2958_v35 = vld [vmem:[#allocation9 + $0x890] sm:$0xff] }
 0x832   :  { %2980 = vmatpush.msrb.mxu1 %v2947_v5  ;;  %v2957_v5 = vld [vmem:[#allocation9 + $0x888] sm:$0xff] }
 0x834   :  { %2981 = vmatpush.msrb.mxu1 %v2946_v22  ;;  %v2956_v22 = vld [vmem:[#allocation9 + $0x880] sm:$0xff] }
 0x836   :  { %2982 = vmatpush.msrb.mxu1 %v2945_v44 }
 0x838   :  { %2983 = vmatpush.msrb.mxu1 %v2944_v25 }
 0x83a   :  { %2984 = vmatpush.msrb.mxu1 %v2943_v24 }
 0x83c   :  { %2985 = vmatpush.msrb.mxu1 %v2942_v31 }
 0x83e   :  { %2986 = vmatpush.msrb.mxu1 %v2941_v38  ;;  %v3052_v38 = vld [vmem:[#allocation12] sm:$0xff] }
 0x83f   :  { %3056 = vperm.xlu1 %3490, %v3052_v38   ;;  %v3269_v38 = vld [vmem:[#allocation14 + $0x188] sm:$0xff] }
 0x840   :  { %2987 = vmatpush.msrb.mxu1 %v2940_v48  ;;  %v3088_v48 = vld [vmem:[#allocation14 + $0x78] sm:$0xff] }
 0x841   :  { %2988 = vmatmul.f32.vlgmr.msrb.gmra.mxu1 %v4137_v12  ;;  %v2857_v12 = vld [vmem:[#allocation9 + $0x7f0] sm:$0xff] }
 0x849   :  { %2991 = vmatmul.f32.gmra.mxu1 %v4146_v28  ;;  %v2856_v28 = vld [vmem:[#allocation9 + $0x7e8] sm:$0xff] }
 0x87e   :  { %v2705_v39 = vpop.f32.mrf.mxu1 }
 0x87f   :  { %v2711_v54 = vadd.f32 %v2705_v39, %v4200_v27  ;;  %v2851_v27 = vld [vmem:[#allocation9 + $0x7c0] sm:$0xff]  ;;  %v3087_v39 = vld [vmem:[#allocation14 + $0x70] sm:$0xff] }
 0x886   :  { %v2708_v29 = vpop.f32.mrf.mxu1 }
 0x887   :  { %v2712_v33 = vadd.f32 %v2708_v29, %v4202_v4  ;;  %v2849_v4 = vld [vmem:[#allocation9 + $0x7b0] sm:$0xff]  ;;  %v3086_v29 = vld [vmem:[#allocation14 + $0x68] sm:$0xff] }
 0x89e   :  { %v2786_v43 = vpop.f32.mrf.mxu1 }
 0x89f   :  { %v2787_v49 = vadd.f32 %v2786_v43, %v2763_v58  ;;  %v3142_v58 = vld [vmem:[#allocation14 + $0xb0] sm:$0xff]  ;;  %v3084_v43 = vld [vmem:[#allocation14 + $0x58] sm:$0xff] }
 0x8a6   :  { %v2789_v47 = vpop.f32.mrf.mxu1 }
 0x8a7   :  { %v2790_v30 = vadd.f32 %v2789_v47, %v2766_v46  ;;  %v3140_v46 = vld [vmem:[#allocation14 + $0xa0] sm:$0xff] }
 0x8a9   :  { %2815 = vmatpush.msra.mxu2 %v2790_v30  ;;  %v3083_v30 = vld [vmem:[#allocation14 + $0x50] sm:$0xff] }
 0x8ab   :  { %2816 = vmatpush.msra.mxu2 %v2787_v49 }
 0x8ac   :  { %3458 = vmatmul.msk.f32.vlgmr.msra.gmra.mxu2 %vm2202_vm1, %v2793_v52  ;;  %v3082_v52 = vld [vmem:[#allocation14 + $0x48] sm:$0xff] }
 0x8ad   :  { %2882 = vmatpush.msrb.mxu2 %v2858_v37 }
 0x8af   :  { %2883 = vmatpush.msrb.mxu2 %v2857_v12 }
 0x8b1   :  { %2884 = vmatpush.msrb.mxu2 %v2856_v28 }
 0x8b3   :  { %2885 = vmatpush.msrb.mxu2 %v2855_v53 }
 0x8b4   :  { %3459 = vmatmul.msk.f32.gmra.mxu2 %vm2202_vm1, %v2794_v59  ;;  %v3019_v59 = vld [vmem:[#allocation11 + $0x80] sm:$0xff] }
 0x8b5   :  { %2886 = vmatpush.msrb.mxu2 %v2854_v3  ;;  %v3079_v3 = vld [vmem:[#allocation14 + $0x38] sm:$0xff] }
 0x8b7   :  { %2887 = vmatpush.msrb.mxu2 %v2853_v34  ;;  %v3078_v34 = vld [vmem:[#allocation14 + $0x30] sm:$0xff] }
 0x8b9   :  { %2888 = vmatpush.msrb.mxu2 %v2852_v63  ;;  %v3077_v63 = vld [vmem:[#allocation14 + $0x28] sm:$0xff] }
 0x8bb   :  { %2889 = vmatpush.msrb.mxu2 %v2851_v27  ;;  %v3076_v27 = vld [vmem:[#allocation14 + $0x20] sm:$0xff] }
 0x8bd   :  { %2890 = vmatpush.msrb.mxu2 %v2850_v40  ;;  %v3020_v40 = vld [vmem:[#allocation11 + $0x88] sm:$0xff] }
 0x8be   :  { %v2989_v47 = vpop.f32.mrf.mxu1 }
 0x8bf   :  { %2891 = vmatpush.msrb.mxu2 %v2849_v4  ;;  %v3081_v4 = vld [vmem:[#allocation14 + $0x40] sm:$0xff] }
 0x8c1   :  { %2892 = vmatpush.msrb.mxu2 %v2848_v45  ;;  %v3075_v45 = vld [vmem:[#allocation14 + $0x18] sm:$0xff] }
 0x8c3   :  { %2893 = vmatpush.msrb.mxu2 %v2847_v23  ;;  %v3139_v23 = vld [vmem:[#allocation14 + $0x98] sm:$0xff] }
 0x8c5   :  { %2894 = vmatpush.msrb.mxu2 %v2846_v17  ;;  %v3176_v17 = vld [vmem:[#allocation14 + $0xf8] sm:$0xff] }
 0x8c6   :  { %v2992_v37 = vpop.f32.mrf.mxu1 }
 0x8c7   :  { %2895 = vmatpush.msrb.mxu2 %v2845_v21  ;;  %v3074_v21 = vld [vmem:[#allocation14 + $0x10] sm:$0xff] }
 0x8c9   :  { %2896 = vmatpush.msrb.mxu2 %v2844_v2  ;;  %v3138_v2 = vld [vmem:[#allocation14 + $0x90] sm:$0xff] }
 0x8cb   :  { %2897 = vmatpush.msrb.mxu2 %v2843_v36  ;;  %v3175_v36 = vld [vmem:[#allocation14 + $0xf0] sm:$0xff] }
 0x8cc   :  { %2898 = vmatmul.f32.vlgmr.msrb.gmra.mxu2 %v4156_v56 }
 0x8cd   :  { %3100 = vmatpush.msra.mxu2 %v3088_v48  ;;  %v3202_v48 = vld [vmem:[#allocation14 + $0x100] sm:$0xff] }
 0x8cf   :  { %3101 = vmatpush.msra.mxu2 %v3087_v39  ;;  %v3235_v39 = vld [vmem:[#allocation14 + $0x140] sm:$0xff] }
 0x8d1   :  { %3102 = vmatpush.msra.mxu2 %v3086_v29 }
 0x8d4   :  { %2901 = vmatmul.f32.gmra.mxu2 %v4162_v14 }
 0x92f   :  { %v2818_v8 = vpop.f32.mrf.mxu2 }
 0x930   :  { %v2824_v62 = vadd.f32 %v2818_v8, %v2711_v54  ;;  %v3053_v54 = vld [vmem:[#allocation12 + $0x8] sm:$0xff]  ;;  %v3073_v8 = vld [vmem:[#allocation14 + $0x8] sm:$0xff] }
 0x931   :  { %3061 = vperm.xlu1 %3490, %v3053_v54   ;;  %v3268_v54 = vld [vmem:[#allocation14 + $0x180] sm:$0xff] }
 0x937   :  { %v2821_v1 = vpop.f32.mrf.mxu2 }
 0x938   :  { %v2825_v6 = vadd.f32 %v2821_v1, %v2712_v33  ;;  %v3143_v33 = vld [vmem:[#allocation14 + $0xb8] sm:$0xff]  ;;  %v3174_v1 = vld [vmem:[#allocation14 + $0xe8] sm:$0xff] }
 0x939   :  { %3155 = vmatpush.msra.mxu1 %v3143_v33  ;;  %v3057_v33 = vpop.permute.xlu1 %3056 }
 0x93b   :  { %3156 = vmatpush.msra.mxu1 %v3142_v58 }
 0x94f   :  { %v2899_v0 = vpop.f32.mrf.mxu2 }
 0x950   :  { %v2900_v51 = vadd.f32 %v2899_v0, %v2876_v42  ;;  %v3136_v42 = vld [vmem:[#allocation14 + $0x80] sm:$0xff] }
 0x951   :  { %v3173_v0 = vld [vmem:[#allocation14 + $0xe0] sm:$0xff] }
 0x957   :  { %v2902_v11 = vpop.f32.mrf.mxu2 }
 0x958   :  { %v2903_v13 = vadd.f32 %v2902_v11, %v2879_v10  ;;  %v3209_v10 = vld [vmem:[#allocation14 + $0x138] sm:$0xff] }
 0x959   :  { %v3242_v11 = vld [vmem:[#allocation14 + $0x178] sm:$0xff] }
 0x95a   :  { %2928 = vmatpush.msra.mxu3 %v2903_v13  ;;  %v3275_v13 = vld [vmem:[#allocation14 + $0x1b8] sm:$0xff] }
 0x95c   :  { %2929 = vmatpush.msra.mxu3 %v2900_v51  ;;  %v3172_v51 = vld [vmem:[#allocation14 + $0xd8] sm:$0xff] }
 0x95d   :  { %3460 = vmatmul.msk.f32.vlgmr.msra.gmra.mxu3 %vm2202_vm1, %v2906_v15  ;;  %v3208_v15 = vld [vmem:[#allocation14 + $0x130] sm:$0xff] }
 0x95e   :  { %2995 = vmatpush.msrb.mxu3 %v2971_v41  ;;  %v3241_v41 = vld [vmem:[#allocation14 + $0x170] sm:$0xff] }
 0x960   :  { %2996 = vmatpush.msrb.mxu3 %v2970_v60  ;;  %v3274_v60 = vld [vmem:[#allocation14 + $0x1b0] sm:$0xff] }
 0x962   :  { %2997 = vmatpush.msrb.mxu3 %v2969_v16  ;;  %v3171_v16 = vld [vmem:[#allocation14 + $0xd0] sm:$0xff] }
 0x964   :  { %2998 = vmatpush.msrb.mxu3 %v2968_v18  ;;  %v3207_v18 = vld [vmem:[#allocation14 + $0x128] sm:$0xff] }
 0x965   :  { %3461 = vmatmul.msk.f32.gmra.mxu3 %vm2202_vm1, %v2907_v61  ;;  %v3240_v61 = vld [vmem:[#allocation14 + $0x168] sm:$0xff] }
 0x966   :  { %2999 = vmatpush.msrb.mxu3 %v2967_v9  ;;  %v3273_v9 = vld [vmem:[#allocation14 + $0x1a8] sm:$0xff] }
 0x968   :  { %3000 = vmatpush.msrb.mxu3 %v2966_v19  ;;  %v3170_v19 = vld [vmem:[#allocation14 + $0xc8] sm:$0xff] }
 0x96a   :  { %3001 = vmatpush.msrb.mxu3 %v2965_v55  ;;  %v3206_v55 = vld [vmem:[#allocation14 + $0x120] sm:$0xff] }
 0x96c   :  { %3002 = vmatpush.msrb.mxu3 %v2964_v7  ;;  %v3239_v7 = vld [vmem:[#allocation14 + $0x160] sm:$0xff] }
 0x96e   :  { %3003 = vmatpush.msrb.mxu3 %v2963_v26  ;;  %v3272_v26 = vld [vmem:[#allocation14 + $0x1a0] sm:$0xff] }
 0x970   :  { %3004 = vmatpush.msrb.mxu3 %v2962_v50  ;;  %v3169_v50 = vld [vmem:[#allocation14 + $0xc0] sm:$0xff] }
 0x972   :  { %3005 = vmatpush.msrb.mxu3 %v2961_v32  ;;  %v3205_v32 = vld [vmem:[#allocation14 + $0x118] sm:$0xff] }
 0x974   :  { %3006 = vmatpush.msrb.mxu3 %v2960_v57  ;;  %v3238_v57 = vld [vmem:[#allocation14 + $0x158] sm:$0xff] }
 0x976   :  { %3007 = vmatpush.msrb.mxu3 %v2959_v20  ;;  %v3271_v20 = vld [vmem:[#allocation14 + $0x198] sm:$0xff] }
 0x978   :  { %3008 = vmatpush.msrb.mxu3 %v2958_v35  ;;  %v3204_v35 = vld [vmem:[#allocation14 + $0x110] sm:$0xff] }
 0x97a   :  { %3009 = vmatpush.msrb.mxu3 %v2957_v5  ;;  %v3237_v5 = vld [vmem:[#allocation14 + $0x150] sm:$0xff] }
 0x97c   :  { %3010 = vmatpush.msrb.mxu3 %v2956_v22  ;;  %v3270_v22 = vld [vmem:[#allocation14 + $0x190] sm:$0xff] }
 0x97d   :  { %3011 = vmatmul.f32.vlgmr.msrb.gmra.mxu3 %v4156_v56  ;;  %v3085_v56 = vld [vmem:[#allocation14 + $0x60] sm:$0xff] }
 0x97e   :  { %3103 = vmatpush.msra.mxu2 %v3085_v56  ;;  %3221 = vmatpush.msra.mxu3 %v3209_v10 }
 0x980   :  { %3104 = vmatpush.msra.mxu2 %v3084_v43  ;;  %3222 = vmatpush.msra.mxu3 %v3208_v15 }
 0x982   :  { %3105 = vmatpush.msra.mxu2 %v3083_v30  ;;  %3223 = vmatpush.msra.mxu3 %v3207_v18 }
 0x984   :  { %3106 = vmatpush.msra.mxu2 %v3082_v52  ;;  %3224 = vmatpush.msra.mxu3 %v3206_v55  ;;  %v3308_v52 = vld [vmem:[#allocation14 + $0x1f8] sm:$0xff] }
 0x985   :  { %3014 = vmatmul.f32.gmra.mxu3 %v4162_v14  ;;  %v3141_v14 = vld [vmem:[#allocation14 + $0xa8] sm:$0xff] }
 0x986   :  { %3157 = vmatpush.msra.mxu1 %v3141_v14  ;;  %3107 = vmatpush.msra.mxu2 %v3081_v4  ;;  %v3302_v4 = vld [vmem:[#allocation14 + $0x1c8] sm:$0xff] }
 0x987   :  { %3225 = vmatpush.msra.mxu3 %v3205_v32  ;;  %v3492_v32 = vld [vmem:[#allocation18] ss:$0 sm:$0xff] }
 0x988   :  { %3158 = vmatpush.msra.mxu1 %v3140_v46  ;;  %3188 = vmatpush.msrb.mxu2 %v3176_v17  ;;  %v3346_v17 = vld [vmem:[#allocation17 + $0x38] sm:$0xff] }
 0x989   :  { %3226 = vmatpush.msra.mxu3 %v3204_v35 }
 0x98a   :  { %3159 = vmatpush.msra.mxu1 %v3139_v23  ;;  %3189 = vmatpush.msrb.mxu2 %v3175_v36  ;;  %v3343_v36 = vld [vmem:[#allocation17 + $0x20] sm:$0xff] }
 0x98c   :  { %3160 = vmatpush.msra.mxu1 %v3138_v2  ;;  %3190 = vmatpush.msrb.mxu2 %v3174_v1  ;;  %v3344_v2 = vld [vmem:[#allocation17 + $0x28] sm:$0xff] }
 0x98d   :  { %v3340_v1 = vld [vmem:[#allocation17 + $0x8] sm:$0xff] }
 0x98e   :  { %3191 = vmatpush.msrb.mxu2 %v3173_v0 }
 0x990   :  { %3192 = vmatpush.msrb.mxu2 %v3172_v51 }
 0x992   :  { %3193 = vmatpush.msrb.mxu2 %v3171_v16 }
 0x994   :  { %3194 = vmatpush.msrb.mxu2 %v3170_v19  ;;  %v3491_v19 = vld [vmem:[#allocation15] ss:$0 sm:$0xff] }
 0x996   :  { %3195 = vmatpush.msrb.mxu2 %v3169_v50 }
 0x9e0   :  { %v2931_v44 = vpop.f32.mrf.mxu3 }
 0x9e1   :  { %v4220_v25 = vadd.f32 %v2931_v44, %v2824_v62  ;;  %v3137_v62 = vld [vmem:[#allocation14 + $0x88] sm:$0xff] }
 0x9e2   :  { %3161 = vmatpush.msra.mxu1 %v3137_v62  ;;  %v3203_v44 = vld [vmem:[#allocation14 + $0x108] sm:$0xff]  ;;  %v3341_v62 = vld [vmem:[#allocation17 + $0x10] sm:$0xff] }
 0x9e3   :  { %3227 = vmatpush.msra.mxu3 %v3203_v44 }
 0x9e4   :  { %3162 = vmatpush.msra.mxu1 %v3136_v42 }
 0x9e5   :  { %3228 = vmatpush.msra.mxu3 %v3202_v48 }
 0x9e6   :  { %3287 = vmatpush.msrb.mxu1 %v3275_v13 }
 0x9e7   :  { %3362 = vmatpush.msrb.mxu3 %v3346_v17 }
 0x9e8   :  { %v2934_v24 = vpop.f32.mrf.mxu3  ;;  %3288 = vmatpush.msrb.mxu1 %v3274_v60 }
 0x9e9   :  { %v4222_v31 = vadd.f32 %v2934_v24, %v2825_v6  ;;  %v3072_v6 = vld [vmem:[#allocation14] sm:$0xff]  ;;  %v3236_v24 = vld [vmem:[#allocation14 + $0x148] sm:$0xff] }
 0x9ea   :  { %3289 = vmatpush.msrb.mxu1 %v3273_v9 }
 0x9ec   :  { %3290 = vmatpush.msrb.mxu1 %v3272_v26 }
 0x9ee   :  { %3291 = vmatpush.msrb.mxu1 %v3271_v20 }
 0x9f0   :  { %3292 = vmatpush.msrb.mxu1 %v3270_v22 }
 0x9f2   :  { %3293 = vmatpush.msrb.mxu1 %v3269_v38 }
 0x9f4   :  { %3294 = vmatpush.msrb.mxu1 %v3268_v54 }
 0xa00   :  { %v3012_v49 = vpop.f32.mrf.mxu3 }
 0xa01   :  { %v3013_v53 = vadd.f32 %v3012_v49, %v2989_v47  ;;  %v3062_v47 = vpop.permute.xlu1 %3061 }
 0xa08   :  { %v3015_v12 = vpop.f32.mrf.mxu3 }
 0xa09   :  { %v3016_v28 = vadd.f32 %v3015_v12, %v2992_v37 }
 0xa0b   :  { %3041 = vmatpush.msra.mxu0 %v3016_v28 }
 0xa0d   :  { %3042 = vmatpush.msra.mxu0 %v3013_v53  ;;  %v3306_v53 = vld [vmem:[#allocation14 + $0x1e8] sm:$0xff] }
 0xa0e   :  { %3462 = vmatmul.msk.f32.vlgmr.msra.gmra.mxu0 %vm2202_vm1, %v3019_v59 }
 0xa0f   :  { %3123 = vmatpush.msrb.mxu0 %v3079_v3  ;;  %v3304_v3 = vld [vmem:[#allocation14 + $0x1d8] sm:$0xff] }
 0xa11   :  { %3124 = vmatpush.msrb.mxu0 %v3078_v34 }
 0xa13   :  { %3125 = vmatpush.msrb.mxu0 %v3077_v63 }
 0xa15   :  { %3126 = vmatpush.msrb.mxu0 %v3076_v27 }
 0xa16   :  { %3463 = vmatmul.msk.f32.gmra.mxu0 %vm2202_vm1, %v3020_v40  ;;  %v3303_v40 = vld [vmem:[#allocation14 + $0x1d0] sm:$0xff] }
 0xa17   :  { %3127 = vmatpush.msrb.mxu0 %v3075_v45  ;;  %v3301_v45 = vld [vmem:[#allocation14 + $0x1c0] sm:$0xff] }
 0xa19   :  { %3128 = vmatpush.msrb.mxu0 %v3074_v21  ;;  %v3345_v21 = vld [vmem:[#allocation17 + $0x30] sm:$0xff] }
 0xa1a   :  { %3363 = vmatpush.msrb.mxu3 %v3345_v21 }
 0xa1b   :  { %3129 = vmatpush.msrb.mxu0 %v3073_v8  ;;  %v3342_v8 = vld [vmem:[#allocation17 + $0x18] sm:$0xff] }
 0xa1c   :  { %3364 = vmatpush.msrb.mxu3 %v3344_v2 }
 0xa1d   :  { %3130 = vmatpush.msrb.mxu0 %v3072_v6  ;;  %v3339_v6 = vld [vmem:[#allocation17] sm:$0xff] }
 0xa1e   :  { %3365 = vmatpush.msrb.mxu3 %v3343_v36 }
 0xa1f   :  { %3254 = vmatpush.msra.mxu0 %v3242_v11 }
 0xa20   :  { %3366 = vmatpush.msrb.mxu3 %v3342_v8 }
 0xa21   :  { %3255 = vmatpush.msra.mxu0 %v3241_v41 }
 0xa22   :  { %3367 = vmatpush.msrb.mxu3 %v3341_v62 }
 0xa23   :  { %3256 = vmatpush.msra.mxu0 %v3240_v61 }
 0xa24   :  { %3368 = vmatpush.msrb.mxu3 %v3340_v1 }
 0xa25   :  { %3257 = vmatpush.msra.mxu0 %v3239_v7 }
 0xa26   :  { %3369 = vmatpush.msrb.mxu3 %v3339_v6 }
 0xa27   :  { %3258 = vmatpush.msra.mxu0 %v3238_v57 }
 0xa29   :  { %3259 = vmatpush.msra.mxu0 %v3237_v5 }
 0xa2b   :  { %3260 = vmatpush.msra.mxu0 %v3236_v24 }
 0xa2d   :  { %3261 = vmatpush.msra.mxu0 %v3235_v39 }
 0xa8b   :  { %v3044_v29 = vpop.f32.mrf.mxu0 }
 0xa8c   :  { %v3050_v58 = vadd.f32 %v3044_v29, %v4220_v25  ;;  %v3307_v25 = vld [vmem:[#allocation14 + $0x1f0] sm:$0xff] }
 0xa8e   :  { %v3064_v56 = vadd.f32 %v3057_v33, %v3050_v58 }
 0xa90   :  { %v3066_v14 = vmax.f32 %v3064_v56, 0.0 }
 0xa92   :  { %3069 = vst.msk [vmem:[#allocation2] sm:$0xff] %vm3068_vm2, %v3066_v14 }
 0xa93   :  { %v3047_v43 = vpop.f32.mrf.mxu0 }
 0xa94   :  { %v3051_v46 = vadd.f32 %v3047_v43, %v4222_v31  ;;  %v3305_v31 = vld [vmem:[#allocation14 + $0x1e0] sm:$0xff] }
 0xa96   :  { %v3065_v30 = vadd.f32 %v3062_v47, %v3051_v46 }
 0xa98   :  { %v3067_v49 = vmax.f32 %v3065_v30, 0.0 }
 0xa99   :  { %v3080_v37 = vld [vmem:[#allocation2 + $0x2] sm:$0x3]  ;;  %v3071_v12 = vld [vmem:[#allocation2] sm:$0x3]  ;;  %v3135_v28 = vld [vmem:[#allocation2 + $0x4] sm:$0x3] }
 0xa9a   :  { %3070 = vst.msk [vmem:[#allocation2 + $0x8] sm:$0xff] %vm3068_vm2, %v3067_v49  ;;  %3464 = vmatmul.msk.f32.vlgmr.msra.gmra.mxu2 %vm3068_vm2, %v3080_v37  ;;  %3465 = vmatmul.msk.f32.vlgmr.msrb.gmra.mxu0 %vm3068_vm2, %v3071_v12  ;;  %v3168_v59 = vld [vmem:[#allocation2 + $0x6] sm:$0x3] }
 0xa9b   :  { %3466 = vmatmul.msk.f32.vlgmr.msra.gmra.mxu1 %vm3068_vm2, %v3135_v28  ;;  %3320 = vmatpush.msra.mxu2 %v3308_v52 }
 0xa9d   :  { %3321 = vmatpush.msra.mxu2 %v3307_v25 }
 0xa9f   :  { %3322 = vmatpush.msra.mxu2 %v3306_v53 }
 0xaa1   :  { %3323 = vmatpush.msra.mxu2 %v3305_v31  ;;  %v3201_v34 = vld [vmem:[#allocation2 + $0x8] sm:$0x3]  ;;  %v3234_v63 = vld [vmem:[#allocation2 + $0xa] sm:$0x3]  ;;  %v3267_v27 = vld [vmem:[#allocation2 + $0xc] sm:$0x3] }
 0xaa2   :  { %3467 = vmatmul.msk.f32.vlgmr.msrb.gmra.mxu2 %vm3068_vm2, %v3168_v59  ;;  %3468 = vmatmul.msk.f32.vlgmr.msra.gmra.mxu3 %vm3068_vm2, %v3201_v34  ;;  %v3300_v23 = vld [vmem:[#allocation2 + $0xe] sm:$0x3] }
 0xaa3   :  { %3469 = vmatmul.msk.f32.vlgmr.msra.gmra.mxu0 %vm3068_vm2, %v3234_v63  ;;  %3470 = vmatmul.msk.f32.vlgmr.msrb.gmra.mxu1 %vm3068_vm2, %v3267_v27 }
 0xaa4   :  { %3324 = vmatpush.msra.mxu2 %v3304_v3 }
 0xaa6   :  { %3325 = vmatpush.msra.mxu2 %v3303_v40 }
 0xaa8   :  { %3326 = vmatpush.msra.mxu2 %v3302_v4 }
 0xaaa   :  { %3327 = vmatpush.msra.mxu2 %v3301_v45 }
 0xaab   :  { %3471 = vmatmul.msk.f32.vlgmr.msra.gmra.mxu2 %vm3068_vm2, %v3300_v23 }
 0xb17   :  { %v3132_v0 = vpop.f32.mrf.mxu0 }
 0xb18   :  { %v3164_v11 = vpop.f32.mrf.mxu1 }
 0xb1d   :  { %v3109_v42 = vpop.f32.mrf.mxu2 }
 0xb1e   :  { %v3133_v10 = vadd.f32 %v3132_v0, %v3109_v42 }
 0xb20   :  { %v3167_v13 = vadd.f32 %v3164_v11, %v3133_v10  ;;  %v3263_v16 = vpop.f32.mrf.mxu0  ;;  %v3296_v61 = vpop.f32.mrf.mxu1 }
 0xb25   :  { %v3197_v51 = vpop.f32.mrf.mxu2  ;;  %v3230_v41 = vpop.f32.mrf.mxu3 }
 0xb26   :  { %v3200_v15 = vadd.f32 %v3197_v51, %v3167_v13 }
 0xb28   :  { %v3233_v60 = vadd.f32 %v3230_v41, %v3200_v15 }
 0xb2a   :  { %v3266_v18 = vadd.f32 %v3263_v16, %v3233_v60 }
 0xb2c   :  { %v3299_v9 = vadd.f32 %v3296_v61, %v3266_v18 }
 0xb2e   :  { %v3329_v55 = vpop.f32.mrf.mxu2 }
 0xb2f   :  { %v3332_v7 = vadd.f32 %v3329_v55, %v3299_v9 }
 0xb31   :  { %v3337_v26 = vadd.f32 %v3491_v19, %v3332_v7 }
 0xb33   :  { %v3338_v50 = vmax.f32 %v3337_v26, 0.0 }
 0xb35   :  { %3472 = vmatmul.msk.f32.vlgmr.msrb.gmra.mxu3 %vm3068_vm2, %v3338_v50 }
 0xbb8   :  { %v3371_v57 = vpop.f32.mrf.mxu3 }
 0xbb9   :  { %v3372_v20 = vadd.f32 %v3492_v32, %v3371_v57 }
 0xbbb   :  { %v3375_v35 = vsel %vm3374_vm3, %v3372_v20, -inf }
 0xbbc   :  { %3376 = vmax.xlane.f32.xlu2 %v3375_v35 }
 0xc2f   :  { %v3377_v5 = vpop.xlane.xlu2 %3376 }
 0xc30   :  { %v3378_v22 = vsub.f32 %v3372_v20, %v3377_v5 }
 0xc32   :  { %v3379_v44 = vmul.f32 1.442695, %v3378_v22 }
 0xc34   :  { %3493 = vpow2.f32 %v3379_v44 }
 0xc3a   :  { %v3494_v24 = vpop.eup %3493 }
 0xc3b   :  { %v3381_v38 = vsel %vm3374_vm3, %v3494_v24, 0.0 }
 0xc3c   :  { %3382 = vadd.xlane.f32.xlu2 %v3381_v38 }
 0xcaf   :  { %v3383_v48 = vpop.xlane.xlu2 %3382 }
 0xcb0   :  { %3495 = vlog2.f32 %v3383_v48 }
 0xcb6   :  { %v3496_v39 = vpop.eup %3495 }
 0xcb7   :  { %v3385_v54 = vmul.f32 0.6931472, %v3496_v39 }
 0xcb9   :  { %v3386_v29 = vsub.f32 %v3378_v22, %v3385_v54 }
 0xcbb   :  { %3387 = vst.msk [vmem:[#allocation20] sm:$0x3] %vm3374_vm3, %v3386_v29 }
 0xcbc   :  { %3398 = dma.vmem_to_hbm [thread:$0]  %s3394_s4, 32, %s3396_s13, [#allocation5]  }
 0xcbd   :  { %3777 = dma.done.wait [#allocation5], 32  }
 0xcbe   :  { %3778 = vsyncadd [#allocation5], 4294967264 }
 0xcbf   :  { %3403 = vsyncpa [#allocation4], 1 }
 0xcc0   :  { %3404 = vsyncpa [#allocation7], 1 }
 0xcc1   :  { %3405 = vsyncpa [#allocation10], 1 }
 0xcc2   :  { %3406 = vsyncpa [#allocation13], 1 }
 0xcc3   :  { %3407 = vsyncpa [#allocation16], 1 }
 0xcc4   :  { %3408 = vsyncpa [#allocation19], 1 }
 0xcc5   :  { %3409 = vsyncpa [#allocation5], 1 }

</bundles_post_ra>
